<compile_context>
chip_gen: v7x
topology: tpu7x:2x2x1
jax: 0.10.0
libtpu: 0.0.40
codegen_flags: <defaults>
</compile_context>

<pallas_src>
import functools

import jax
import jax.numpy as jnp
from jax.experimental import pallas as pl
from jax.experimental.pallas import tpu as pltpu

TAU_INV = 0.5          # 1 / LIF tau (tau = 2)
BN_EPS = 1e-5          # nn.BatchNorm1d default eps
ATTN_SCALE = 0.125     # SSA.scale
MATMUL_DTYPE = jnp.bfloat16   # MXU operand dtype (f32 accumulation everywhere)
SPIKE_DTYPE = jnp.bfloat16    # spikes are exactly 0.0 / 1.0 -> lossless in bf16
VMEM_LIMIT = 32 * 1024 * 1024  # safe on v5e/v6e (128 MiB) and v7x (64 MiB)
TILE_BUDGET = 2 * 1024 * 1024  # max f32 bytes for the largest per-tile slab


def _pick_tile(m, t, cmax, budget_bytes=TILE_BUDGET):
    """Largest multiple-of-8 divisor of m whose (t, tm, cmax) f32 slab fits budget."""
    best = 0
    tm = 8
    while tm <= m:
        if m % tm == 0 and t * tm * cmax * 4 <= budget_bytes:
            best = tm
        tm += 8
    if best == 0:
        # TODO(synk): masked remainder tiles for M with no multiple-of-8 divisor.
        return m
    return best


# ---------------------------------------------------------------------------
# Kernel 1a: per-channel BN statistics (sum / sum-of-squares), accumulated
#            across the M grid axis ("arbitrary" -> output stays VMEM-resident)
# ---------------------------------------------------------------------------
def _bn_stats_kernel(x_ref, w_ref, stats_ref):
    # x_ref: (T, tm, Cin)   w_ref: (Cin, Cout)   stats_ref: (2, Cout) accumulator
    @pl.when(pl.program_id(0) == 0)
    def _():
        stats_ref[...] = jnp.zeros_like(stats_ref)

    t, tm, cin = x_ref.shape
    x = x_ref[...].reshape(t * tm, cin).astype(MATMUL_DTYPE)
    w = w_ref[...].astype(MATMUL_DTYPE)
    y = jnp.dot(x, w, preferred_element_type=jnp.float32)
    s = jnp.sum(y, axis=0, keepdims=True)
    ss = jnp.sum(y * y, axis=0, keepdims=True)
    stats_ref[...] += jnp.concatenate([s, ss], axis=0)


# ---------------------------------------------------------------------------
# Kernel 1b: matmul -> folded BN affine -> multi-step LIF (+ optional residual)
# ---------------------------------------------------------------------------
def _bn_lif_kernel(x_ref, w_ref, scale_ref, shift_ref, *rest, thr, has_residual):
    if has_residual:
        res_ref, o_ref = rest
    else:
        (o_ref,) = rest

    t, tm, cin = x_ref.shape
    cout = w_ref.shape[1]

    x = x_ref[...].reshape(t * tm, cin).astype(MATMUL_DTYPE)
    w = w_ref[...].astype(MATMUL_DTYPE)
    y = jnp.dot(x, w, preferred_element_type=jnp.float32)
    y = y * scale_ref[...] + shift_ref[...]          # BN folded into one affine
    y = y.reshape(t, tm, cout)

    # multi-step LIF: h = v + (y - v)/tau ; spike = h >= thr ; hard reset to 0.
    v = jnp.zeros((tm, cout), jnp.float32)
    for step in range(t):                            # T is small & static -> unrolled
        h = v + (y[step] - v) * TAU_INV
        fire = h >= thr
        s = jnp.where(fire, 1.0, 0.0)
        v = jnp.where(fire, 0.0, h)
        if has_residual:
            s = s + res_ref[step].astype(jnp.float32)
        o_ref[step] = s.astype(o_ref.dtype)


def linear_bn_lif(x, w, gamma, beta, *, residual=None, thr=1.0):
    """x: (T, M, Cin) -> (T, M, Cout).

    residual=None : returns LIF spikes in SPIKE_DTYPE (bf16, exactly 0/1).
    residual given: returns residual + spikes in float32 (residual fused in-kernel).
    """
    t, m, cin = x.shape
    cout = w.shape[1]
    tm = _pick_tile(m, t, max(cin, cout))
    grid_m = m // tm

    # ---- phase 1: global per-channel batch statistics -----------------------
    stats = pl.pallas_call(
        _bn_stats_kernel,
        out_shape=jax.ShapeDtypeStruct((2, cout), jnp.float32),
        grid=(grid_m,),
        in_specs=[
            pl.BlockSpec((t, tm, cin), lambda i: (0, i, 0)),
            pl.BlockSpec((cin, cout), lambda i: (0, 0)),
        ],
        out_specs=pl.BlockSpec((2, cout), lambda i: (0, 0)),
        compiler_params=pltpu.CompilerParams(
            dimension_semantics=("arbitrary",), vmem_limit_bytes=VMEM_LIMIT),
    )(x, w)

    count = jnp.float32(t * m)
    mean = stats[0] / count
    var = jnp.maximum(stats[1] / count - mean * mean, 0.0)   # biased, training mode
    scale = gamma * jax.lax.rsqrt(var + BN_EPS)
    shift = beta - mean * scale
    scale = scale.reshape(1, cout).astype(jnp.float32)
    shift = shift.reshape(1, cout).astype(jnp.float32)

    # ---- phase 2: normalize + LIF (+ residual), tiled over M ----------------
    has_res = residual is not None
    out_dtype = jnp.float32 if has_res else SPIKE_DTYPE
    kernel = functools.partial(_bn_lif_kernel, thr=thr, has_residual=has_res)

    in_specs = [
        pl.BlockSpec((t, tm, cin), lambda i: (0, i, 0)),
        pl.BlockSpec((cin, cout), lambda i: (0, 0)),
        pl.BlockSpec((1, cout), lambda i: (0, 0)),
        pl.BlockSpec((1, cout), lambda i: (0, 0)),
    ]
    args = [x, w, scale, shift]
    if has_res:
        in_specs.append(pl.BlockSpec((t, tm, cout), lambda i: (0, i, 0)))
        args.append(residual)

    bytes_accessed = (int(x.size) * x.dtype.itemsize
                      + int(w.size) * w.dtype.itemsize
                      + t * m * cout * (4 if has_res else 2))
    if has_res:
        bytes_accessed += int(residual.size) * residual.dtype.itemsize

    return pl.pallas_call(
        kernel,
        out_shape=jax.ShapeDtypeStruct((t, m, cout), out_dtype),
        grid=(grid_m,),
        in_specs=in_specs,
        out_specs=pl.BlockSpec((t, tm, cout), lambda i: (0, i, 0)),
        compiler_params=pltpu.CompilerParams(
            dimension_semantics=("parallel",), vmem_limit_bytes=VMEM_LIMIT),
        cost_estimate=pl.CostEstimate(
            flops=2 * t * m * cin * cout, transcendentals=0,
            bytes_accessed=int(bytes_accessed)),
    )(*args)


# ---------------------------------------------------------------------------
# Kernel 2: spiking self-attention, one batch per grid step, all heads inside.
#           Consumes the fused q|k|v spike tensor directly (lane-dense blocks).
# ---------------------------------------------------------------------------
def _ssa_attn_kernel(qkv_ref, o_ref, *, num_heads, dim, scale, thr):
    # qkv_ref: (T, 1, N, 3*dim) spikes (bf16)   o_ref: (T, 1, N, dim) spikes
    t = qkv_ref.shape[0]
    n = qkv_ref.shape[2]
    ch = dim // num_heads

    v_state = jnp.zeros((n, dim), jnp.float32)
    for step in range(t):                            # T static & small -> unrolled
        qkv_t = qkv_ref[step, 0]                     # (N, 3*dim)
        q_t = qkv_t[:, :dim]
        k_t = qkv_t[:, dim:2 * dim]
        v_t = qkv_t[:, 2 * dim:]
        parts = []
        for h in range(num_heads):                   # static per-head slices
            lo, hi = h * ch, (h + 1) * ch
            qh = q_t[:, lo:hi]
            kh = k_t[:, lo:hi]
            vh = v_t[:, lo:hi]
            # spikes are exact in bf16 -> bf16 MXU matmul, f32 accumulation
            attn = jnp.dot(qh, kh.T, preferred_element_type=jnp.float32) * scale
            # attn is not 0/1-valued -> keep the second matmul in f32
            parts.append(jnp.dot(attn, vh.astype(jnp.float32),
                                 preferred_element_type=jnp.float32))
        y = jnp.concatenate(parts, axis=-1)          # (N, dim), channel = h*ch + c

        # attn_lif: tau=2, v_threshold=0.5, hard reset to 0
        h_mem = v_state + (y - v_state) * TAU_INV
        fire = h_mem >= thr
        s = jnp.where(fire, 1.0, 0.0)
        v_state = jnp.where(fire, 0.0, h_mem)
        o_ref[step, 0] = s.astype(o_ref.dtype)


def ssa_attention(qkv_spk, *, num_heads, dim, scale=ATTN_SCALE, thr=0.5):
    """qkv_spk: (T, B, N, 3*dim) spikes -> attn_lif spikes (T, B, N, dim)."""
    t, b, n, three_c = qkv_spk.shape
    kernel = functools.partial(_ssa_attn_kernel, num_heads=num_heads, dim=dim,
                               scale=scale, thr=thr)
    return pl.pallas_call(
        kernel,
        out_shape=jax.ShapeDtypeStruct((t, b, n, dim), SPIKE_DTYPE),
        grid=(b,),
        in_specs=[pl.BlockSpec((t, 1, n, three_c), lambda i: (0, i, 0, 0))],
        out_specs=pl.BlockSpec((t, 1, n, dim), lambda i: (0, i, 0, 0)),
        compiler_params=pltpu.CompilerParams(
            dimension_semantics=("parallel",), vmem_limit_bytes=VMEM_LIMIT),
    )(qkv_spk)


# ---------------------------------------------------------------------------
# Module assembly (plain-JAX glue: only free reshapes + tiny param concats)
# ---------------------------------------------------------------------------
def ssa_forward(x, p, *, num_heads):
    t, b, n, c = x.shape
    ch = c // num_heads
    m = b * n
    xf = x.reshape(t, m, c)

    # fused q/k/v projection: one matmul against [Wq | Wk | Wv]  (C, 3C).
    qkv_w = jnp.concatenate([p["q_w"], p["k_w"], p["v_w"]], axis=1)
    qkv_g = jnp.concatenate([p["q_g"], p["k_g"], p["v_g"]], axis=0)
    qkv_beta = jnp.concatenate([p["q_beta"], p["k_beta"], p["v_beta"]], axis=0)
    qkv_spk = linear_bn_lif(xf, qkv_w, qkv_g, qkv_beta)          # (T, M, 3C) bf16

    attn_spk = ssa_attention(qkv_spk.reshape(t, b, n, 3 * c),
                             num_heads=num_heads, dim=c)         # (T, B, N, C) bf16

    # proj + BN + LIF with the residual x fused into the same kernel
    out = linear_bn_lif(attn_spk.reshape(t, m, c), p["proj_w"], p["proj_g"],
                        p["proj_beta"], residual=xf)             # (T, M, C) f32

    # SSA also returns the v spikes in head layout (T, B, H, N, C//H)
    v_spk = qkv_spk[..., 2 * c:]                                  # (T, M, C)
    v_ret = v_spk.reshape(t, b, n, num_heads, ch)
    v_ret = v_ret.transpose(0, 1, 3, 2, 4).astype(jnp.float32)
    return out.reshape(t, b, n, c), v_ret


def sew_block_linear(x, params, *, num_heads):
    t, b, n, c = x.shape
    m = b * n
    # x1 = x + SSA(x)   (residual fused into the proj kernel)
    x1, attn = ssa_forward(x, params, num_heads=num_heads)
    x1f = x1.reshape(t, m, c)
    # MLP: fc1 spikes, then fc2 with the second residual fused in-kernel
    h = linear_bn_lif(x1f, params["fc1_w"], params["fc1_g"], params["fc1_beta"])
    out = linear_bn_lif(h, params["fc2_w"], params["fc2_g"], params["fc2_beta"],
                        residual=x1f)                             # x1 + MLP(x1)
    return out.reshape(t, b, n, c), attn


# ---------------------------------------------------------------------------
# Deterministic parameter initialization (PyTorch-style shapes)
# Linear biases are omitted: BN mean subtraction cancels them exactly.
# ---------------------------------------------------------------------------
def _init_linear_w(key, cin, cout):
    bound = 1.0 / jnp.sqrt(jnp.float32(cin))
    return jax.random.uniform(key, (cin, cout), jnp.float32, -bound, bound)  # W^T layout


def init_params(key, dim, num_heads, mlp_ratio):
    hidden = int(dim * mlp_ratio)
    keys = jax.random.split(key, 6)
    layers = [
        ("q", keys[0], dim, dim),
        ("k", keys[1], dim, dim),
        ("v", keys[2], dim, dim),
        ("proj", keys[3], dim, dim),
        ("fc1", keys[4], dim, hidden),
        ("fc2", keys[5], hidden, dim),
    ]
    p = {}
    for name, k, cin, cout in layers:
        p[f"{name}_w"] = _init_linear_w(k, cin, cout)
        p[f"{name}_g"] = jnp.ones((cout,), jnp.float32)      # BN gamma (PyTorch default)
        p[f"{name}_beta"] = jnp.zeros((cout,), jnp.float32)  # BN beta  (PyTorch default)
    return p


# TODO(synk): BatchNorm running-stat updates (training side effect) are not
# reproduced; only the forward normalization with batch statistics is.

if __name__ == "__main__":
    T, B, N, C = 2, 2, 16, 32
    num_heads = 4
    mlp_ratio = 4.0

    key = jax.random.PRNGKey(0)
    kx, kp = jax.random.split(key)
    x = jax.random.normal(kx, (T, B, N, C), jnp.float32)
    params = init_params(kp, C, num_heads, mlp_ratio)

    fwd = jax.jit(functools.partial(sew_block_linear, num_heads=num_heads))
    y, attn = fwd(x, params)
    jax.block_until_ready((y, attn))

    assert y.shape == (T, B, N, C), y.shape
    assert attn.shape == (T, B, num_heads, N, C // num_heads), attn.shape
    assert bool(jnp.all(jnp.isfinite(y)))
    assert bool(jnp.all(jnp.isfinite(attn)))
    print("KERNEL_OK")
</pallas_src>

<mosaic_0001>
module attributes {stable_mosaic.version = 11 : i64} {
  func.func @_bn_lif_kernel(%arg0: i32, %arg1: memref<2x32x32xf32, #tpu.memory_space<vmem>>, %arg2: memref<32x96xf32, #tpu.memory_space<vmem>>, %arg3: memref<1x96xf32, #tpu.memory_space<vmem>>, %arg4: memref<1x96xf32, #tpu.memory_space<vmem>>, %arg5: memref<2x32x96xbf16, #tpu.memory_space<vmem>>) attributes {dimension_semantics = [#tpu.dimension_semantics<parallel>], iteration_bounds = array<i64: 1>, scalar_prefetch = 0 : i64, scratch_operands = 0 : i64, tpu.core_type = #tpu.core_type<tc>, window_params = [{transform_indices = @transform_0, window_bounds = array<i64: 2, 32, 32>}, {pipeline_mode = #tpu.pipeline_mode<synchronous>, transform_indices = @transform_1, window_bounds = array<i64: 32, 96>}, {pipeline_mode = #tpu.pipeline_mode<synchronous>, transform_indices = @transform_2, window_bounds = array<i64: 1, 96>}, {pipeline_mode = #tpu.pipeline_mode<synchronous>, transform_indices = @transform_3, window_bounds = array<i64: 1, 96>}, {transform_indices = @transform_4, window_bounds = array<i64: 2, 32, 96>}]} {
    %c0 = arith.constant 0 : index
    %c0_0 = arith.constant 0 : index
    %c0_1 = arith.constant 0 : index
    %0 = vector.load %arg1[%c0, %c0_0, %c0_1] : memref<2x32x32xf32, #tpu.memory_space<vmem>>, vector<2x32x32xf32>
    %1 = vector.shape_cast %0 : vector<2x32x32xf32> to vector<64x32xf32>
    %2 = arith.truncf %1 : vector<64x32xf32> to vector<64x32xbf16>
    %c0_2 = arith.constant 0 : index
    %c0_3 = arith.constant 0 : index
    %3 = vector.load %arg2[%c0_2, %c0_3] : memref<32x96xf32, #tpu.memory_space<vmem>>, vector<32x96xf32>
    %4 = arith.truncf %3 : vector<32x96xf32> to vector<32x96xbf16>
    %cst = arith.constant dense<0.000000e+00> : vector<64x96xf32>
    %5 = tpu.matmul %2, %4, %cst {dimension_numbers = #tpu.dot_dimension_numbers<[1], [0], [0], [1], [0, 0, 1, 1], [], []>} : vector<64x32xbf16>, vector<32x96xbf16>, vector<64x96xf32> -> vector<64x96xf32>
    %c0_4 = arith.constant 0 : index
    %c0_5 = arith.constant 0 : index
    %6 = vector.load %arg3[%c0_4, %c0_5] : memref<1x96xf32, #tpu.memory_space<vmem>>, vector<1x96xf32>
    %7 = vector.broadcast %6 : vector<1x96xf32> to vector<64x96xf32>
    %8 = arith.mulf %5, %7 : vector<64x96xf32>
    %c0_6 = arith.constant 0 : index
    %c0_7 = arith.constant 0 : index
    %9 = vector.load %arg4[%c0_6, %c0_7] : memref<1x96xf32, #tpu.memory_space<vmem>>, vector<1x96xf32>
    %10 = vector.broadcast %9 : vector<1x96xf32> to vector<64x96xf32>
    %11 = arith.addf %8, %10 : vector<64x96xf32>
    %12 = vector.shape_cast %11 : vector<64x96xf32> to vector<2x32x96xf32>
    %cst_8 = arith.constant 0.000000e+00 : f32
    %13 = vector.broadcast %cst_8 : f32 to vector<32x96xf32>
    %14 = vector.extract_strided_slice %12 {offsets = [0, 0, 0], sizes = [1, 32, 96], strides = [1, 1, 1]} : vector<2x32x96xf32> to vector<1x32x96xf32>
    %15 = vector.shape_cast %14 : vector<1x32x96xf32> to vector<32x96xf32>
    %16 = arith.subf %15, %13 : vector<32x96xf32>
    %cst_9 = arith.constant 5.000000e-01 : f32
    %17 = vector.broadcast %cst_9 : f32 to vector<32x96xf32>
    %18 = arith.mulf %16, %17 : vector<32x96xf32>
    %19 = arith.addf %13, %18 : vector<32x96xf32>
    %cst_10 = arith.constant 1.000000e+00 : f32
    %20 = vector.broadcast %cst_10 : f32 to vector<32x96xf32>
    %21 = arith.cmpf oge, %19, %20 : vector<32x96xf32>
    %cst_11 = arith.constant 1.000000e+00 : f32
    %cst_12 = arith.constant 0.000000e+00 : f32
    %22 = vector.broadcast %cst_11 : f32 to vector<32x96xf32>
    %23 = vector.broadcast %cst_12 : f32 to vector<32x96xf32>
    %24 = arith.select %21, %22, %23 : vector<32x96xi1>, vector<32x96xf32>
    %cst_13 = arith.constant 0.000000e+00 : f32
    %25 = vector.broadcast %cst_13 : f32 to vector<32x96xf32>
    %26 = arith.select %21, %25, %19 : vector<32x96xi1>, vector<32x96xf32>
    %27 = arith.truncf %24 : vector<32x96xf32> to vector<32x96xbf16>
    %c0_14 = arith.constant 0 : index
    %c0_15 = arith.constant 0 : index
    %c0_16 = arith.constant 0 : index
    %28 = vector.load %arg5[%c0_14, %c0_15, %c0_16] : memref<2x32x96xbf16, #tpu.memory_space<vmem>>, vector<1x32x96xbf16>
    %29 = vector.shape_cast %28 : vector<1x32x96xbf16> to vector<32x96xbf16>
    %30 = vector.shape_cast %27 : vector<32x96xbf16> to vector<1x32x96xbf16>
    tpu.vector_store %arg5[%c0_14, %c0_15, %c0_16], %30 {strides = array<i32>} : memref<2x32x96xbf16, #tpu.memory_space<vmem>>, vector<1x32x96xbf16>,
    %31 = vector.extract_strided_slice %12 {offsets = [1, 0, 0], sizes = [1, 32, 96], strides = [1, 1, 1]} : vector<2x32x96xf32> to vector<1x32x96xf32>
    %32 = vector.shape_cast %31 : vector<1x32x96xf32> to vector<32x96xf32>
    %33 = arith.subf %32, %26 : vector<32x96xf32>
    %cst_17 = arith.constant 5.000000e-01 : f32
    %34 = vector.broadcast %cst_17 : f32 to vector<32x96xf32>
    %35 = arith.mulf %33, %34 : vector<32x96xf32>
    %36 = arith.addf %26, %35 : vector<32x96xf32>
    %cst_18 = arith.constant 1.000000e+00 : f32
    %37 = vector.broadcast %cst_18 : f32 to vector<32x96xf32>
    %38 = arith.cmpf oge, %36, %37 : vector<32x96xf32>
    %cst_19 = arith.constant 1.000000e+00 : f32
    %cst_20 = arith.constant 0.000000e+00 : f32
    %39 = vector.broadcast %cst_19 : f32 to vector<32x96xf32>
    %40 = vector.broadcast %cst_20 : f32 to vector<32x96xf32>
    %41 = arith.select %38, %39, %40 : vector<32x96xi1>, vector<32x96xf32>
    %42 = arith.truncf %41 : vector<32x96xf32> to vector<32x96xbf16>
    %c1 = arith.constant 1 : index
    %c0_21 = arith.constant 0 : index
    %c0_22 = arith.constant 0 : index
    %43 = vector.load %arg5[%c1, %c0_21, %c0_22] : memref<2x32x96xbf16, #tpu.memory_space<vmem>>, vector<1x32x96xbf16>
    %44 = vector.shape_cast %43 : vector<1x32x96xbf16> to vector<32x96xbf16>
    %45 = vector.shape_cast %42 : vector<32x96xbf16> to vector<1x32x96xbf16>
    tpu.vector_store %arg5[%c1, %c0_21, %c0_22], %45 {strides = array<i32>} : memref<2x32x96xbf16, #tpu.memory_space<vmem>>, vector<1x32x96xbf16>,
    return
  }
  func.func @transform_0(%arg0: i32) -> (i32, i32, i32) {
    %c0_i32 = arith.constant 0 : i32
    %c0_i32_0 = arith.constant 0 : i32
    %c0_i32_1 = arith.constant 0 : i32
    return %c0_i32, %arg0, %c0_i32_0 : i32, i32, i32
  }
  func.func @transform_1(%arg0: i32) -> (i32, i32) {
    %c0_i32 = arith.constant 0 : i32
    %c0_i32_0 = arith.constant 0 : i32
    %c0_i32_1 = arith.constant 0 : i32
    return %c0_i32, %c0_i32_0 : i32, i32
  }
  func.func @transform_2(%arg0: i32) -> (i32, i32) {
    %c0_i32 = arith.constant 0 : i32
    %c0_i32_0 = arith.constant 0 : i32
    %c0_i32_1 = arith.constant 0 : i32
    return %c0_i32, %c0_i32_0 : i32, i32
  }
  func.func @transform_3(%arg0: i32) -> (i32, i32) {
    %c0_i32 = arith.constant 0 : i32
    %c0_i32_0 = arith.constant 0 : i32
    %c0_i32_1 = arith.constant 0 : i32
    return %c0_i32, %c0_i32_0 : i32, i32
  }
  func.func @transform_4(%arg0: i32) -> (i32, i32, i32) {
    %c0_i32 = arith.constant 0 : i32
    %c0_i32_0 = arith.constant 0 : i32
    %c0_i32_1 = arith.constant 0 : i32
    return %c0_i32, %arg0, %c0_i32_0 : i32, i32, i32
  }
}

module attributes {stable_mosaic.version = 11 : i64} {
  func.func @_bn_stats_kernel(%arg0: i32, %arg1: memref<2x32x32xf32, #tpu.memory_space<vmem>>, %arg2: memref<32x96xf32, #tpu.memory_space<vmem>>, %arg3: memref<2x96xf32, #tpu.memory_space<vmem>>) attributes {dimension_semantics = [#tpu.dimension_semantics<arbitrary>], iteration_bounds = array<i64: 1>, scalar_prefetch = 0 : i64, scratch_operands = 0 : i64, tpu.core_type = #tpu.core_type<tc>, window_params = [{transform_indices = @transform_0, window_bounds = array<i64: 2, 32, 32>}, {pipeline_mode = #tpu.pipeline_mode<synchronous>, transform_indices = @transform_1, window_bounds = array<i64: 32, 96>}, {pipeline_mode = #tpu.pipeline_mode<synchronous>, transform_indices = @transform_2, window_bounds = array<i64: 2, 96>}]} {
    %c0_i32 = arith.constant 0 : i32
    %0 = arith.cmpi eq, %arg0, %c0_i32 : i32
    %1 = arith.extui %0 : i1 to i32
    %c0_i32_0 = arith.constant 0 : i32
    %2 = arith.cmpi ne, %1, %c0_i32_0 : i32
    scf.if %2 {
      %cst_11 = arith.constant 0.000000e+00 : f32
      %18 = vector.broadcast %cst_11 : f32 to vector<2x96xf32>
      %c0_12 = arith.constant 0 : index
      %c0_13 = arith.constant 0 : index
      %19 = vector.load %arg3[%c0_12, %c0_13] : memref<2x96xf32, #tpu.memory_space<vmem>>, vector<2x96xf32>
      tpu.vector_store %arg3[%c0_12, %c0_13], %18 {strides = array<i32>} : memref<2x96xf32, #tpu.memory_space<vmem>>, vector<2x96xf32>,
    } else {
    }
    %c0 = arith.constant 0 : index
    %c0_1 = arith.constant 0 : index
    %c0_2 = arith.constant 0 : index
    %3 = vector.load %arg1[%c0, %c0_1, %c0_2] : memref<2x32x32xf32, #tpu.memory_space<vmem>>, vector<2x32x32xf32>
    %4 = vector.shape_cast %3 : vector<2x32x32xf32> to vector<64x32xf32>
    %5 = arith.truncf %4 : vector<64x32xf32> to vector<64x32xbf16>
    %c0_3 = arith.constant 0 : index
    %c0_4 = arith.constant 0 : index
    %6 = vector.load %arg2[%c0_3, %c0_4] : memref<32x96xf32, #tpu.memory_space<vmem>>, vector<32x96xf32>
    %7 = arith.truncf %6 : vector<32x96xf32> to vector<32x96xbf16>
    %cst = arith.constant dense<0.000000e+00> : vector<64x96xf32>
    %8 = tpu.matmul %5, %7, %cst {dimension_numbers = #tpu.dot_dimension_numbers<[1], [0], [0], [1], [0, 0, 1, 1], [], []>} : vector<64x32xbf16>, vector<32x96xbf16>, vector<64x96xf32> -> vector<64x96xf32>
    %cst_5 = arith.constant dense<0.000000e+00> : vector<96xf32>
    %9 = vector.multi_reduction <add>, %8, %cst_5 [0] : vector<64x96xf32> to vector<96xf32>
    %10 = vector.shape_cast %9 : vector<96xf32> to vector<1x96xf32>
    %11 = arith.mulf %8, %8 : vector<64x96xf32>
    %cst_6 = arith.constant dense<0.000000e+00> : vector<96xf32>
    %12 = vector.multi_reduction <add>, %11, %cst_6 [0] : vector<64x96xf32> to vector<96xf32>
    %13 = vector.shape_cast %12 : vector<96xf32> to vector<1x96xf32>
    %c0_7 = arith.constant 0 : index
    %c0_8 = arith.constant 0 : index
    %14 = vector.load %arg3[%c0_7, %c0_8] : memref<2x96xf32, #tpu.memory_space<vmem>>, vector<2x96xf32>
    %15 = tpu.concatenate %10, %13 in 0 : vector<1x96xf32>, vector<1x96xf32> -> vector<2x96xf32>
    %16 = arith.addf %14, %15 : vector<2x96xf32>
    %c0_9 = arith.constant 0 : index
    %c0_10 = arith.constant 0 : index
    %17 = vector.load %arg3[%c0_9, %c0_10] : memref<2x96xf32, #tpu.memory_space<vmem>>, vector<2x96xf32>
    tpu.vector_store %arg3[%c0_9, %c0_10], %16 {strides = array<i32>} : memref<2x96xf32, #tpu.memory_space<vmem>>, vector<2x96xf32>,
    return
  }
  func.func @transform_0(%arg0: i32) -> (i32, i32, i32) {
    %c0_i32 = arith.constant 0 : i32
    %c0_i32_0 = arith.constant 0 : i32
    %c0_i32_1 = arith.constant 0 : i32
    return %c0_i32, %arg0, %c0_i32_0 : i32, i32, i32
  }
  func.func @transform_1(%arg0: i32) -> (i32, i32) {
    %c0_i32 = arith.constant 0 : i32
    %c0_i32_0 = arith.constant 0 : i32
    %c0_i32_1 = arith.constant 0 : i32
    return %c0_i32, %c0_i32_0 : i32, i32
  }
  func.func @transform_2(%arg0: i32) -> (i32, i32) {
    %c0_i32 = arith.constant 0 : i32
    %c0_i32_0 = arith.constant 0 : i32
    %c0_i32_1 = arith.constant 0 : i32
    return %c0_i32, %c0_i32_0 : i32, i32
  }
}

module attributes {stable_mosaic.version = 11 : i64} {
  func.func @_bn_stats_kernel(%arg0: i32, %arg1: memref<2x32x32xbf16, #tpu.memory_space<vmem>>, %arg2: memref<32x32xf32, #tpu.memory_space<vmem>>, %arg3: memref<2x32xf32, #tpu.memory_space<vmem>>) attributes {dimension_semantics = [#tpu.dimension_semantics<arbitrary>], iteration_bounds = array<i64: 1>, scalar_prefetch = 0 : i64, scratch_operands = 0 : i64, tpu.core_type = #tpu.core_type<tc>, window_params = [{transform_indices = @transform_0, window_bounds = array<i64: 2, 32, 32>}, {pipeline_mode = #tpu.pipeline_mode<synchronous>, transform_indices = @transform_1, window_bounds = array<i64: 32, 32>}, {pipeline_mode = #tpu.pipeline_mode<synchronous>, transform_indices = @transform_2, window_bounds = array<i64: 2, 32>}]} {
    %c0_i32 = arith.constant 0 : i32
    %0 = arith.cmpi eq, %arg0, %c0_i32 : i32
    %1 = arith.extui %0 : i1 to i32
    %c0_i32_0 = arith.constant 0 : i32
    %2 = arith.cmpi ne, %1, %c0_i32_0 : i32
    scf.if %2 {
      %cst_11 = arith.constant 0.000000e+00 : f32
      %17 = vector.broadcast %cst_11 : f32 to vector<2x32xf32>
      %c0_12 = arith.constant 0 : index
      %c0_13 = arith.constant 0 : index
      %18 = vector.load %arg3[%c0_12, %c0_13] : memref<2x32xf32, #tpu.memory_space<vmem>>, vector<2x32xf32>
      tpu.vector_store %arg3[%c0_12, %c0_13], %17 {strides = array<i32>} : memref<2x32xf32, #tpu.memory_space<vmem>>, vector<2x32xf32>,
    } else {
    }
    %c0 = arith.constant 0 : index
    %c0_1 = arith.constant 0 : index
    %c0_2 = arith.constant 0 : index
    %3 = vector.load %arg1[%c0, %c0_1, %c0_2] : memref<2x32x32xbf16, #tpu.memory_space<vmem>>, vector<2x32x32xbf16>
    %4 = vector.shape_cast %3 : vector<2x32x32xbf16> to vector<64x32xbf16>
    %c0_3 = arith.constant 0 : index
    %c0_4 = arith.constant 0 : index
    %5 = vector.load %arg2[%c0_3, %c0_4] : memref<32x32xf32, #tpu.memory_space<vmem>>, vector<32x32xf32>
    %6 = arith.truncf %5 : vector<32x32xf32> to vector<32x32xbf16>
    %cst = arith.constant dense<0.000000e+00> : vector<64x32xf32>
    %7 = tpu.matmul %4, %6, %cst {dimension_numbers = #tpu.dot_dimension_numbers<[1], [0], [0], [1], [0, 0, 1, 1], [], []>} : vector<64x32xbf16>, vector<32x32xbf16>, vector<64x32xf32> -> vector<64x32xf32>
    %cst_5 = arith.constant dense<0.000000e+00> : vector<32xf32>
    %8 = vector.multi_reduction <add>, %7, %cst_5 [0] : vector<64x32xf32> to vector<32xf32>
    %9 = vector.shape_cast %8 : vector<32xf32> to vector<1x32xf32>
    %10 = arith.mulf %7, %7 : vector<64x32xf32>
    %cst_6 = arith.constant dense<0.000000e+00> : vector<32xf32>
    %11 = vector.multi_reduction <add>, %10, %cst_6 [0] : vector<64x32xf32> to vector<32xf32>
    %12 = vector.shape_cast %11 : vector<32xf32> to vector<1x32xf32>
    %c0_7 = arith.constant 0 : index
    %c0_8 = arith.constant 0 : index
    %13 = vector.load %arg3[%c0_7, %c0_8] : memref<2x32xf32, #tpu.memory_space<vmem>>, vector<2x32xf32>
    %14 = tpu.concatenate %9, %12 in 0 : vector<1x32xf32>, vector<1x32xf32> -> vector<2x32xf32>
    %15 = arith.addf %13, %14 : vector<2x32xf32>
    %c0_9 = arith.constant 0 : index
    %c0_10 = arith.constant 0 : index
    %16 = vector.load %arg3[%c0_9, %c0_10] : memref<2x32xf32, #tpu.memory_space<vmem>>, vector<2x32xf32>
    tpu.vector_store %arg3[%c0_9, %c0_10], %15 {strides = array<i32>} : memref<2x32xf32, #tpu.memory_space<vmem>>, vector<2x32xf32>,
    return
  }
  func.func @transform_0(%arg0: i32) -> (i32, i32, i32) {
    %c0_i32 = arith.constant 0 : i32
    %c0_i32_0 = arith.constant 0 : i32
    %c0_i32_1 = arith.constant 0 : i32
    return %c0_i32, %arg0, %c0_i32_0 : i32, i32, i32
  }
  func.func @transform_1(%arg0: i32) -> (i32, i32) {
    %c0_i32 = arith.constant 0 : i32
    %c0_i32_0 = arith.constant 0 : i32
    %c0_i32_1 = arith.constant 0 : i32
    return %c0_i32, %c0_i32_0 : i32, i32
  }
  func.func @transform_2(%arg0: i32) -> (i32, i32) {
    %c0_i32 = arith.constant 0 : i32
    %c0_i32_0 = arith.constant 0 : i32
    %c0_i32_1 = arith.constant 0 : i32
    return %c0_i32, %c0_i32_0 : i32, i32
  }
}

module attributes {stable_mosaic.version = 11 : i64} {
  func.func @_ssa_attn_kernel(%arg0: i32, %arg1: memref<2x1x16x96xbf16, #tpu.memory_space<vmem>>, %arg2: memref<2x1x16x32xbf16, #tpu.memory_space<vmem>>) attributes {dimension_semantics = [#tpu.dimension_semantics<parallel>], iteration_bounds = array<i64: 2>, scalar_prefetch = 0 : i64, scratch_operands = 0 : i64, tpu.core_type = #tpu.core_type<tc>, window_params = [{transform_indices = @transform_0, window_bounds = array<i64: 2, 1, 16, 96>}, {transform_indices = @transform_1, window_bounds = array<i64: 2, 1, 16, 32>}]} {
    %cst = arith.constant 0.000000e+00 : f32
    %0 = vector.broadcast %cst : f32 to vector<16x32xf32>
    %c0 = arith.constant 0 : index
    %c0_0 = arith.constant 0 : index
    %c0_1 = arith.constant 0 : index
    %c0_2 = arith.constant 0 : index
    %1 = vector.load %arg1[%c0, %c0_0, %c0_1, %c0_2] : memref<2x1x16x96xbf16, #tpu.memory_space<vmem>>, vector<1x1x16x96xbf16>
    %2 = vector.shape_cast %1 : vector<1x1x16x96xbf16> to vector<16x96xbf16>
    %3 = vector.extract_strided_slice %2 {offsets = [0, 0], sizes = [16, 32], strides = [1, 1]} : vector<16x96xbf16> to vector<16x32xbf16>
    %4 = vector.extract_strided_slice %2 {offsets = [0, 32], sizes = [16, 32], strides = [1, 1]} : vector<16x96xbf16> to vector<16x32xbf16>
    %5 = vector.extract_strided_slice %2 {offsets = [0, 64], sizes = [16, 32], strides = [1, 1]} : vector<16x96xbf16> to vector<16x32xbf16>
    %6 = vector.extract_strided_slice %3 {offsets = [0, 0], sizes = [16, 8], strides = [1, 1]} : vector<16x32xbf16> to vector<16x8xbf16>
    %7 = vector.extract_strided_slice %4 {offsets = [0, 0], sizes = [16, 8], strides = [1, 1]} : vector<16x32xbf16> to vector<16x8xbf16>
    %8 = vector.extract_strided_slice %5 {offsets = [0, 0], sizes = [16, 8], strides = [1, 1]} : vector<16x32xbf16> to vector<16x8xbf16>
    %9 = tpu.transpose %7, [1, 0] : vector<16x8xbf16> -> vector<8x16xbf16>
    %cst_3 = arith.constant dense<0.000000e+00> : vector<16x16xf32>
    %10 = tpu.matmul %6, %9, %cst_3 {dimension_numbers = #tpu.dot_dimension_numbers<[1], [0], [0], [1], [0, 0, 1, 1], [], []>} : vector<16x8xbf16>, vector<8x16xbf16>, vector<16x16xf32> -> vector<16x16xf32>
    %cst_4 = arith.constant 1.250000e-01 : f32
    %11 = vector.broadcast %cst_4 : f32 to vector<16x16xf32>
    %12 = arith.mulf %10, %11 : vector<16x16xf32>
    %13 = arith.extf %8 : vector<16x8xbf16> to vector<16x8xf32>
    %cst_5 = arith.constant dense<0.000000e+00> : vector<16x8xf32>
    %14 = tpu.matmul %12, %13, %cst_5 {dimension_numbers = #tpu.dot_dimension_numbers<[1], [0], [0], [1], [0, 0, 1, 1], [], []>} : vector<16x16xf32>, vector<16x8xf32>, vector<16x8xf32> -> vector<16x8xf32>
    %15 = vector.extract_strided_slice %3 {offsets = [0, 8], sizes = [16, 8], strides = [1, 1]} : vector<16x32xbf16> to vector<16x8xbf16>
    %16 = vector.extract_strided_slice %4 {offsets = [0, 8], sizes = [16, 8], strides = [1, 1]} : vector<16x32xbf16> to vector<16x8xbf16>
    %17 = vector.extract_strided_slice %5 {offsets = [0, 8], sizes = [16, 8], strides = [1, 1]} : vector<16x32xbf16> to vector<16x8xbf16>
    %18 = tpu.transpose %16, [1, 0] : vector<16x8xbf16> -> vector<8x16xbf16>
    %cst_6 = arith.constant dense<0.000000e+00> : vector<16x16xf32>
    %19 = tpu.matmul %15, %18, %cst_6 {dimension_numbers = #tpu.dot_dimension_numbers<[1], [0], [0], [1], [0, 0, 1, 1], [], []>} : vector<16x8xbf16>, vector<8x16xbf16>, vector<16x16xf32> -> vector<16x16xf32>
    %cst_7 = arith.constant 1.250000e-01 : f32
    %20 = vector.broadcast %cst_7 : f32 to vector<16x16xf32>
    %21 = arith.mulf %19, %20 : vector<16x16xf32>
    %22 = arith.extf %17 : vector<16x8xbf16> to vector<16x8xf32>
    %cst_8 = arith.constant dense<0.000000e+00> : vector<16x8xf32>
    %23 = tpu.matmul %21, %22, %cst_8 {dimension_numbers = #tpu.dot_dimension_numbers<[1], [0], [0], [1], [0, 0, 1, 1], [], []>} : vector<16x16xf32>, vector<16x8xf32>, vector<16x8xf32> -> vector<16x8xf32>
    %24 = vector.extract_strided_slice %3 {offsets = [0, 16], sizes = [16, 8], strides = [1, 1]} : vector<16x32xbf16> to vector<16x8xbf16>
    %25 = vector.extract_strided_slice %4 {offsets = [0, 16], sizes = [16, 8], strides = [1, 1]} : vector<16x32xbf16> to vector<16x8xbf16>
    %26 = vector.extract_strided_slice %5 {offsets = [0, 16], sizes = [16, 8], strides = [1, 1]} : vector<16x32xbf16> to vector<16x8xbf16>
    %27 = tpu.transpose %25, [1, 0] : vector<16x8xbf16> -> vector<8x16xbf16>
    %cst_9 = arith.constant dense<0.000000e+00> : vector<16x16xf32>
    %28 = tpu.matmul %24, %27, %cst_9 {dimension_numbers = #tpu.dot_dimension_numbers<[1], [0], [0], [1], [0, 0, 1, 1], [], []>} : vector<16x8xbf16>, vector<8x16xbf16>, vector<16x16xf32> -> vector<16x16xf32>
    %cst_10 = arith.constant 1.250000e-01 : f32
    %29 = vector.broadcast %cst_10 : f32 to vector<16x16xf32>
    %30 = arith.mulf %28, %29 : vector<16x16xf32>
    %31 = arith.extf %26 : vector<16x8xbf16> to vector<16x8xf32>
    %cst_11 = arith.constant dense<0.000000e+00> : vector<16x8xf32>
    %32 = tpu.matmul %30, %31, %cst_11 {dimension_numbers = #tpu.dot_dimension_numbers<[1], [0], [0], [1], [0, 0, 1, 1], [], []>} : vector<16x16xf32>, vector<16x8xf32>, vector<16x8xf32> -> vector<16x8xf32>
    %33 = vector.extract_strided_slice %3 {offsets = [0, 24], sizes = [16, 8], strides = [1, 1]} : vector<16x32xbf16> to vector<16x8xbf16>
    %34 = vector.extract_strided_slice %4 {offsets = [0, 24], sizes = [16, 8], strides = [1, 1]} : vector<16x32xbf16> to vector<16x8xbf16>
    %35 = vector.extract_strided_slice %5 {offsets = [0, 24], sizes = [16, 8], strides = [1, 1]} : vector<16x32xbf16> to vector<16x8xbf16>
    %36 = tpu.transpose %34, [1, 0] : vector<16x8xbf16> -> vector<8x16xbf16>
    %cst_12 = arith.constant dense<0.000000e+00> : vector<16x16xf32>
    %37 = tpu.matmul %33, %36, %cst_12 {dimension_numbers = #tpu.dot_dimension_numbers<[1], [0], [0], [1], [0, 0, 1, 1], [], []>} : vector<16x8xbf16>, vector<8x16xbf16>, vector<16x16xf32> -> vector<16x16xf32>
    %cst_13 = arith.constant 1.250000e-01 : f32
    %38 = vector.broadcast %cst_13 : f32 to vector<16x16xf32>
    %39 = arith.mulf %37, %38 : vector<16x16xf32>
    %40 = arith.extf %35 : vector<16x8xbf16> to vector<16x8xf32>
    %cst_14 = arith.constant dense<0.000000e+00> : vector<16x8xf32>
    %41 = tpu.matmul %39, %40, %cst_14 {dimension_numbers = #tpu.dot_dimension_numbers<[1], [0], [0], [1], [0, 0, 1, 1], [], []>} : vector<16x16xf32>, vector<16x8xf32>, vector<16x8xf32> -> vector<16x8xf32>
    %42 = tpu.concatenate %14, %23, %32, %41 in 1 : vector<16x8xf32>, vector<16x8xf32>, vector<16x8xf32>, vector<16x8xf32> -> vector<16x32xf32>
    %43 = arith.subf %42, %0 : vector<16x32xf32>
    %cst_15 = arith.constant 5.000000e-01 : f32
    %44 = vector.broadcast %cst_15 : f32 to vector<16x32xf32>
    %45 = arith.mulf %43, %44 : vector<16x32xf32>
    %46 = arith.addf %0, %45 : vector<16x32xf32>
    %cst_16 = arith.constant 5.000000e-01 : f32
    %47 = vector.broadcast %cst_16 : f32 to vector<16x32xf32>
    %48 = arith.cmpf oge, %46, %47 : vector<16x32xf32>
    %cst_17 = arith.constant 1.000000e+00 : f32
    %cst_18 = arith.constant 0.000000e+00 : f32
    %49 = vector.broadcast %cst_17 : f32 to vector<16x32xf32>
    %50 = vector.broadcast %cst_18 : f32 to vector<16x32xf32>
    %51 = arith.select %48, %49, %50 : vector<16x32xi1>, vector<16x32xf32>
    %cst_19 = arith.constant 0.000000e+00 : f32
    %52 = vector.broadcast %cst_19 : f32 to vector<16x32xf32>
    %53 = arith.select %48, %52, %46 : vector<16x32xi1>, vector<16x32xf32>
    %54 = arith.truncf %51 : vector<16x32xf32> to vector<16x32xbf16>
    %c0_20 = arith.constant 0 : index
    %c0_21 = arith.constant 0 : index
    %c0_22 = arith.constant 0 : index
    %c0_23 = arith.constant 0 : index
    %55 = vector.load %arg2[%c0_20, %c0_21, %c0_22, %c0_23] : memref<2x1x16x32xbf16, #tpu.memory_space<vmem>>, vector<1x1x16x32xbf16>
    %56 = vector.shape_cast %55 : vector<1x1x16x32xbf16> to vector<16x32xbf16>
    %57 = vector.shape_cast %54 : vector<16x32xbf16> to vector<1x1x16x32xbf16>
    tpu.vector_store %arg2[%c0_20, %c0_21, %c0_22, %c0_23], %57 {strides = array<i32>} : memref<2x1x16x32xbf16, #tpu.memory_space<vmem>>, vector<1x1x16x32xbf16>,
    %c1 = arith.constant 1 : index
    %c0_24 = arith.constant 0 : index
    %c0_25 = arith.constant 0 : index
    %c0_26 = arith.constant 0 : index
    %58 = vector.load %arg1[%c1, %c0_24, %c0_25, %c0_26] : memref<2x1x16x96xbf16, #tpu.memory_space<vmem>>, vector<1x1x16x96xbf16>
    %59 = vector.shape_cast %58 : vector<1x1x16x96xbf16> to vector<16x96xbf16>
    %60 = vector.extract_strided_slice %59 {offsets = [0, 0], sizes = [16, 32], strides = [1, 1]} : vector<16x96xbf16> to vector<16x32xbf16>
    %61 = vector.extract_strided_slice %59 {offsets = [0, 32], sizes = [16, 32], strides = [1, 1]} : vector<16x96xbf16> to vector<16x32xbf16>
    %62 = vector.extract_strided_slice %59 {offsets = [0, 64], sizes = [16, 32], strides = [1, 1]} : vector<16x96xbf16> to vector<16x32xbf16>
    %63 = vector.extract_strided_slice %60 {offsets = [0, 0], sizes = [16, 8], strides = [1, 1]} : vector<16x32xbf16> to vector<16x8xbf16>
    %64 = vector.extract_strided_slice %61 {offsets = [0, 0], sizes = [16, 8], strides = [1, 1]} : vector<16x32xbf16> to vector<16x8xbf16>
    %65 = vector.extract_strided_slice %62 {offsets = [0, 0], sizes = [16, 8], strides = [1, 1]} : vector<16x32xbf16> to vector<16x8xbf16>
    %66 = tpu.transpose %64, [1, 0] : vector<16x8xbf16> -> vector<8x16xbf16>
    %cst_27 = arith.constant dense<0.000000e+00> : vector<16x16xf32>
    %67 = tpu.matmul %63, %66, %cst_27 {dimension_numbers = #tpu.dot_dimension_numbers<[1], [0], [0], [1], [0, 0, 1, 1], [], []>} : vector<16x8xbf16>, vector<8x16xbf16>, vector<16x16xf32> -> vector<16x16xf32>
    %cst_28 = arith.constant 1.250000e-01 : f32
    %68 = vector.broadcast %cst_28 : f32 to vector<16x16xf32>
    %69 = arith.mulf %67, %68 : vector<16x16xf32>
    %70 = arith.extf %65 : vector<16x8xbf16> to vector<16x8xf32>
    %cst_29 = arith.constant dense<0.000000e+00> : vector<16x8xf32>
    %71 = tpu.matmul %69, %70, %cst_29 {dimension_numbers = #tpu.dot_dimension_numbers<[1], [0], [0], [1], [0, 0, 1, 1], [], []>} : vector<16x16xf32>, vector<16x8xf32>, vector<16x8xf32> -> vector<16x8xf32>
    %72 = vector.extract_strided_slice %60 {offsets = [0, 8], sizes = [16, 8], strides = [1, 1]} : vector<16x32xbf16> to vector<16x8xbf16>
    %73 = vector.extract_strided_slice %61 {offsets = [0, 8], sizes = [16, 8], strides = [1, 1]} : vector<16x32xbf16> to vector<16x8xbf16>
    %74 = vector.extract_strided_slice %62 {offsets = [0, 8], sizes = [16, 8], strides = [1, 1]} : vector<16x32xbf16> to vector<16x8xbf16>
    %75 = tpu.transpose %73, [1, 0] : vector<16x8xbf16> -> vector<8x16xbf16>
    %cst_30 = arith.constant dense<0.000000e+00> : vector<16x16xf32>
    %76 = tpu.matmul %72, %75, %cst_30 {dimension_numbers = #tpu.dot_dimension_numbers<[1], [0], [0], [1], [0, 0, 1, 1], [], []>} : vector<16x8xbf16>, vector<8x16xbf16>, vector<16x16xf32> -> vector<16x16xf32>
    %cst_31 = arith.constant 1.250000e-01 : f32
    %77 = vector.broadcast %cst_31 : f32 to vector<16x16xf32>
    %78 = arith.mulf %76, %77 : vector<16x16xf32>
    %79 = arith.extf %74 : vector<16x8xbf16> to vector<16x8xf32>
    %cst_32 = arith.constant dense<0.000000e+00> : vector<16x8xf32>
    %80 = tpu.matmul %78, %79, %cst_32 {dimension_numbers = #tpu.dot_dimension_numbers<[1], [0], [0], [1], [0, 0, 1, 1], [], []>} : vector<16x16xf32>, vector<16x8xf32>, vector<16x8xf32> -> vector<16x8xf32>
    %81 = vector.extract_strided_slice %60 {offsets = [0, 16], sizes = [16, 8], strides = [1, 1]} : vector<16x32xbf16> to vector<16x8xbf16>
    %82 = vector.extract_strided_slice %61 {offsets = [0, 16], sizes = [16, 8], strides = [1, 1]} : vector<16x32xbf16> to vector<16x8xbf16>
    %83 = vector.extract_strided_slice %62 {offsets = [0, 16], sizes = [16, 8], strides = [1, 1]} : vector<16x32xbf16> to vector<16x8xbf16>
    %84 = tpu.transpose %82, [1, 0] : vector<16x8xbf16> -> vector<8x16xbf16>
    %cst_33 = arith.constant dense<0.000000e+00> : vector<16x16xf32>
    %85 = tpu.matmul %81, %84, %cst_33 {dimension_numbers = #tpu.dot_dimension_numbers<[1], [0], [0], [1], [0, 0, 1, 1], [], []>} : vector<16x8xbf16>, vector<8x16xbf16>, vector<16x16xf32> -> vector<16x16xf32>
    %cst_34 = arith.constant 1.250000e-01 : f32
    %86 = vector.broadcast %cst_34 : f32 to vector<16x16xf32>
    %87 = arith.mulf %85, %86 : vector<16x16xf32>
    %88 = arith.extf %83 : vector<16x8xbf16> to vector<16x8xf32>
    %cst_35 = arith.constant dense<0.000000e+00> : vector<16x8xf32>
    %89 = tpu.matmul %87, %88, %cst_35 {dimension_numbers = #tpu.dot_dimension_numbers<[1], [0], [0], [1], [0, 0, 1, 1], [], []>} : vector<16x16xf32>, vector<16x8xf32>, vector<16x8xf32> -> vector<16x8xf32>
    %90 = vector.extract_strided_slice %60 {offsets = [0, 24], sizes = [16, 8], strides = [1, 1]} : vector<16x32xbf16> to vector<16x8xbf16>
    %91 = vector.extract_strided_slice %61 {offsets = [0, 24], sizes = [16, 8], strides = [1, 1]} : vector<16x32xbf16> to vector<16x8xbf16>
    %92 = vector.extract_strided_slice %62 {offsets = [0, 24], sizes = [16, 8], strides = [1, 1]} : vector<16x32xbf16> to vector<16x8xbf16>
    %93 = tpu.transpose %91, [1, 0] : vector<16x8xbf16> -> vector<8x16xbf16>
    %cst_36 = arith.constant dense<0.000000e+00> : vector<16x16xf32>
    %94 = tpu.matmul %90, %93, %cst_36 {dimension_numbers = #tpu.dot_dimension_numbers<[1], [0], [0], [1], [0, 0, 1, 1], [], []>} : vector<16x8xbf16>, vector<8x16xbf16>, vector<16x16xf32> -> vector<16x16xf32>
    %cst_37 = arith.constant 1.250000e-01 : f32
    %95 = vector.broadcast %cst_37 : f32 to vector<16x16xf32>
    %96 = arith.mulf %94, %95 : vector<16x16xf32>
    %97 = arith.extf %92 : vector<16x8xbf16> to vector<16x8xf32>
    %cst_38 = arith.constant dense<0.000000e+00> : vector<16x8xf32>
    %98 = tpu.matmul %96, %97, %cst_38 {dimension_numbers = #tpu.dot_dimension_numbers<[1], [0], [0], [1], [0, 0, 1, 1], [], []>} : vector<16x16xf32>, vector<16x8xf32>, vector<16x8xf32> -> vector<16x8xf32>
    %99 = tpu.concatenate %71, %80, %89, %98 in 1 : vector<16x8xf32>, vector<16x8xf32>, vector<16x8xf32>, vector<16x8xf32> -> vector<16x32xf32>
    %100 = arith.subf %99, %53 : vector<16x32xf32>
    %cst_39 = arith.constant 5.000000e-01 : f32
    %101 = vector.broadcast %cst_39 : f32 to vector<16x32xf32>
    %102 = arith.mulf %100, %101 : vector<16x32xf32>
    %103 = arith.addf %53, %102 : vector<16x32xf32>
    %cst_40 = arith.constant 5.000000e-01 : f32
    %104 = vector.broadcast %cst_40 : f32 to vector<16x32xf32>
    %105 = arith.cmpf oge, %103, %104 : vector<16x32xf32>
    %cst_41 = arith.constant 1.000000e+00 : f32
    %cst_42 = arith.constant 0.000000e+00 : f32
    %106 = vector.broadcast %cst_41 : f32 to vector<16x32xf32>
    %107 = vector.broadcast %cst_42 : f32 to vector<16x32xf32>
    %108 = arith.select %105, %106, %107 : vector<16x32xi1>, vector<16x32xf32>
    %109 = arith.truncf %108 : vector<16x32xf32> to vector<16x32xbf16>
    %c1_43 = arith.constant 1 : index
    %c0_44 = arith.constant 0 : index
    %c0_45 = arith.constant 0 : index
    %c0_46 = arith.constant 0 : index
    %110 = vector.load %arg2[%c1_43, %c0_44, %c0_45, %c0_46] : memref<2x1x16x32xbf16, #tpu.memory_space<vmem>>, vector<1x1x16x32xbf16>
    %111 = vector.shape_cast %110 : vector<1x1x16x32xbf16> to vector<16x32xbf16>
    %112 = vector.shape_cast %109 : vector<16x32xbf16> to vector<1x1x16x32xbf16>
    tpu.vector_store %arg2[%c1_43, %c0_44, %c0_45, %c0_46], %112 {strides = array<i32>} : memref<2x1x16x32xbf16, #tpu.memory_space<vmem>>, vector<1x1x16x32xbf16>,
    return
  }
  func.func @transform_0(%arg0: i32) -> (i32, i32, i32, i32) {
    %c0_i32 = arith.constant 0 : i32
    %c0_i32_0 = arith.constant 0 : i32
    %c0_i32_1 = arith.constant 0 : i32
    %c0_i32_2 = arith.constant 0 : i32
    return %c0_i32, %arg0, %c0_i32_0, %c0_i32_1 : i32, i32, i32, i32
  }
  func.func @transform_1(%arg0: i32) -> (i32, i32, i32, i32) {
    %c0_i32 = arith.constant 0 : i32
    %c0_i32_0 = arith.constant 0 : i32
    %c0_i32_1 = arith.constant 0 : i32
    %c0_i32_2 = arith.constant 0 : i32
    return %c0_i32, %arg0, %c0_i32_0, %c0_i32_1 : i32, i32, i32, i32
  }
}

module attributes {stable_mosaic.version = 11 : i64} {
  func.func @_bn_lif_kernel(%arg0: i32, %arg1: memref<2x32x32xbf16, #tpu.memory_space<vmem>>, %arg2: memref<32x32xf32, #tpu.memory_space<vmem>>, %arg3: memref<1x32xf32, #tpu.memory_space<vmem>>, %arg4: memref<1x32xf32, #tpu.memory_space<vmem>>, %arg5: memref<2x32x32xf32, #tpu.memory_space<vmem>>, %arg6: memref<2x32x32xf32, #tpu.memory_space<vmem>>) attributes {dimension_semantics = [#tpu.dimension_semantics<parallel>], iteration_bounds = array<i64: 1>, scalar_prefetch = 0 : i64, scratch_operands = 0 : i64, tpu.core_type = #tpu.core_type<tc>, window_params = [{transform_indices = @transform_0, window_bounds = array<i64: 2, 32, 32>}, {pipeline_mode = #tpu.pipeline_mode<synchronous>, transform_indices = @transform_1, window_bounds = array<i64: 32, 32>}, {pipeline_mode = #tpu.pipeline_mode<synchronous>, transform_indices = @transform_2, window_bounds = array<i64: 1, 32>}, {pipeline_mode = #tpu.pipeline_mode<synchronous>, transform_indices = @transform_3, window_bounds = array<i64: 1, 32>}, {transform_indices = @transform_4, window_bounds = array<i64: 2, 32, 32>}, {transform_indices = @transform_5, window_bounds = array<i64: 2, 32, 32>}]} {
    %c0 = arith.constant 0 : index
    %c0_0 = arith.constant 0 : index
    %c0_1 = arith.constant 0 : index
    %0 = vector.load %arg1[%c0, %c0_0, %c0_1] : memref<2x32x32xbf16, #tpu.memory_space<vmem>>, vector<2x32x32xbf16>
    %1 = vector.shape_cast %0 : vector<2x32x32xbf16> to vector<64x32xbf16>
    %c0_2 = arith.constant 0 : index
    %c0_3 = arith.constant 0 : index
    %2 = vector.load %arg2[%c0_2, %c0_3] : memref<32x32xf32, #tpu.memory_space<vmem>>, vector<32x32xf32>
    %3 = arith.truncf %2 : vector<32x32xf32> to vector<32x32xbf16>
    %cst = arith.constant dense<0.000000e+00> : vector<64x32xf32>
    %4 = tpu.matmul %1, %3, %cst {dimension_numbers = #tpu.dot_dimension_numbers<[1], [0], [0], [1], [0, 0, 1, 1], [], []>} : vector<64x32xbf16>, vector<32x32xbf16>, vector<64x32xf32> -> vector<64x32xf32>
    %c0_4 = arith.constant 0 : index
    %c0_5 = arith.constant 0 : index
    %5 = vector.load %arg3[%c0_4, %c0_5] : memref<1x32xf32, #tpu.memory_space<vmem>>, vector<1x32xf32>
    %6 = vector.broadcast %5 : vector<1x32xf32> to vector<64x32xf32>
    %7 = arith.mulf %4, %6 : vector<64x32xf32>
    %c0_6 = arith.constant 0 : index
    %c0_7 = arith.constant 0 : index
    %8 = vector.load %arg4[%c0_6, %c0_7] : memref<1x32xf32, #tpu.memory_space<vmem>>, vector<1x32xf32>
    %9 = vector.broadcast %8 : vector<1x32xf32> to vector<64x32xf32>
    %10 = arith.addf %7, %9 : vector<64x32xf32>
    %11 = vector.shape_cast %10 : vector<64x32xf32> to vector<2x32x32xf32>
    %cst_8 = arith.constant 0.000000e+00 : f32
    %12 = vector.broadcast %cst_8 : f32 to vector<32x32xf32>
    %13 = vector.extract_strided_slice %11 {offsets = [0, 0, 0], sizes = [1, 32, 32], strides = [1, 1, 1]} : vector<2x32x32xf32> to vector<1x32x32xf32>
    %14 = vector.shape_cast %13 : vector<1x32x32xf32> to vector<32x32xf32>
    %15 = arith.subf %14, %12 : vector<32x32xf32>
    %cst_9 = arith.constant 5.000000e-01 : f32
    %16 = vector.broadcast %cst_9 : f32 to vector<32x32xf32>
    %17 = arith.mulf %15, %16 : vector<32x32xf32>
    %18 = arith.addf %12, %17 : vector<32x32xf32>
    %cst_10 = arith.constant 1.000000e+00 : f32
    %19 = vector.broadcast %cst_10 : f32 to vector<32x32xf32>
    %20 = arith.cmpf oge, %18, %19 : vector<32x32xf32>
    %cst_11 = arith.constant 1.000000e+00 : f32
    %cst_12 = arith.constant 0.000000e+00 : f32
    %21 = vector.broadcast %cst_11 : f32 to vector<32x32xf32>
    %22 = vector.broadcast %cst_12 : f32 to vector<32x32xf32>
    %23 = arith.select %20, %21, %22 : vector<32x32xi1>, vector<32x32xf32>
    %cst_13 = arith.constant 0.000000e+00 : f32
    %24 = vector.broadcast %cst_13 : f32 to vector<32x32xf32>
    %25 = arith.select %20, %24, %18 : vector<32x32xi1>, vector<32x32xf32>
    %c0_14 = arith.constant 0 : index
    %c0_15 = arith.constant 0 : index
    %c0_16 = arith.constant 0 : index
    %26 = vector.load %arg5[%c0_14, %c0_15, %c0_16] : memref<2x32x32xf32, #tpu.memory_space<vmem>>, vector<1x32x32xf32>
    %27 = vector.shape_cast %26 : vector<1x32x32xf32> to vector<32x32xf32>
    %28 = arith.addf %23, %27 : vector<32x32xf32>
    %c0_17 = arith.constant 0 : index
    %c0_18 = arith.constant 0 : index
    %c0_19 = arith.constant 0 : index
    %29 = vector.load %arg6[%c0_17, %c0_18, %c0_19] : memref<2x32x32xf32, #tpu.memory_space<vmem>>, vector<1x32x32xf32>
    %30 = vector.shape_cast %29 : vector<1x32x32xf32> to vector<32x32xf32>
    %31 = vector.shape_cast %28 : vector<32x32xf32> to vector<1x32x32xf32>
    tpu.vector_store %arg6[%c0_17, %c0_18, %c0_19], %31 {strides = array<i32>} : memref<2x32x32xf32, #tpu.memory_space<vmem>>, vector<1x32x32xf32>,
    %32 = vector.extract_strided_slice %11 {offsets = [1, 0, 0], sizes = [1, 32, 32], strides = [1, 1, 1]} : vector<2x32x32xf32> to vector<1x32x32xf32>
    %33 = vector.shape_cast %32 : vector<1x32x32xf32> to vector<32x32xf32>
    %34 = arith.subf %33, %25 : vector<32x32xf32>
    %cst_20 = arith.constant 5.000000e-01 : f32
    %35 = vector.broadcast %cst_20 : f32 to vector<32x32xf32>
    %36 = arith.mulf %34, %35 : vector<32x32xf32>
    %37 = arith.addf %25, %36 : vector<32x32xf32>
    %cst_21 = arith.constant 1.000000e+00 : f32
    %38 = vector.broadcast %cst_21 : f32 to vector<32x32xf32>
    %39 = arith.cmpf oge, %37, %38 : vector<32x32xf32>
    %cst_22 = arith.constant 1.000000e+00 : f32
    %cst_23 = arith.constant 0.000000e+00 : f32
    %40 = vector.broadcast %cst_22 : f32 to vector<32x32xf32>
    %41 = vector.broadcast %cst_23 : f32 to vector<32x32xf32>
    %42 = arith.select %39, %40, %41 : vector<32x32xi1>, vector<32x32xf32>
    %c1 = arith.constant 1 : index
    %c0_24 = arith.constant 0 : index
    %c0_25 = arith.constant 0 : index
    %43 = vector.load %arg5[%c1, %c0_24, %c0_25] : memref<2x32x32xf32, #tpu.memory_space<vmem>>, vector<1x32x32xf32>
    %44 = vector.shape_cast %43 : vector<1x32x32xf32> to vector<32x32xf32>
    %45 = arith.addf %42, %44 : vector<32x32xf32>
    %c1_26 = arith.constant 1 : index
    %c0_27 = arith.constant 0 : index
    %c0_28 = arith.constant 0 : index
    %46 = vector.load %arg6[%c1_26, %c0_27, %c0_28] : memref<2x32x32xf32, #tpu.memory_space<vmem>>, vector<1x32x32xf32>
    %47 = vector.shape_cast %46 : vector<1x32x32xf32> to vector<32x32xf32>
    %48 = vector.shape_cast %45 : vector<32x32xf32> to vector<1x32x32xf32>
    tpu.vector_store %arg6[%c1_26, %c0_27, %c0_28], %48 {strides = array<i32>} : memref<2x32x32xf32, #tpu.memory_space<vmem>>, vector<1x32x32xf32>,
    return
  }
  func.func @transform_0(%arg0: i32) -> (i32, i32, i32) {
    %c0_i32 = arith.constant 0 : i32
    %c0_i32_0 = arith.constant 0 : i32
    %c0_i32_1 = arith.constant 0 : i32
    return %c0_i32, %arg0, %c0_i32_0 : i32, i32, i32
  }
  func.func @transform_1(%arg0: i32) -> (i32, i32) {
    %c0_i32 = arith.constant 0 : i32
    %c0_i32_0 = arith.constant 0 : i32
    %c0_i32_1 = arith.constant 0 : i32
    return %c0_i32, %c0_i32_0 : i32, i32
  }
  func.func @transform_2(%arg0: i32) -> (i32, i32) {
    %c0_i32 = arith.constant 0 : i32
    %c0_i32_0 = arith.constant 0 : i32
    %c0_i32_1 = arith.constant 0 : i32
    return %c0_i32, %c0_i32_0 : i32, i32
  }
  func.func @transform_3(%arg0: i32) -> (i32, i32) {
    %c0_i32 = arith.constant 0 : i32
    %c0_i32_0 = arith.constant 0 : i32
    %c0_i32_1 = arith.constant 0 : i32
    return %c0_i32, %c0_i32_0 : i32, i32
  }
  func.func @transform_4(%arg0: i32) -> (i32, i32, i32) {
    %c0_i32 = arith.constant 0 : i32
    %c0_i32_0 = arith.constant 0 : i32
    %c0_i32_1 = arith.constant 0 : i32
    return %c0_i32, %arg0, %c0_i32_0 : i32, i32, i32
  }
  func.func @transform_5(%arg0: i32) -> (i32, i32, i32) {
    %c0_i32 = arith.constant 0 : i32
    %c0_i32_0 = arith.constant 0 : i32
    %c0_i32_1 = arith.constant 0 : i32
    return %c0_i32, %arg0, %c0_i32_0 : i32, i32, i32
  }
}

module attributes {stable_mosaic.version = 11 : i64} {
  func.func @_bn_stats_kernel(%arg0: i32, %arg1: memref<2x32x32xf32, #tpu.memory_space<vmem>>, %arg2: memref<32x128xf32, #tpu.memory_space<vmem>>, %arg3: memref<2x128xf32, #tpu.memory_space<vmem>>) attributes {dimension_semantics = [#tpu.dimension_semantics<arbitrary>], iteration_bounds = array<i64: 1>, scalar_prefetch = 0 : i64, scratch_operands = 0 : i64, tpu.core_type = #tpu.core_type<tc>, window_params = [{transform_indices = @transform_0, window_bounds = array<i64: 2, 32, 32>}, {pipeline_mode = #tpu.pipeline_mode<synchronous>, transform_indices = @transform_1, window_bounds = array<i64: 32, 128>}, {pipeline_mode = #tpu.pipeline_mode<synchronous>, transform_indices = @transform_2, window_bounds = array<i64: 2, 128>}]} {
    %c0_i32 = arith.constant 0 : i32
    %0 = arith.cmpi eq, %arg0, %c0_i32 : i32
    %1 = arith.extui %0 : i1 to i32
    %c0_i32_0 = arith.constant 0 : i32
    %2 = arith.cmpi ne, %1, %c0_i32_0 : i32
    scf.if %2 {
      %cst_11 = arith.constant 0.000000e+00 : f32
      %18 = vector.broadcast %cst_11 : f32 to vector<2x128xf32>
      %c0_12 = arith.constant 0 : index
      %c0_13 = arith.constant 0 : index
      %19 = vector.load %arg3[%c0_12, %c0_13] : memref<2x128xf32, #tpu.memory_space<vmem>>, vector<2x128xf32>
      tpu.vector_store %arg3[%c0_12, %c0_13], %18 {strides = array<i32>} : memref<2x128xf32, #tpu.memory_space<vmem>>, vector<2x128xf32>,
    } else {
    }
    %c0 = arith.constant 0 : index
    %c0_1 = arith.constant 0 : index
    %c0_2 = arith.constant 0 : index
    %3 = vector.load %arg1[%c0, %c0_1, %c0_2] : memref<2x32x32xf32, #tpu.memory_space<vmem>>, vector<2x32x32xf32>
    %4 = vector.shape_cast %3 : vector<2x32x32xf32> to vector<64x32xf32>
    %5 = arith.truncf %4 : vector<64x32xf32> to vector<64x32xbf16>
    %c0_3 = arith.constant 0 : index
    %c0_4 = arith.constant 0 : index
    %6 = vector.load %arg2[%c0_3, %c0_4] : memref<32x128xf32, #tpu.memory_space<vmem>>, vector<32x128xf32>
    %7 = arith.truncf %6 : vector<32x128xf32> to vector<32x128xbf16>
    %cst = arith.constant dense<0.000000e+00> : vector<64x128xf32>
    %8 = tpu.matmul %5, %7, %cst {dimension_numbers = #tpu.dot_dimension_numbers<[1], [0], [0], [1], [0, 0, 1, 1], [], []>} : vector<64x32xbf16>, vector<32x128xbf16>, vector<64x128xf32> -> vector<64x128xf32>
    %cst_5 = arith.constant dense<0.000000e+00> : vector<128xf32>
    %9 = vector.multi_reduction <add>, %8, %cst_5 [0] : vector<64x128xf32> to vector<128xf32>
    %10 = vector.shape_cast %9 : vector<128xf32> to vector<1x128xf32>
    %11 = arith.mulf %8, %8 : vector<64x128xf32>
    %cst_6 = arith.constant dense<0.000000e+00> : vector<128xf32>
    %12 = vector.multi_reduction <add>, %11, %cst_6 [0] : vector<64x128xf32> to vector<128xf32>
    %13 = vector.shape_cast %12 : vector<128xf32> to vector<1x128xf32>
    %c0_7 = arith.constant 0 : index
    %c0_8 = arith.constant 0 : index
    %14 = vector.load %arg3[%c0_7, %c0_8] : memref<2x128xf32, #tpu.memory_space<vmem>>, vector<2x128xf32>
    %15 = tpu.concatenate %10, %13 in 0 : vector<1x128xf32>, vector<1x128xf32> -> vector<2x128xf32>
    %16 = arith.addf %14, %15 : vector<2x128xf32>
    %c0_9 = arith.constant 0 : index
    %c0_10 = arith.constant 0 : index
    %17 = vector.load %arg3[%c0_9, %c0_10] : memref<2x128xf32, #tpu.memory_space<vmem>>, vector<2x128xf32>
    tpu.vector_store %arg3[%c0_9, %c0_10], %16 {strides = array<i32>} : memref<2x128xf32, #tpu.memory_space<vmem>>, vector<2x128xf32>,
    return
  }
  func.func @transform_0(%arg0: i32) -> (i32, i32, i32) {
    %c0_i32 = arith.constant 0 : i32
    %c0_i32_0 = arith.constant 0 : i32
    %c0_i32_1 = arith.constant 0 : i32
    return %c0_i32, %arg0, %c0_i32_0 : i32, i32, i32
  }
  func.func @transform_1(%arg0: i32) -> (i32, i32) {
    %c0_i32 = arith.constant 0 : i32
    %c0_i32_0 = arith.constant 0 : i32
    %c0_i32_1 = arith.constant 0 : i32
    return %c0_i32, %c0_i32_0 : i32, i32
  }
  func.func @transform_2(%arg0: i32) -> (i32, i32) {
    %c0_i32 = arith.constant 0 : i32
    %c0_i32_0 = arith.constant 0 : i32
    %c0_i32_1 = arith.constant 0 : i32
    return %c0_i32, %c0_i32_0 : i32, i32
  }
}

module attributes {stable_mosaic.version = 11 : i64} {
  func.func @_bn_lif_kernel(%arg0: i32, %arg1: memref<2x32x32xf32, #tpu.memory_space<vmem>>, %arg2: memref<32x128xf32, #tpu.memory_space<vmem>>, %arg3: memref<1x128xf32, #tpu.memory_space<vmem>>, %arg4: memref<1x128xf32, #tpu.memory_space<vmem>>, %arg5: memref<2x32x128xbf16, #tpu.memory_space<vmem>>) attributes {dimension_semantics = [#tpu.dimension_semantics<parallel>], iteration_bounds = array<i64: 1>, scalar_prefetch = 0 : i64, scratch_operands = 0 : i64, tpu.core_type = #tpu.core_type<tc>, window_params = [{transform_indices = @transform_0, window_bounds = array<i64: 2, 32, 32>}, {pipeline_mode = #tpu.pipeline_mode<synchronous>, transform_indices = @transform_1, window_bounds = array<i64: 32, 128>}, {pipeline_mode = #tpu.pipeline_mode<synchronous>, transform_indices = @transform_2, window_bounds = array<i64: 1, 128>}, {pipeline_mode = #tpu.pipeline_mode<synchronous>, transform_indices = @transform_3, window_bounds = array<i64: 1, 128>}, {transform_indices = @transform_4, window_bounds = array<i64: 2, 32, 128>}]} {
    %c0 = arith.constant 0 : index
    %c0_0 = arith.constant 0 : index
    %c0_1 = arith.constant 0 : index
    %0 = vector.load %arg1[%c0, %c0_0, %c0_1] : memref<2x32x32xf32, #tpu.memory_space<vmem>>, vector<2x32x32xf32>
    %1 = vector.shape_cast %0 : vector<2x32x32xf32> to vector<64x32xf32>
    %2 = arith.truncf %1 : vector<64x32xf32> to vector<64x32xbf16>
    %c0_2 = arith.constant 0 : index
    %c0_3 = arith.constant 0 : index
    %3 = vector.load %arg2[%c0_2, %c0_3] : memref<32x128xf32, #tpu.memory_space<vmem>>, vector<32x128xf32>
    %4 = arith.truncf %3 : vector<32x128xf32> to vector<32x128xbf16>
    %cst = arith.constant dense<0.000000e+00> : vector<64x128xf32>
    %5 = tpu.matmul %2, %4, %cst {dimension_numbers = #tpu.dot_dimension_numbers<[1], [0], [0], [1], [0, 0, 1, 1], [], []>} : vector<64x32xbf16>, vector<32x128xbf16>, vector<64x128xf32> -> vector<64x128xf32>
    %c0_4 = arith.constant 0 : index
    %c0_5 = arith.constant 0 : index
    %6 = vector.load %arg3[%c0_4, %c0_5] : memref<1x128xf32, #tpu.memory_space<vmem>>, vector<1x128xf32>
    %7 = vector.broadcast %6 : vector<1x128xf32> to vector<64x128xf32>
    %8 = arith.mulf %5, %7 : vector<64x128xf32>
    %c0_6 = arith.constant 0 : index
    %c0_7 = arith.constant 0 : index
    %9 = vector.load %arg4[%c0_6, %c0_7] : memref<1x128xf32, #tpu.memory_space<vmem>>, vector<1x128xf32>
    %10 = vector.broadcast %9 : vector<1x128xf32> to vector<64x128xf32>
    %11 = arith.addf %8, %10 : vector<64x128xf32>
    %12 = vector.shape_cast %11 : vector<64x128xf32> to vector<2x32x128xf32>
    %cst_8 = arith.constant 0.000000e+00 : f32
    %13 = vector.broadcast %cst_8 : f32 to vector<32x128xf32>
    %14 = vector.extract_strided_slice %12 {offsets = [0, 0, 0], sizes = [1, 32, 128], strides = [1, 1, 1]} : vector<2x32x128xf32> to vector<1x32x128xf32>
    %15 = vector.shape_cast %14 : vector<1x32x128xf32> to vector<32x128xf32>
    %16 = arith.subf %15, %13 : vector<32x128xf32>
    %cst_9 = arith.constant 5.000000e-01 : f32
    %17 = vector.broadcast %cst_9 : f32 to vector<32x128xf32>
    %18 = arith.mulf %16, %17 : vector<32x128xf32>
    %19 = arith.addf %13, %18 : vector<32x128xf32>
    %cst_10 = arith.constant 1.000000e+00 : f32
    %20 = vector.broadcast %cst_10 : f32 to vector<32x128xf32>
    %21 = arith.cmpf oge, %19, %20 : vector<32x128xf32>
    %cst_11 = arith.constant 1.000000e+00 : f32
    %cst_12 = arith.constant 0.000000e+00 : f32
    %22 = vector.broadcast %cst_11 : f32 to vector<32x128xf32>
    %23 = vector.broadcast %cst_12 : f32 to vector<32x128xf32>
    %24 = arith.select %21, %22, %23 : vector<32x128xi1>, vector<32x128xf32>
    %cst_13 = arith.constant 0.000000e+00 : f32
    %25 = vector.broadcast %cst_13 : f32 to vector<32x128xf32>
    %26 = arith.select %21, %25, %19 : vector<32x128xi1>, vector<32x128xf32>
    %27 = arith.truncf %24 : vector<32x128xf32> to vector<32x128xbf16>
    %c0_14 = arith.constant 0 : index
    %c0_15 = arith.constant 0 : index
    %c0_16 = arith.constant 0 : index
    %28 = vector.load %arg5[%c0_14, %c0_15, %c0_16] : memref<2x32x128xbf16, #tpu.memory_space<vmem>>, vector<1x32x128xbf16>
    %29 = vector.shape_cast %28 : vector<1x32x128xbf16> to vector<32x128xbf16>
    %30 = vector.shape_cast %27 : vector<32x128xbf16> to vector<1x32x128xbf16>
    tpu.vector_store %arg5[%c0_14, %c0_15, %c0_16], %30 {strides = array<i32>} : memref<2x32x128xbf16, #tpu.memory_space<vmem>>, vector<1x32x128xbf16>,
    %31 = vector.extract_strided_slice %12 {offsets = [1, 0, 0], sizes = [1, 32, 128], strides = [1, 1, 1]} : vector<2x32x128xf32> to vector<1x32x128xf32>
    %32 = vector.shape_cast %31 : vector<1x32x128xf32> to vector<32x128xf32>
    %33 = arith.subf %32, %26 : vector<32x128xf32>
    %cst_17 = arith.constant 5.000000e-01 : f32
    %34 = vector.broadcast %cst_17 : f32 to vector<32x128xf32>
    %35 = arith.mulf %33, %34 : vector<32x128xf32>
    %36 = arith.addf %26, %35 : vector<32x128xf32>
    %cst_18 = arith.constant 1.000000e+00 : f32
    %37 = vector.broadcast %cst_18 : f32 to vector<32x128xf32>
    %38 = arith.cmpf oge, %36, %37 : vector<32x128xf32>
    %cst_19 = arith.constant 1.000000e+00 : f32
    %cst_20 = arith.constant 0.000000e+00 : f32
    %39 = vector.broadcast %cst_19 : f32 to vector<32x128xf32>
    %40 = vector.broadcast %cst_20 : f32 to vector<32x128xf32>
    %41 = arith.select %38, %39, %40 : vector<32x128xi1>, vector<32x128xf32>
    %42 = arith.truncf %41 : vector<32x128xf32> to vector<32x128xbf16>
    %c1 = arith.constant 1 : index
    %c0_21 = arith.constant 0 : index
    %c0_22 = arith.constant 0 : index
    %43 = vector.load %arg5[%c1, %c0_21, %c0_22] : memref<2x32x128xbf16, #tpu.memory_space<vmem>>, vector<1x32x128xbf16>
    %44 = vector.shape_cast %43 : vector<1x32x128xbf16> to vector<32x128xbf16>
    %45 = vector.shape_cast %42 : vector<32x128xbf16> to vector<1x32x128xbf16>
    tpu.vector_store %arg5[%c1, %c0_21, %c0_22], %45 {strides = array<i32>} : memref<2x32x128xbf16, #tpu.memory_space<vmem>>, vector<1x32x128xbf16>,
    return
  }
  func.func @transform_0(%arg0: i32) -> (i32, i32, i32) {
    %c0_i32 = arith.constant 0 : i32
    %c0_i32_0 = arith.constant 0 : i32
    %c0_i32_1 = arith.constant 0 : i32
    return %c0_i32, %arg0, %c0_i32_0 : i32, i32, i32
  }
  func.func @transform_1(%arg0: i32) -> (i32, i32) {
    %c0_i32 = arith.constant 0 : i32
    %c0_i32_0 = arith.constant 0 : i32
    %c0_i32_1 = arith.constant 0 : i32
    return %c0_i32, %c0_i32_0 : i32, i32
  }
  func.func @transform_2(%arg0: i32) -> (i32, i32) {
    %c0_i32 = arith.constant 0 : i32
    %c0_i32_0 = arith.constant 0 : i32
    %c0_i32_1 = arith.constant 0 : i32
    return %c0_i32, %c0_i32_0 : i32, i32
  }
  func.func @transform_3(%arg0: i32) -> (i32, i32) {
    %c0_i32 = arith.constant 0 : i32
    %c0_i32_0 = arith.constant 0 : i32
    %c0_i32_1 = arith.constant 0 : i32
    return %c0_i32, %c0_i32_0 : i32, i32
  }
  func.func @transform_4(%arg0: i32) -> (i32, i32, i32) {
    %c0_i32 = arith.constant 0 : i32
    %c0_i32_0 = arith.constant 0 : i32
    %c0_i32_1 = arith.constant 0 : i32
    return %c0_i32, %arg0, %c0_i32_0 : i32, i32, i32
  }
}

module attributes {stable_mosaic.version = 11 : i64} {
  func.func @_bn_stats_kernel(%arg0: i32, %arg1: memref<2x32x128xbf16, #tpu.memory_space<vmem>>, %arg2: memref<128x32xf32, #tpu.memory_space<vmem>>, %arg3: memref<2x32xf32, #tpu.memory_space<vmem>>) attributes {dimension_semantics = [#tpu.dimension_semantics<arbitrary>], iteration_bounds = array<i64: 1>, scalar_prefetch = 0 : i64, scratch_operands = 0 : i64, tpu.core_type = #tpu.core_type<tc>, window_params = [{transform_indices = @transform_0, window_bounds = array<i64: 2, 32, 128>}, {pipeline_mode = #tpu.pipeline_mode<synchronous>, transform_indices = @transform_1, window_bounds = array<i64: 128, 32>}, {pipeline_mode = #tpu.pipeline_mode<synchronous>, transform_indices = @transform_2, window_bounds = array<i64: 2, 32>}]} {
    %c0_i32 = arith.constant 0 : i32
    %0 = arith.cmpi eq, %arg0, %c0_i32 : i32
    %1 = arith.extui %0 : i1 to i32
    %c0_i32_0 = arith.constant 0 : i32
    %2 = arith.cmpi ne, %1, %c0_i32_0 : i32
    scf.if %2 {
      %cst_11 = arith.constant 0.000000e+00 : f32
      %17 = vector.broadcast %cst_11 : f32 to vector<2x32xf32>
      %c0_12 = arith.constant 0 : index
      %c0_13 = arith.constant 0 : index
      %18 = vector.load %arg3[%c0_12, %c0_13] : memref<2x32xf32, #tpu.memory_space<vmem>>, vector<2x32xf32>
      tpu.vector_store %arg3[%c0_12, %c0_13], %17 {strides = array<i32>} : memref<2x32xf32, #tpu.memory_space<vmem>>, vector<2x32xf32>,
    } else {
    }
    %c0 = arith.constant 0 : index
    %c0_1 = arith.constant 0 : index
    %c0_2 = arith.constant 0 : index
    %3 = vector.load %arg1[%c0, %c0_1, %c0_2] : memref<2x32x128xbf16, #tpu.memory_space<vmem>>, vector<2x32x128xbf16>
    %4 = vector.shape_cast %3 : vector<2x32x128xbf16> to vector<64x128xbf16>
    %c0_3 = arith.constant 0 : index
    %c0_4 = arith.constant 0 : index
    %5 = vector.load %arg2[%c0_3, %c0_4] : memref<128x32xf32, #tpu.memory_space<vmem>>, vector<128x32xf32>
    %6 = arith.truncf %5 : vector<128x32xf32> to vector<128x32xbf16>
    %cst = arith.constant dense<0.000000e+00> : vector<64x32xf32>
    %7 = tpu.matmul %4, %6, %cst {dimension_numbers = #tpu.dot_dimension_numbers<[1], [0], [0], [1], [0, 0, 1, 1], [], []>} : vector<64x128xbf16>, vector<128x32xbf16>, vector<64x32xf32> -> vector<64x32xf32>
    %cst_5 = arith.constant dense<0.000000e+00> : vector<32xf32>
    %8 = vector.multi_reduction <add>, %7, %cst_5 [0] : vector<64x32xf32> to vector<32xf32>
    %9 = vector.shape_cast %8 : vector<32xf32> to vector<1x32xf32>
    %10 = arith.mulf %7, %7 : vector<64x32xf32>
    %cst_6 = arith.constant dense<0.000000e+00> : vector<32xf32>
    %11 = vector.multi_reduction <add>, %10, %cst_6 [0] : vector<64x32xf32> to vector<32xf32>
    %12 = vector.shape_cast %11 : vector<32xf32> to vector<1x32xf32>
    %c0_7 = arith.constant 0 : index
    %c0_8 = arith.constant 0 : index
    %13 = vector.load %arg3[%c0_7, %c0_8] : memref<2x32xf32, #tpu.memory_space<vmem>>, vector<2x32xf32>
    %14 = tpu.concatenate %9, %12 in 0 : vector<1x32xf32>, vector<1x32xf32> -> vector<2x32xf32>
    %15 = arith.addf %13, %14 : vector<2x32xf32>
    %c0_9 = arith.constant 0 : index
    %c0_10 = arith.constant 0 : index
    %16 = vector.load %arg3[%c0_9, %c0_10] : memref<2x32xf32, #tpu.memory_space<vmem>>, vector<2x32xf32>
    tpu.vector_store %arg3[%c0_9, %c0_10], %15 {strides = array<i32>} : memref<2x32xf32, #tpu.memory_space<vmem>>, vector<2x32xf32>,
    return
  }
  func.func @transform_0(%arg0: i32) -> (i32, i32, i32) {
    %c0_i32 = arith.constant 0 : i32
    %c0_i32_0 = arith.constant 0 : i32
    %c0_i32_1 = arith.constant 0 : i32
    return %c0_i32, %arg0, %c0_i32_0 : i32, i32, i32
  }
  func.func @transform_1(%arg0: i32) -> (i32, i32) {
    %c0_i32 = arith.constant 0 : i32
    %c0_i32_0 = arith.constant 0 : i32
    %c0_i32_1 = arith.constant 0 : i32
    return %c0_i32, %c0_i32_0 : i32, i32
  }
  func.func @transform_2(%arg0: i32) -> (i32, i32) {
    %c0_i32 = arith.constant 0 : i32
    %c0_i32_0 = arith.constant 0 : i32
    %c0_i32_1 = arith.constant 0 : i32
    return %c0_i32, %c0_i32_0 : i32, i32
  }
}

module attributes {stable_mosaic.version = 11 : i64} {
  func.func @_bn_lif_kernel(%arg0: i32, %arg1: memref<2x32x128xbf16, #tpu.memory_space<vmem>>, %arg2: memref<128x32xf32, #tpu.memory_space<vmem>>, %arg3: memref<1x32xf32, #tpu.memory_space<vmem>>, %arg4: memref<1x32xf32, #tpu.memory_space<vmem>>, %arg5: memref<2x32x32xf32, #tpu.memory_space<vmem>>, %arg6: memref<2x32x32xf32, #tpu.memory_space<vmem>>) attributes {dimension_semantics = [#tpu.dimension_semantics<parallel>], iteration_bounds = array<i64: 1>, scalar_prefetch = 0 : i64, scratch_operands = 0 : i64, tpu.core_type = #tpu.core_type<tc>, window_params = [{transform_indices = @transform_0, window_bounds = array<i64: 2, 32, 128>}, {pipeline_mode = #tpu.pipeline_mode<synchronous>, transform_indices = @transform_1, window_bounds = array<i64: 128, 32>}, {pipeline_mode = #tpu.pipeline_mode<synchronous>, transform_indices = @transform_2, window_bounds = array<i64: 1, 32>}, {pipeline_mode = #tpu.pipeline_mode<synchronous>, transform_indices = @transform_3, window_bounds = array<i64: 1, 32>}, {transform_indices = @transform_4, window_bounds = array<i64: 2, 32, 32>}, {transform_indices = @transform_5, window_bounds = array<i64: 2, 32, 32>}]} {
    %c0 = arith.constant 0 : index
    %c0_0 = arith.constant 0 : index
    %c0_1 = arith.constant 0 : index
    %0 = vector.load %arg1[%c0, %c0_0, %c0_1] : memref<2x32x128xbf16, #tpu.memory_space<vmem>>, vector<2x32x128xbf16>
    %1 = vector.shape_cast %0 : vector<2x32x128xbf16> to vector<64x128xbf16>
    %c0_2 = arith.constant 0 : index
    %c0_3 = arith.constant 0 : index
    %2 = vector.load %arg2[%c0_2, %c0_3] : memref<128x32xf32, #tpu.memory_space<vmem>>, vector<128x32xf32>
    %3 = arith.truncf %2 : vector<128x32xf32> to vector<128x32xbf16>
    %cst = arith.constant dense<0.000000e+00> : vector<64x32xf32>
    %4 = tpu.matmul %1, %3, %cst {dimension_numbers = #tpu.dot_dimension_numbers<[1], [0], [0], [1], [0, 0, 1, 1], [], []>} : vector<64x128xbf16>, vector<128x32xbf16>, vector<64x32xf32> -> vector<64x32xf32>
    %c0_4 = arith.constant 0 : index
    %c0_5 = arith.constant 0 : index
    %5 = vector.load %arg3[%c0_4, %c0_5] : memref<1x32xf32, #tpu.memory_space<vmem>>, vector<1x32xf32>
    %6 = vector.broadcast %5 : vector<1x32xf32> to vector<64x32xf32>
    %7 = arith.mulf %4, %6 : vector<64x32xf32>
    %c0_6 = arith.constant 0 : index
    %c0_7 = arith.constant 0 : index
    %8 = vector.load %arg4[%c0_6, %c0_7] : memref<1x32xf32, #tpu.memory_space<vmem>>, vector<1x32xf32>
    %9 = vector.broadcast %8 : vector<1x32xf32> to vector<64x32xf32>
    %10 = arith.addf %7, %9 : vector<64x32xf32>
    %11 = vector.shape_cast %10 : vector<64x32xf32> to vector<2x32x32xf32>
    %cst_8 = arith.constant 0.000000e+00 : f32
    %12 = vector.broadcast %cst_8 : f32 to vector<32x32xf32>
    %13 = vector.extract_strided_slice %11 {offsets = [0, 0, 0], sizes = [1, 32, 32], strides = [1, 1, 1]} : vector<2x32x32xf32> to vector<1x32x32xf32>
    %14 = vector.shape_cast %13 : vector<1x32x32xf32> to vector<32x32xf32>
    %15 = arith.subf %14, %12 : vector<32x32xf32>
    %cst_9 = arith.constant 5.000000e-01 : f32
    %16 = vector.broadcast %cst_9 : f32 to vector<32x32xf32>
    %17 = arith.mulf %15, %16 : vector<32x32xf32>
    %18 = arith.addf %12, %17 : vector<32x32xf32>
    %cst_10 = arith.constant 1.000000e+00 : f32
    %19 = vector.broadcast %cst_10 : f32 to vector<32x32xf32>
    %20 = arith.cmpf oge, %18, %19 : vector<32x32xf32>
    %cst_11 = arith.constant 1.000000e+00 : f32
    %cst_12 = arith.constant 0.000000e+00 : f32
    %21 = vector.broadcast %cst_11 : f32 to vector<32x32xf32>
    %22 = vector.broadcast %cst_12 : f32 to vector<32x32xf32>
    %23 = arith.select %20, %21, %22 : vector<32x32xi1>, vector<32x32xf32>
    %cst_13 = arith.constant 0.000000e+00 : f32
    %24 = vector.broadcast %cst_13 : f32 to vector<32x32xf32>
    %25 = arith.select %20, %24, %18 : vector<32x32xi1>, vector<32x32xf32>
    %c0_14 = arith.constant 0 : index
    %c0_15 = arith.constant 0 : index
    %c0_16 = arith.constant 0 : index
    %26 = vector.load %arg5[%c0_14, %c0_15, %c0_16] : memref<2x32x32xf32, #tpu.memory_space<vmem>>, vector<1x32x32xf32>
    %27 = vector.shape_cast %26 : vector<1x32x32xf32> to vector<32x32xf32>
    %28 = arith.addf %23, %27 : vector<32x32xf32>
    %c0_17 = arith.constant 0 : index
    %c0_18 = arith.constant 0 : index
    %c0_19 = arith.constant 0 : index
    %29 = vector.load %arg6[%c0_17, %c0_18, %c0_19] : memref<2x32x32xf32, #tpu.memory_space<vmem>>, vector<1x32x32xf32>
    %30 = vector.shape_cast %29 : vector<1x32x32xf32> to vector<32x32xf32>
    %31 = vector.shape_cast %28 : vector<32x32xf32> to vector<1x32x32xf32>
    tpu.vector_store %arg6[%c0_17, %c0_18, %c0_19], %31 {strides = array<i32>} : memref<2x32x32xf32, #tpu.memory_space<vmem>>, vector<1x32x32xf32>,
    %32 = vector.extract_strided_slice %11 {offsets = [1, 0, 0], sizes = [1, 32, 32], strides = [1, 1, 1]} : vector<2x32x32xf32> to vector<1x32x32xf32>
    %33 = vector.shape_cast %32 : vector<1x32x32xf32> to vector<32x32xf32>
    %34 = arith.subf %33, %25 : vector<32x32xf32>
    %cst_20 = arith.constant 5.000000e-01 : f32
    %35 = vector.broadcast %cst_20 : f32 to vector<32x32xf32>
    %36 = arith.mulf %34, %35 : vector<32x32xf32>
    %37 = arith.addf %25, %36 : vector<32x32xf32>
    %cst_21 = arith.constant 1.000000e+00 : f32
    %38 = vector.broadcast %cst_21 : f32 to vector<32x32xf32>
    %39 = arith.cmpf oge, %37, %38 : vector<32x32xf32>
    %cst_22 = arith.constant 1.000000e+00 : f32
    %cst_23 = arith.constant 0.000000e+00 : f32
    %40 = vector.broadcast %cst_22 : f32 to vector<32x32xf32>
    %41 = vector.broadcast %cst_23 : f32 to vector<32x32xf32>
    %42 = arith.select %39, %40, %41 : vector<32x32xi1>, vector<32x32xf32>
    %c1 = arith.constant 1 : index
    %c0_24 = arith.constant 0 : index
    %c0_25 = arith.constant 0 : index
    %43 = vector.load %arg5[%c1, %c0_24, %c0_25] : memref<2x32x32xf32, #tpu.memory_space<vmem>>, vector<1x32x32xf32>
    %44 = vector.shape_cast %43 : vector<1x32x32xf32> to vector<32x32xf32>
    %45 = arith.addf %42, %44 : vector<32x32xf32>
    %c1_26 = arith.constant 1 : index
    %c0_27 = arith.constant 0 : index
    %c0_28 = arith.constant 0 : index
    %46 = vector.load %arg6[%c1_26, %c0_27, %c0_28] : memref<2x32x32xf32, #tpu.memory_space<vmem>>, vector<1x32x32xf32>
    %47 = vector.shape_cast %46 : vector<1x32x32xf32> to vector<32x32xf32>
    %48 = vector.shape_cast %45 : vector<32x32xf32> to vector<1x32x32xf32>
    tpu.vector_store %arg6[%c1_26, %c0_27, %c0_28], %48 {strides = array<i32>} : memref<2x32x32xf32, #tpu.memory_space<vmem>>, vector<1x32x32xf32>,
    return
  }
  func.func @transform_0(%arg0: i32) -> (i32, i32, i32) {
    %c0_i32 = arith.constant 0 : i32
    %c0_i32_0 = arith.constant 0 : i32
    %c0_i32_1 = arith.constant 0 : i32
    return %c0_i32, %arg0, %c0_i32_0 : i32, i32, i32
  }
  func.func @transform_1(%arg0: i32) -> (i32, i32) {
    %c0_i32 = arith.constant 0 : i32
    %c0_i32_0 = arith.constant 0 : i32
    %c0_i32_1 = arith.constant 0 : i32
    return %c0_i32, %c0_i32_0 : i32, i32
  }
  func.func @transform_2(%arg0: i32) -> (i32, i32) {
    %c0_i32 = arith.constant 0 : i32
    %c0_i32_0 = arith.constant 0 : i32
    %c0_i32_1 = arith.constant 0 : i32
    return %c0_i32, %c0_i32_0 : i32, i32
  }
  func.func @transform_3(%arg0: i32) -> (i32, i32) {
    %c0_i32 = arith.constant 0 : i32
    %c0_i32_0 = arith.constant 0 : i32
    %c0_i32_1 = arith.constant 0 : i32
    return %c0_i32, %c0_i32_0 : i32, i32
  }
  func.func @transform_4(%arg0: i32) -> (i32, i32, i32) {
    %c0_i32 = arith.constant 0 : i32
    %c0_i32_0 = arith.constant 0 : i32
    %c0_i32_1 = arith.constant 0 : i32
    return %c0_i32, %arg0, %c0_i32_0 : i32, i32, i32
  }
  func.func @transform_5(%arg0: i32) -> (i32, i32, i32) {
    %c0_i32 = arith.constant 0 : i32
    %c0_i32_0 = arith.constant 0 : i32
    %c0_i32_1 = arith.constant 0 : i32
    return %c0_i32, %arg0, %c0_i32_0 : i32, i32, i32
  }
}

</mosaic_0001>

<bundles_post_ra>
// kernel: sew_block_linear.9
= control target key start
LH: loop header
LB: loop body
LE: loop exit
PB: predicated region body
PF: predicated region fallthrough
CT: control target
= control target key end

     0   :  { %vm36_vm0 = vcmask 261120   ;;  %vm16_vm1 = vcmask 779264   ;;  %v202_v18 = vmov 0.0   ;;  %vm114_vm2 = vcmask 785408   ;;  %s285_s1 = inlined_call_operand.vmem [shape: f32[32,96], index: 1, kind: input, shape index: {}]   ;;  %s286_s0 = inlined_call_operand.vmem [shape: f32[2,32,32], index: 0, kind: input, shape index: {}]   ;;  %s287_s2 = inlined_call_operand.vmem [shape: f32[2,96], index: 2, kind: output, shape index: {}]  }
   0x1   :  { %v30_v0 = vld [vmem:[%s285_s1] sm:$0xff]  ;;  %v31_v1 = vld [vmem:[%s285_s1 + $0x8] sm:$0xff]  ;;  %v32_v2 = vld [vmem:[%s285_s1 + $0x10] sm:$0xff]  ;;  %17 = vst.msk [vmem:[%s287_s2] sm:$0x3] %vm16_vm1, %v202_v18  ;;  %vm166_vm3 = vcmask 1040384  }
   0x2   :  { %v34_v3 = vpack.c.bf16 %v31_v1, %v30_v0  ;;  %v33_v4 = vld [vmem:[%s285_s1 + $0x18] sm:$0xff]  ;;  %v18_v5 = vld [vmem:[%s286_s0] sm:$0xff]  ;;  %v19_v6 = vld [vmem:[%s286_s0 + $0x8] sm:$0xff] }
   0x3   :  { %v35_v7 = vpack.c.bf16 %v33_v4, %v32_v2  ;;  %v26_v8 = vpack.c.bf16 %v19_v6, %v18_v5  ;;  %v22_v9 = vld [vmem:[%s286_s0 + $0x20] sm:$0xff]  ;;  %v20_v10 = vld [vmem:[%s286_s0 + $0x10] sm:$0xff]  ;;  %v23_v11 = vld [vmem:[%s286_s0 + $0x28] sm:$0xff] }
   0x4   :  { %185 = vmatprep.subr.bf16.mxu0 %v34_v3  ;;  %197 = vmatprep.subr.bf16.mxu1 %v34_v3  ;;  %v21_v12 = vld [vmem:[%s286_s0 + $0x18] sm:$0xff]  ;;  %v28_v13 = vpack.c.bf16 %v23_v11, %v22_v9  ;;  %v24_v14 = vld [vmem:[%s286_s0 + $0x30] sm:$0xff] }
   0x5   :  { %186 = vmatpush3.bf16.msra.mxu0 %v34_v3  ;;  %199 = vmatpush3.bf16.msra.mxu1 %v34_v3  ;;  %v25_v15 = vld [vmem:[%s286_s0 + $0x38] sm:$0xff]  ;;  %v27_v16 = vpack.c.bf16 %v21_v12, %v20_v10 }
   0x6   :  { %187 = vmatprep.subr.bf16.mxu0 %v35_v7  ;;  %189 = vmatprep.mubr.msk.bf16.mxu0 %vm36_vm0, %v26_v8  ;;  %v29_v17 = vpack.c.bf16 %v25_v15, %v24_v14 }
   0x7   :  { %198 = vmatprep.subr.bf16.mxu1 %v35_v7  ;;  %193 = vmatprep.mubr.msk.bf16.mxu1 %vm36_vm0, %v28_v13 }
   0x8   :  { %v165_v13 = vld [vmem:[%s287_s2] sm:$0x3] }
   0x9   :  { %188 = vmatpush3.bf16.msra.mxu0 %v35_v7  ;;  %200 = vmatpush3.bf16.msra.mxu1 %v35_v7 }
   0xc   :  { %190 = vmatmul.mubr.msk.bf16.vlgmr.msra.gmra.mrb[0].mxu0 %vm36_vm0, %v27_v16  ;;  %194 = vmatmul.mubr.msk.bf16.vlgmr.msra.gmra.mrb[0].mxu1 %vm36_vm0, %v29_v17 }
  0xdf   :  { %v191_v19 = vpop.f32.mrb[0].mxu0  ;;  %v195_v20 = vpop.f32.mrb[0].mxu1 }
  0xe0   :  { %v83_v21 = vpop.f32.mrb[1].mxu0  ;;  %v99_v22 = vpop.f32.mrb[1].mxu1  ;;  %v138_v28 = vmul.f32 %v191_v19, %v191_v19  ;;  %v118_v32 = vsel %vm114_vm2, %v191_v19, 0.0  ;;  %v142_v50 = vmul.f32 %v195_v20, %v195_v20  ;;  %v126_v54 = vsel %vm114_vm2, %v195_v20, 0.0 }
  0xe1   :  { %v136_v23 = vmul.f32 %v83_v21, %v83_v21  ;;  %v192_v24 = vpop.f32.mrb[2].mxu0  ;;  %v196_v25 = vpop.f32.mrb[2].mxu1  ;;  %v115_v29 = vsel %vm114_vm2, %v83_v21, 0.0  ;;  %v140_v37 = vmul.f32 %v99_v22, %v99_v22  ;;  %v122_v42 = vsel %vm114_vm2, %v99_v22, 0.0 }
  0xe2   :  { %v86_v26 = vpop.f32.mrb[3].mxu0  ;;  %v102_v27 = vpop.f32.mrb[3].mxu1  ;;  %v139_v35 = vmul.f32 %v192_v24, %v192_v24  ;;  %v147_v40 = vsel %vm114_vm2, %v138_v28, 0.0  ;;  %v120_v41 = vsel %vm114_vm2, %v192_v24, 0.0  ;;  %v143_v55 = vmul.f32 %v196_v25, %v196_v25 }
  0xe3   :  { %v116_v30 = vsel %vm114_vm2, %v86_v26, 0.0  ;;  %v137_v31 = vmul.f32 %v86_v26, %v86_v26  ;;  %v144_v34 = vsel %vm114_vm2, %v136_v23, 0.0  ;;  %v151_v46 = vsel %vm114_vm2, %v140_v37, 0.0 }
  0xe4   :  { %v117_v33 = vadd.f32 %v116_v30, %v115_v29  ;;  %v149_v45 = vsel %vm114_vm2, %v139_v35, 0.0  ;;  %v141_v47 = vmul.f32 %v102_v27, %v102_v27  ;;  %v124_v51 = vsel %vm114_vm2, %v102_v27, 0.0 }
  0xe5   :  { %v145_v36 = vsel %vm114_vm2, %v137_v31, 0.0  ;;  %v155_v59 = vsel %vm114_vm2, %v142_v50, 0.0  ;;  %v128_v60 = vsel %vm114_vm2, %v196_v25, 0.0  ;;  %v157_v63 = vsel %vm114_vm2, %v143_v55, 0.0 }
  0xe6   :  { %v119_v38 = vadd.f32 %v118_v32, %v117_v33  ;;  %v146_v39 = vadd.f32 %v145_v36, %v144_v34  ;;  %v153_v56 = vsel %vm114_vm2, %v141_v47, 0.0 }
  0xe8   :  { %v148_v43 = vadd.f32 %v147_v40, %v146_v39  ;;  %v121_v44 = vadd.f32 %v120_v41, %v119_v38 }
  0xea   :  { %v123_v48 = vadd.f32 %v122_v42, %v121_v44  ;;  %v150_v49 = vadd.f32 %v149_v45, %v148_v43 }
  0xec   :  { %v152_v52 = vadd.f32 %v151_v46, %v150_v49  ;;  %v125_v53 = vadd.f32 %v124_v51, %v123_v48 }
  0xee   :  { %v127_v57 = vadd.f32 %v126_v54, %v125_v53  ;;  %v154_v58 = vadd.f32 %v153_v56, %v152_v52 }
  0xf0   :  { %v129_v61 = vadd.f32 %v128_v60, %v127_v57  ;;  %v156_v62 = vadd.f32 %v155_v59, %v154_v58 }
  0xf2   :  { %v130_v0 = vrot.slane %v129_v61, 4  ;;  %v158_v1 = vadd.f32 %v157_v63, %v156_v62 }
  0xf4   :  { %v131_v2 = vadd.f32 %v130_v0, %v129_v61  ;;  %v159_v3 = vrot.slane %v158_v1, 4 }
  0xf6   :  { %v132_v4 = vrot.slane %v131_v2, 2  ;;  %v160_v5 = vadd.f32 %v159_v3, %v158_v1 }
  0xf8   :  { %v133_v6 = vadd.f32 %v132_v4, %v131_v2  ;;  %v161_v7 = vrot.slane %v160_v5, 2 }
  0xfa   :  { %v134_v8 = vrot.slane %v133_v6, 1  ;;  %v162_v9 = vadd.f32 %v161_v7, %v160_v5 }
  0xfc   :  { %v163_v10 = vrot.slane %v162_v9, 1  ;;  %v135_v11 = vadd.f32 %v134_v8, %v133_v6 }
  0xfe   :  { %v164_v12 = vadd.f32 %v163_v10, %v162_v9 }
 0x100   :  { %v167_v14 = vsel %vm166_vm3, %v135_v11, %v164_v12 }
 0x101   :  { %v168_v15 = vadd.f32 %v167_v14, %v165_v13 }
 0x103   :  { %170 = vst.msk [vmem:[%s287_s2] sm:$0x3] %vm16_vm1, %v168_v15 }

// kernel: sew_block_linear.10
= control target key start
LH: loop header
LB: loop body
LE: loop exit
PB: predicated region body
PF: predicated region fallthrough
CT: control target
= control target key end

     0   :  { %vm36_vm0 = vcmask 261120   ;;  %vm180_vm1 = vcmask 781312   ;;  %v279_v47 = vmov 0.0   ;;  %s383_s1 = inlined_call_operand.vmem [shape: f32[32,96], index: 1, kind: input, shape index: {}]   ;;  %s384_s0 = inlined_call_operand.vmem [shape: f32[2,32,32], index: 0, kind: input, shape index: {}]   ;;  %s385_s2 = inlined_call_operand.vmem [shape: f32[1,96], index: 2, kind: input, shape index: {}]   ;;  %s386_s3 = inlined_call_operand.vmem [shape: f32[1,96], index: 3, kind: input, shape index: {}]   ;;  %s387_s4 = inlined_call_operand.vmem [shape: bf16[2,32,96], index: 4, kind: output, shape index: {}]  }
   0x1   :  { %v30_v0 = vld [vmem:[%s383_s1] sm:$0xff]  ;;  %v31_v1 = vld [vmem:[%s383_s1 + $0x8] sm:$0xff]  ;;  %v32_v2 = vld [vmem:[%s383_s1 + $0x10] sm:$0xff] }
   0x2   :  { %v34_v3 = vpack.c.bf16 %v31_v1, %v30_v0  ;;  %v33_v4 = vld [vmem:[%s383_s1 + $0x18] sm:$0xff]  ;;  %v18_v5 = vld [vmem:[%s384_s0] sm:$0xff]  ;;  %v19_v6 = vld [vmem:[%s384_s0 + $0x8] sm:$0xff] }
   0x3   :  { %v35_v7 = vpack.c.bf16 %v33_v4, %v32_v2  ;;  %v26_v8 = vpack.c.bf16 %v19_v6, %v18_v5  ;;  %v22_v9 = vld [vmem:[%s384_s0 + $0x20] sm:$0xff]  ;;  %v20_v10 = vld [vmem:[%s384_s0 + $0x10] sm:$0xff]  ;;  %v23_v11 = vld [vmem:[%s384_s0 + $0x28] sm:$0xff] }
   0x4   :  { %262 = vmatprep.subr.bf16.mxu0 %v34_v3  ;;  %274 = vmatprep.subr.bf16.mxu1 %v34_v3  ;;  %v21_v12 = vld [vmem:[%s384_s0 + $0x18] sm:$0xff]  ;;  %v28_v13 = vpack.c.bf16 %v23_v11, %v22_v9  ;;  %v24_v14 = vld [vmem:[%s384_s0 + $0x30] sm:$0xff]  ;;  %v234_v18 = vld [vmem:[%s385_s2] ss:$0 sm:$0xff] }
   0x5   :  { %263 = vmatpush3.bf16.msra.mxu0 %v34_v3  ;;  %276 = vmatpush3.bf16.msra.mxu1 %v34_v3  ;;  %v25_v15 = vld [vmem:[%s384_s0 + $0x38] sm:$0xff]  ;;  %v27_v16 = vpack.c.bf16 %v21_v12, %v20_v10  ;;  %v235_v20 = vld [vmem:[%s386_s3] ss:$0 sm:$0xff] }
   0x6   :  { %264 = vmatprep.subr.bf16.mxu0 %v35_v7  ;;  %275 = vmatprep.subr.bf16.mxu1 %v35_v7  ;;  %v29_v17 = vpack.c.bf16 %v25_v15, %v24_v14 }
   0x7   :  { %266 = vmatprep.mubr.msk.bf16.mxu0 %vm36_vm0, %v26_v8  ;;  %270 = vmatprep.mubr.msk.bf16.mxu1 %vm36_vm0, %v28_v13 }
   0x9   :  { %265 = vmatpush3.bf16.msra.mxu0 %v35_v7  ;;  %277 = vmatpush3.bf16.msra.mxu1 %v35_v7 }
   0xc   :  { %267 = vmatmul.mubr.msk.bf16.vlgmr.msra.gmra.mrb[0].mxu0 %vm36_vm0, %v27_v16  ;;  %271 = vmatmul.mubr.msk.bf16.vlgmr.msra.gmra.mrb[0].mxu1 %vm36_vm0, %v29_v17 }
  0xdf   :  { %v268_v19 = vpop.f32.mrb[0].mxu0  ;;  %v272_v21 = vpop.f32.mrb[0].mxu1 }
  0xe0   :  { %v123_v22 = vmul.f32 %v268_v19, %v234_v18  ;;  %v83_v23 = vpop.f32.mrb[1].mxu0  ;;  %v127_v24 = vmul.f32 %v272_v21, %v234_v18  ;;  %v99_v25 = vpop.f32.mrb[1].mxu1 }
  0xe1   :  { %v121_v26 = vmul.f32 %v234_v18, %v83_v23  ;;  %v269_v27 = vpop.f32.mrb[2].mxu0  ;;  %v125_v28 = vmul.f32 %v234_v18, %v99_v25  ;;  %v273_v29 = vpop.f32.mrb[2].mxu1 }
  0xe2   :  { %v138_v30 = vadd.f32 %v235_v20, %v123_v22  ;;  %v124_v31 = vmul.f32 %v269_v27, %v234_v18  ;;  %v86_v32 = vpop.f32.mrb[3].mxu0  ;;  %v128_v33 = vmul.f32 %v273_v29, %v234_v18  ;;  %v102_v34 = vpop.f32.mrb[3].mxu1  ;;  %v142_v39 = vadd.f32 %v235_v20, %v127_v24 }
  0xe3   :  { %v136_v35 = vadd.f32 %v235_v20, %v121_v26  ;;  %v122_v36 = vmul.f32 %v234_v18, %v86_v32  ;;  %v126_v37 = vmul.f32 %v234_v18, %v102_v34  ;;  %v140_v42 = vadd.f32 %v235_v20, %v125_v28 }
  0xe4   :  { %v146_v38 = vmul.f32 0.5, %v138_v30  ;;  %v139_v40 = vadd.f32 %v235_v20, %v124_v31  ;;  %v143_v45 = vadd.f32 %v235_v20, %v128_v33 }
  0xe5   :  { %v144_v41 = vmul.f32 0.5, %v136_v35  ;;  %v137_v43 = vadd.f32 %v235_v20, %v122_v36  ;;  %v141_v46 = vadd.f32 %v235_v20, %v126_v37 }
  0xe6   :  { %vm154_vm2 = vcmp.ge.f32.partialorder %v146_v38, 1.0  ;;  %v147_v44 = vmul.f32 0.5, %v139_v40 }
  0xe7   :  { %v158_v48 = vsel %vm154_vm2, 1.0, %v279_v47  ;;  %v162_v49 = vsel %vm154_vm2, 0.0, %v146_v38  ;;  %vm152_vm3 = vcmp.ge.f32.partialorder %v144_v41, 1.0  ;;  %v145_v50 = vmul.f32 0.5, %v137_v43 }
  0xe8   :  { %v250_v51 = vpack.c.bf16 %v158_v48, %v158_v48  ;;  %v156_v52 = vsel %vm152_vm3, 1.0, %v279_v47  ;;  %v160_v53 = vsel %vm152_vm3, 0.0, %v144_v41  ;;  %v187_v54 = vsub.f32 %v142_v39, %v162_v49 }
  0xe9   :  { %v248_v55 = vpack.c.bf16 %v156_v52, %v156_v52  ;;  %vm155_vm4 = vcmp.ge.f32.partialorder %v147_v44, 1.0  ;;  %v185_v56 = vsub.f32 %v140_v42, %v160_v53  ;;  %vm153_vm5 = vcmp.ge.f32.partialorder %v145_v50, 1.0 }
  0xea   :  { %183 = vst.msk [vmem:[%s387_s4 + $0x8] sm:$0xf] %vm180_vm1, %v250_v51  ;;  %v191_v57 = vmul.f32 0.5, %v187_v54  ;;  %v159_v58 = vsel %vm155_vm4, 1.0, %v279_v47  ;;  %v163_v59 = vsel %vm155_vm4, 0.0, %v147_v44  ;;  %v157_v60 = vsel %vm153_vm5, 1.0, %v279_v47 }
  0xeb   :  { %181 = vst.msk [vmem:[%s387_s4] sm:$0xf] %vm180_vm1, %v248_v55  ;;  %v251_v61 = vpack.c.bf16 %v159_v58, %v159_v58  ;;  %v189_v62 = vmul.f32 0.5, %v185_v56  ;;  %v161_v63 = vsel %vm153_vm5, 0.0, %v145_v50  ;;  %v249_v0 = vpack.c.bf16 %v157_v60, %v157_v60 }
  0xec   :  { %v195_v1 = vadd.f32 %v191_v57, %v162_v49  ;;  %v188_v2 = vsub.f32 %v143_v45, %v163_v59  ;;  %v186_v3 = vsub.f32 %v141_v46, %v161_v63 }
  0xed   :  { %184 = vst.msk [vmem:[%s387_s4 + $0xc] sm:$0xf] %vm180_vm1, %v251_v61  ;;  %v193_v4 = vadd.f32 %v189_v62, %v160_v53  ;;  %182 = vst.msk [vmem:[%s387_s4 + $0x4] sm:$0xf] %vm180_vm1, %v249_v0 }
  0xee   :  { %vm199_vm6 = vcmp.ge.f32.partialorder %v195_v1, 1.0  ;;  %v192_v5 = vmul.f32 0.5, %v188_v2  ;;  %v190_v6 = vmul.f32 0.5, %v186_v3 }
  0xef   :  { %v203_v7 = vsel %vm199_vm6, 1.0, %v279_v47  ;;  %vm197_vm7 = vcmp.ge.f32.partialorder %v193_v4, 1.0 }
  0xf0   :  { %v254_v8 = vpack.c.bf16 %v203_v7, %v203_v7  ;;  %v201_v9 = vsel %vm197_vm7, 1.0, %v279_v47  ;;  %v196_v10 = vadd.f32 %v192_v5, %v163_v59  ;;  %v194_v11 = vadd.f32 %v190_v6, %v161_v63 }
  0xf1   :  { %v252_v12 = vpack.c.bf16 %v201_v9, %v201_v9 }
  0xf2   :  { %246 = vst.msk [vmem:[%s387_s4 + $0x18] sm:$0xf] %vm180_vm1, %v254_v8  ;;  %vm200_vm8 = vcmp.ge.f32.partialorder %v196_v10, 1.0  ;;  %vm198_vm9 = vcmp.ge.f32.partialorder %v194_v11, 1.0 }
  0xf3   :  { %244 = vst.msk [vmem:[%s387_s4 + $0x10] sm:$0xf] %vm180_vm1, %v252_v12  ;;  %v204_v13 = vsel %vm200_vm8, 1.0, %v279_v47  ;;  %v202_v14 = vsel %vm198_vm9, 1.0, %v279_v47 }
  0xf4   :  { %v255_v15 = vpack.c.bf16 %v204_v13, %v204_v13  ;;  %v253_v16 = vpack.c.bf16 %v202_v14, %v202_v14 }
  0xf6   :  { %247 = vst.msk [vmem:[%s387_s4 + $0x1c] sm:$0xf] %vm180_vm1, %v255_v15  ;;  %245 = vst.msk [vmem:[%s387_s4 + $0x14] sm:$0xf] %vm180_vm1, %v253_v16 }

// kernel: sew_block_linear.12
= control target key start
LH: loop header
LB: loop body
LE: loop exit
PB: predicated region body
PF: predicated region fallthrough
CT: control target
= control target key end

     0   :  { %vm52_vm0 = vcmask 261120   ;;  %vm16_vm1 = vcmask 254976   ;;  %v225_v10 = vmov 0.0   ;;  %vm181_vm2 = vcmask 1040384   ;;  %s296_s1 = inlined_call_operand.vmem [shape: f32[32,32], index: 1, kind: input, shape index: {}]   ;;  %s297_s0 = inlined_call_operand.vmem [shape: bf16[2,32,32], index: 0, kind: input, shape index: {}]   ;;  %s298_s2 = inlined_call_operand.vmem [shape: f32[2,32], index: 2, kind: output, shape index: {}]  }
   0x1   :  { %v26_v0 = vld [vmem:[%s296_s1] sm:$0xff]  ;;  %v27_v1 = vld [vmem:[%s296_s1 + $0x8] sm:$0xff]  ;;  %v28_v2 = vld [vmem:[%s296_s1 + $0x10] sm:$0xff]  ;;  %17 = vst.msk [vmem:[%s298_s2] sm:$0x3] %vm16_vm1, %v225_v10 }
   0x2   :  { %v30_v3 = vpack.c.bf16 %v27_v1, %v26_v0  ;;  %v29_v4 = vld [vmem:[%s296_s1 + $0x18] sm:$0xff]  ;;  %v221_v6 = vld [vmem:[%s297_s0] sm:$0xff]   ;;  %v223_v7 = vld [vmem:[%s297_s0 + $0x10] sm:$0xff]  }
   0x3   :  { %v31_v5 = vpack.c.bf16 %v29_v4, %v28_v2  ;;  %208 = vmatprep.mubr.msk.bf16.mxu0 %vm52_vm0, %v221_v6  ;;  %212 = vmatprep.mubr.msk.bf16.mxu1 %vm52_vm0, %v223_v7  ;;  %v222_v8 = vld [vmem:[%s297_s0 + $0x8] sm:$0xff]   ;;  %v224_v9 = vld [vmem:[%s297_s0 + $0x18] sm:$0xff]  }
   0x4   :  { %204 = vmatprep.subr.bf16.mxu0 %v30_v3  ;;  %216 = vmatprep.subr.bf16.mxu1 %v30_v3 }
   0x5   :  { %205 = vmatpush3.bf16.msra.mxu0 %v30_v3  ;;  %218 = vmatpush3.bf16.msra.mxu1 %v30_v3 }
   0x6   :  { %206 = vmatprep.subr.bf16.mxu0 %v31_v5  ;;  %217 = vmatprep.subr.bf16.mxu1 %v31_v5 }
   0x9   :  { %207 = vmatpush3.bf16.msra.mxu0 %v31_v5  ;;  %219 = vmatpush3.bf16.msra.mxu1 %v31_v5  ;;  %v180_v5 = vld [vmem:[%s298_s2] sm:$0x3] }
   0xc   :  { %209 = vmatmul.mubr.msk.bf16.vlgmr.msra.gmra.mrb[0].mxu0 %vm52_vm0, %v222_v8  ;;  %213 = vmatmul.mubr.msk.bf16.vlgmr.msra.gmra.mrb[0].mxu1 %vm52_vm0, %v224_v9 }
  0xdf   :  { %v210_v11 = vpop.f32.mrb[0].mxu0  ;;  %v214_v12 = vpop.f32.mrb[0].mxu1 }
  0xe0   :  { %v99_v13 = vpop.f32.mrb[1].mxu0  ;;  %v115_v14 = vpop.f32.mrb[1].mxu1  ;;  %v153_v20 = vmul.f32 %v210_v11, %v210_v11  ;;  %v133_v24 = vsel %vm52_vm0, %v210_v11, 0.0  ;;  %v157_v42 = vmul.f32 %v214_v12, %v214_v12  ;;  %v141_v46 = vsel %vm52_vm0, %v214_v12, 0.0 }
  0xe1   :  { %v151_v15 = vmul.f32 %v99_v13, %v99_v13  ;;  %v211_v16 = vpop.f32.mrb[2].mxu0  ;;  %v215_v17 = vpop.f32.mrb[2].mxu1  ;;  %v130_v21 = vsel %vm52_vm0, %v99_v13, 0.0  ;;  %v155_v29 = vmul.f32 %v115_v14, %v115_v14  ;;  %v137_v34 = vsel %vm52_vm0, %v115_v14, 0.0 }
  0xe2   :  { %v102_v18 = vpop.f32.mrb[3].mxu0  ;;  %v118_v19 = vpop.f32.mrb[3].mxu1  ;;  %v154_v27 = vmul.f32 %v211_v16, %v211_v16  ;;  %v162_v32 = vsel %vm52_vm0, %v153_v20, 0.0  ;;  %v135_v33 = vsel %vm52_vm0, %v211_v16, 0.0  ;;  %v158_v47 = vmul.f32 %v215_v17, %v215_v17 }
  0xe3   :  { %v131_v22 = vsel %vm52_vm0, %v102_v18, 0.0  ;;  %v152_v23 = vmul.f32 %v102_v18, %v102_v18  ;;  %v159_v26 = vsel %vm52_vm0, %v151_v15, 0.0  ;;  %v166_v38 = vsel %vm52_vm0, %v155_v29, 0.0 }
  0xe4   :  { %v132_v25 = vadd.f32 %v131_v22, %v130_v21  ;;  %v164_v37 = vsel %vm52_vm0, %v154_v27, 0.0  ;;  %v156_v39 = vmul.f32 %v118_v19, %v118_v19  ;;  %v139_v43 = vsel %vm52_vm0, %v118_v19, 0.0 }
  0xe5   :  { %v160_v28 = vsel %vm52_vm0, %v152_v23, 0.0  ;;  %v170_v51 = vsel %vm52_vm0, %v157_v42, 0.0  ;;  %v143_v52 = vsel %vm52_vm0, %v215_v17, 0.0  ;;  %v172_v55 = vsel %vm52_vm0, %v158_v47, 0.0 }
  0xe6   :  { %v134_v30 = vadd.f32 %v133_v24, %v132_v25  ;;  %v161_v31 = vadd.f32 %v160_v28, %v159_v26  ;;  %v168_v48 = vsel %vm52_vm0, %v156_v39, 0.0 }
  0xe8   :  { %v163_v35 = vadd.f32 %v162_v32, %v161_v31  ;;  %v136_v36 = vadd.f32 %v135_v33, %v134_v30 }
  0xea   :  { %v138_v40 = vadd.f32 %v137_v34, %v136_v36  ;;  %v165_v41 = vadd.f32 %v164_v37, %v163_v35 }
  0xec   :  { %v167_v44 = vadd.f32 %v166_v38, %v165_v41  ;;  %v140_v45 = vadd.f32 %v139_v43, %v138_v40 }
  0xee   :  { %v142_v49 = vadd.f32 %v141_v46, %v140_v45  ;;  %v169_v50 = vadd.f32 %v168_v48, %v167_v44 }
  0xf0   :  { %v144_v53 = vadd.f32 %v143_v52, %v142_v49  ;;  %v171_v54 = vadd.f32 %v170_v51, %v169_v50 }
  0xf2   :  { %v145_v56 = vrot.slane %v144_v53, 4  ;;  %v173_v57 = vadd.f32 %v172_v55, %v171_v54 }
  0xf4   :  { %v146_v58 = vadd.f32 %v145_v56, %v144_v53  ;;  %v174_v59 = vrot.slane %v173_v57, 4 }
  0xf6   :  { %v147_v60 = vrot.slane %v146_v58, 2  ;;  %v175_v61 = vadd.f32 %v174_v59, %v173_v57 }
  0xf8   :  { %v148_v62 = vadd.f32 %v147_v60, %v146_v58  ;;  %v176_v63 = vrot.slane %v175_v61, 2 }
  0xfa   :  { %v149_v0 = vrot.slane %v148_v62, 1  ;;  %v177_v1 = vadd.f32 %v176_v63, %v175_v61 }
  0xfc   :  { %v178_v2 = vrot.slane %v177_v1, 1  ;;  %v150_v3 = vadd.f32 %v149_v0, %v148_v62 }
  0xfe   :  { %v179_v4 = vadd.f32 %v178_v2, %v177_v1 }
 0x100   :  { %v182_v6 = vsel %vm181_vm2, %v150_v3, %v179_v4 }
 0x101   :  { %v183_v7 = vadd.f32 %v182_v6, %v180_v5 }
 0x103   :  { %185 = vst.msk [vmem:[%s298_s2] sm:$0x3] %vm16_vm1, %v183_v7 }

// kernel: sew_block_linear.14
= control target key start
LH: loop header
LB: loop body
LE: loop exit
PB: predicated region body
PF: predicated region fallthrough
CT: control target
= control target key end

     0   :  { %vm35_vm0 = vcmask 261120   ;;  %v183_v18 = vmov 0.0   ;;  %vm148_vm1 = vcmask 1040384   ;;  %s248_s1 = inlined_call_operand.vmem [shape: f32[32,128], index: 1, kind: input, shape index: {}]   ;;  %s249_s0 = inlined_call_operand.vmem [shape: f32[2,32,32], index: 0, kind: input, shape index: {}]   ;;  %s250_s2 = inlined_call_operand.vmem [shape: f32[2,128], index: 2, kind: output, shape index: {}]  }
   0x1   :  { %v29_v0 = vld [vmem:[%s248_s1] sm:$0xff]  ;;  %v30_v1 = vld [vmem:[%s248_s1 + $0x8] sm:$0xff]  ;;  %v31_v2 = vld [vmem:[%s248_s1 + $0x10] sm:$0xff]  ;;  %16 = vst [vmem:[%s250_s2] sm:$0x3] %v183_v18 }
   0x2   :  { %v33_v3 = vpack.c.bf16 %v30_v1, %v29_v0  ;;  %v32_v4 = vld [vmem:[%s248_s1 + $0x18] sm:$0xff]  ;;  %v17_v5 = vld [vmem:[%s249_s0] sm:$0xff]  ;;  %v18_v6 = vld [vmem:[%s249_s0 + $0x8] sm:$0xff] }
   0x3   :  { %v34_v7 = vpack.c.bf16 %v32_v4, %v31_v2  ;;  %v25_v8 = vpack.c.bf16 %v18_v6, %v17_v5  ;;  %v21_v9 = vld [vmem:[%s249_s0 + $0x20] sm:$0xff]  ;;  %v19_v10 = vld [vmem:[%s249_s0 + $0x10] sm:$0xff]  ;;  %v22_v11 = vld [vmem:[%s249_s0 + $0x28] sm:$0xff] }
   0x4   :  { %166 = vmatprep.subr.bf16.mxu0 %v33_v3  ;;  %178 = vmatprep.subr.bf16.mxu1 %v33_v3  ;;  %v20_v12 = vld [vmem:[%s249_s0 + $0x18] sm:$0xff]  ;;  %v27_v13 = vpack.c.bf16 %v22_v11, %v21_v9  ;;  %v23_v14 = vld [vmem:[%s249_s0 + $0x30] sm:$0xff] }
   0x5   :  { %167 = vmatpush3.bf16.msra.mxu0 %v33_v3  ;;  %180 = vmatpush3.bf16.msra.mxu1 %v33_v3  ;;  %v24_v15 = vld [vmem:[%s249_s0 + $0x38] sm:$0xff]  ;;  %v26_v16 = vpack.c.bf16 %v20_v12, %v19_v10 }
   0x6   :  { %168 = vmatprep.subr.bf16.mxu0 %v34_v7  ;;  %170 = vmatprep.mubr.msk.bf16.mxu0 %vm35_vm0, %v25_v8  ;;  %v28_v17 = vpack.c.bf16 %v24_v15, %v23_v14 }
   0x7   :  { %179 = vmatprep.subr.bf16.mxu1 %v34_v7  ;;  %174 = vmatprep.mubr.msk.bf16.mxu1 %vm35_vm0, %v27_v13 }
   0x8   :  { %v147_v61 = vld [vmem:[%s250_s2] sm:$0x3] }
   0x9   :  { %169 = vmatpush3.bf16.msra.mxu0 %v34_v7  ;;  %181 = vmatpush3.bf16.msra.mxu1 %v34_v7 }
   0xc   :  { %171 = vmatmul.mubr.msk.bf16.vlgmr.msra.gmra.mrb[0].mxu0 %vm35_vm0, %v26_v16  ;;  %175 = vmatmul.mubr.msk.bf16.vlgmr.msra.gmra.mrb[0].mxu1 %vm35_vm0, %v28_v17 }
  0xdf   :  { %v172_v19 = vpop.f32.mrb[0].mxu0  ;;  %v176_v20 = vpop.f32.mrb[0].mxu1 }
  0xe0   :  { %v82_v21 = vpop.f32.mrb[1].mxu0  ;;  %v98_v22 = vpop.f32.mrb[1].mxu1  ;;  %v128_v30 = vmul.f32 %v172_v19, %v172_v19  ;;  %v132_v42 = vmul.f32 %v176_v20, %v176_v20 }
  0xe1   :  { %v173_v23 = vpop.f32.mrb[2].mxu0  ;;  %v177_v24 = vpop.f32.mrb[2].mxu1  ;;  %v126_v27 = vmul.f32 %v82_v21, %v82_v21  ;;  %v130_v36 = vmul.f32 %v98_v22, %v98_v22 }
  0xe2   :  { %v85_v25 = vpop.f32.mrb[3].mxu0  ;;  %v101_v26 = vpop.f32.mrb[3].mxu1  ;;  %v129_v33 = vmul.f32 %v173_v23, %v173_v23  ;;  %v133_v45 = vmul.f32 %v177_v24, %v177_v24 }
  0xe3   :  { %v113_v28 = vadd.f32 %v85_v25, %v82_v21  ;;  %v127_v29 = vmul.f32 %v85_v25, %v85_v25  ;;  %v131_v41 = vmul.f32 %v101_v26, %v101_v26 }
  0xe5   :  { %v114_v31 = vadd.f32 %v172_v19, %v113_v28  ;;  %v134_v32 = vadd.f32 %v127_v29, %v126_v27 }
  0xe7   :  { %v135_v34 = vadd.f32 %v134_v32, %v128_v30  ;;  %v115_v35 = vadd.f32 %v173_v23, %v114_v31 }
  0xe9   :  { %v116_v37 = vadd.f32 %v115_v35, %v98_v22  ;;  %v136_v38 = vadd.f32 %v135_v34, %v129_v33 }
  0xeb   :  { %v137_v39 = vadd.f32 %v136_v38, %v130_v36  ;;  %v117_v40 = vadd.f32 %v116_v37, %v101_v26 }
  0xed   :  { %v118_v43 = vadd.f32 %v176_v20, %v117_v40  ;;  %v138_v44 = vadd.f32 %v137_v39, %v131_v41 }
  0xef   :  { %v119_v46 = vadd.f32 %v177_v24, %v118_v43  ;;  %v139_v47 = vadd.f32 %v138_v44, %v132_v42 }
  0xf1   :  { %v120_v48 = vrot.slane %v119_v46, 4  ;;  %v140_v49 = vadd.f32 %v139_v47, %v133_v45 }
  0xf3   :  { %v121_v50 = vadd.f32 %v120_v48, %v119_v46  ;;  %v141_v51 = vrot.slane %v140_v49, 4 }
  0xf5   :  { %v122_v52 = vrot.slane %v121_v50, 2  ;;  %v142_v53 = vadd.f32 %v141_v51, %v140_v49 }
  0xf7   :  { %v123_v54 = vadd.f32 %v122_v52, %v121_v50  ;;  %v143_v55 = vrot.slane %v142_v53, 2 }
  0xf9   :  { %v124_v56 = vrot.slane %v123_v54, 1  ;;  %v144_v57 = vadd.f32 %v143_v55, %v142_v53 }
  0xfb   :  { %v145_v58 = vrot.slane %v144_v57, 1  ;;  %v125_v59 = vadd.f32 %v124_v56, %v123_v54 }
  0xfd   :  { %v146_v60 = vadd.f32 %v145_v58, %v144_v57 }
  0xff   :  { %v149_v62 = vsel %vm148_vm1, %v125_v59, %v146_v60 }
 0x100   :  { %v150_v63 = vadd.f32 %v149_v62, %v147_v61 }
 0x102   :  { %151 = vst [vmem:[%s250_s2] sm:$0x3] %v150_v63 }

// kernel: sew_block_linear.11
= control target key start
LH: loop header
LB: loop body
LE: loop exit
PB: predicated region body
PF: predicated region fallthrough
CT: control target
= control target key end

     0   :  { %s1900_s6 = smov 0   ;;  %s1902_s7 = smov 0   ;;  %s2118_s0 = inlined_call_operand.vmem [shape: bf16[2,2,16,96], index: 0, kind: input, shape index: {}]   ;;  %s2119_s1 = inlined_call_operand.vmem [shape: bf16[2,2,16,32], index: 1, kind: output, shape index: {}]  }
   0x1   :  { %s1904_s8 = smov 0  }
   0x2 LB: > { %s1527_s9 = sadd.s32 4294967295, %s1872_s8   ;;  %s1917_s10 = sadd.s32 1, %s1872_s8   ;;  %s1872_s8 = sphi %s1904_s8, %s2123_s8   ;;  %s1868_s7 = sphi %s1902_s7, %s2122_s7   ;;  %s1864_s6 = sphi %s1900_s6, %s2121_s6  }
   0x3   : > { %s15_s11 = ssub.s32 %s1872_s8, %s1917_s10  ;;  %s18_s12 = sadd.s32 1, %s1868_s7 }
   0x4   : > { %p16_p0 = scmp.eq.s32.totalorder %s15_s11, 0  ;;  %p25_p1 = scmp.ne.s32.totalorder %s1868_s7, %s1864_s6 }
   0x5   : > { %p26_p2 = scmp.eq.s32.totalorder %s1872_s8, 0  ;;  %p55_p3 = scmp.eq.s32.totalorder %s1527_s9, 1 }
   0x6   : > { %s1928_s13 = scalar_select %p16_p0, %s1868_s7, %s18_s12  }
   0x7   : > { %p27_p4 = por %p26_p2, %p25_p1  ;;  %p1930_p5 = por %p55_p3, %p25_p1 }
   0x8   : > { %p1530_p6 = scmp.ge.s32.totalorder %s1872_s8, 2 }
   0xa   : > { %77 = sbr.rel (%p1530_p6) target bundleno = 24 (0x18), region = 16 }
  0x11   : > { %80 = sbr.rel (!%p27_p4) target bundleno = 24 (0x18), region = 20  ;;  %s82_s15 = sand.u32 (%p27_p4), 1, %s1868_s7  }
  0x12   : > { %s1576_s16 = sshll.u32 (%p27_p4), %s1872_s8, 3  ;;  %s1531_s17 = sshll.u32 (%p27_p4), %s82_s15, 4 }
  0x13   : > { %s87_s20 = scalar_lea.vmem (%p27_p4), %s2118_s0, %s1576_s16  ;;  %s84_s21 = scalar_lea.vmem (%p27_p4), [#allocation2], %s1531_s17 }
  0x14   : > { %v103_v0 = vld [vmem:[%s87_s20] sm:$0xff] (%p27_p4)   ;;  %v107_v1 = vld [vmem:[%s87_s20 + $0x10] sm:$0xff] (%p27_p4)  }
  0x15   : > { %104 = vst [vmem:[%s84_s21] sm:$0xff] (%p27_p4), %v103_v0   ;;  %108 = vst [vmem:[%s84_s21 + $0x8] sm:$0xff] (%p27_p4), %v107_v1  }
  0x18 PF: > { %p1534_p7 = scmp.ge.s32.totalorder %s1872_s8, 1  ;;  %p140_p8 = scmp.lt.s32.totalorder %s1872_s8, 3 }
  0x1a   : > { %p141_p9 = pnand %p1534_p7, %p140_p8 }
  0x1b   : > { %s147_s22 = sand.u32 (!%p141_p9), 1, %s1864_s6   ;;  %v1874_v2 = vmov (!%p141_p9), 0.0   ;;  %vm1875_vm0 = vmmov (!%p141_p9), 0   ;;  %s1876_s25 = smov (!%p141_p9), 96   ;;  %vm175_vm1 = vcmask (!%p141_p9), 64512   ;;  %vm235_vm2 = vcmask (!%p141_p9), 130048  }
  0x1c   : > { %144 = sbr.rel (%p141_p9) target bundleno = 1641 (0x669), region = 61  ;;  %s1943_s23 = sshll.u32 (!%p141_p9), %s147_s22, 4  ;;  %1630 = vmatprep.subr.bf16.mxu0 (!%p141_p9), %v1874_v2  ;;  %1632 = vmatprep.mubr.msk.bf16.mxu0 (!%p141_p9), %vm1875_vm0, %v1874_v2  ;;  %vm765_vm3 = vcmask (!%p141_p9), 195584   ;;  %vm786_vm5 = vcmask (!%p141_p9), 257024  }
  0x1d   : > { %s149_s24 = scalar_lea.vmem (!%p141_p9), [#allocation2], %s1943_s23  ;;  %s1877_s26 = smov (!%p141_p9), 88  }
  0x1e   : > { %v166_v3 = vld [vmem:[%s149_s24] sm:$0xff] (!%p141_p9)   ;;  %s1878_s27 = smov (!%p141_p9), 64   ;;  %s1879_s28 = smov (!%p141_p9), 120   ;;  %v1969_v13 = vld [vmem:[%s149_s24 + $0x8] sm:$0xff] (!%p141_p9)  }
  0x1f   : > { %v225_v4 = vunpack.c.l.bf16 (!%p141_p9), %v166_v3  ;;  %v226_v5 = vunpack.c.h.bf16 (!%p141_p9), %v166_v3  ;;  %173 = vrot.lane.b32.xlu0 (!%p141_p9), %v166_v3, %s1876_s25  ;;  %319 = vrot.lane.b32.xlu1 (!%p141_p9), %v166_v3, %s1877_s26  ;;  %s1880_s29 = smov (!%p141_p9), 80   ;;  %s1881_s30 = smov (!%p141_p9), 112   ;;  %v848_v34 = vunpack.c.l.bf16 (!%p141_p9), %v1969_v13  ;;  %v849_v35 = vunpack.c.h.bf16 (!%p141_p9), %v1969_v13 }
  0x20   : > { %s1882_s2 = smov (!%p141_p9), 56   ;;  %s1883_s3 = smov (!%p141_p9), 48  }
  0x21   : > { %v1952_v6 = vpack.i.bf16 (!%p141_p9), %v226_v5, %v225_v4  ;;  %s1884_s4 = smov (!%p141_p9), 72   ;;  %s1885_s5 = smov (!%p141_p9), 104   ;;  %v1826_v36 = vpack.i.bf16 (!%p141_p9), %v849_v35, %v848_v34 }
  0x22   : > { %s1886_s6 = smov (!%p141_p9), 40   ;;  %s1887_s11 = smov (!%p141_p9), 8  }
  0x23   : > { %1807 = vrot.lane.b32.xlu0 %v1952_v6, %s1878_s27  ;;  %317 = vrot.lane.b32.xlu1 %v166_v3, %s1879_s28  ;;  %s1888_s12 = smov 16   ;;  %s1889_s15 = smov 24  }
  0x24   : > { %s2071_s16 = scalar_lea.vmem [#allocation3], %s1943_s23  ;;  %s1581_s17 = sshll.u32 (%p1930_p5), %s1527_s9, 3 }
  0x25   : > { %s1419_s20 = scalar_lea.vmem (%p1930_p5), %s2119_s1, %s1581_s17 }
  0x27   : > { %459 = vrot.lane.b32.xlu0 %v166_v3, %s1880_s29  ;;  %457 = vrot.lane.b32.xlu1 %v166_v3, %s1881_s30 }
  0x2b   : > { %1812 = vrot.lane.b32.xlu0 %v1952_v6, %s1882_s2  ;;  %1817 = vrot.lane.b32.xlu1 %v1952_v6, %s1883_s3 }
  0x2f   : > { %599 = vrot.lane.b32.xlu0 %v166_v3, %s1884_s4  ;;  %597 = vrot.lane.b32.xlu1 %v166_v3, %s1885_s5 }
  0x33   : > { %797 = vrot.lane.b32.xlu0 %v1969_v13, %s1876_s25  ;;  %1822 = vrot.lane.b32.xlu1 %v1952_v6, %s1886_s6 }
  0x37   : > { %1827 = vrot.lane.b32.xlu0 %v1826_v36, %s1878_s27  ;;  %941 = vrot.lane.b32.xlu1 %v1969_v13, %s1877_s26 }
  0x3b   : > { %939 = vrot.lane.b32.xlu0 %v1969_v13, %s1879_s28  ;;  %1081 = vrot.lane.b32.xlu1 %v1969_v13, %s1880_s29 }
  0x3f   : > { %1079 = vrot.lane.b32.xlu0 %v1969_v13, %s1881_s30  ;;  %1832 = vrot.lane.b32.xlu1 %v1826_v36, %s1882_s2 }
  0x43   : > { %1837 = vrot.lane.b32.xlu0 %v1826_v36, %s1883_s3  ;;  %1221 = vrot.lane.b32.xlu1 %v1969_v13, %s1884_s4 }
  0x47   : > { %1219 = vrot.lane.b32.xlu0 %v1969_v13, %s1885_s5  ;;  %1842 = vrot.lane.b32.xlu1 %v1826_v36, %s1886_s6 }
  0x91   : > { %v174_v7 = vpop.permute.xlu0 %173  ;;  %v320_v15 = vpop.permute.xlu1 %319 }
  0x92   : > { %v180_v8 = vsel %vm175_vm1, %v174_v7, 0  ;;  %v325_v20 = vsel %vm175_vm1, %v320_v15, 0 }
  0x93   : > { %1631 = vmatpush3.bf16.xpose.msra.mxu0 %v180_v8 }
  0x95   : > { %v1808_v9 = vpop.permute.xlu0 %1807  ;;  %v318_v24 = vpop.permute.xlu1 %317 }
  0x96   : > { %v1810_v10 = vunpack.i.h.bf16 %v1808_v9  ;;  %v1809_v11 = vunpack.i.l.bf16 %v1808_v9 }
  0x98   : > { %v1734_v12 = vpack.c.bf16 %v1810_v10, %v1809_v11 }
  0x99   : > { %v460_v22 = vpop.permute.xlu0 %459  ;;  %v458_v29 = vpop.permute.xlu1 %457 }
  0x9a   : > { %1633 = vmatmul.mubr.msk.bf16.vlgmr.msra.gmra.mrb[0].mxu0 %vm175_vm1, %v166_v3  ;;  %1735 = vmatprep.subr.bf16.mxu1 %v1734_v12  ;;  %v465_v27 = vsel %vm175_vm1, %v460_v22, 0 }
  0x9b   : > { %1737 = vmatpush3.bf16.msra.mxu1 %v1734_v12 }
  0x9c   : > { %1643 = vmatprep.subr.bf16.mxu1 %v1874_v2 }
  0x9d   : > { %v1813_v23 = vpop.permute.xlu0 %1812  ;;  %v1818_v30 = vpop.permute.xlu1 %1817 }
  0x9e   : > { %v1815_v25 = vunpack.i.h.bf16 %v1813_v23  ;;  %v1814_v26 = vunpack.i.l.bf16 %v1813_v23  ;;  %v1820_v31 = vunpack.i.h.bf16 %v1818_v30  ;;  %v1819_v32 = vunpack.i.l.bf16 %v1818_v30 }
  0xa0   : > { %v1738_v28 = vpack.c.bf16 %v1815_v25, %v1814_v26  ;;  %v1742_v33 = vpack.c.bf16 %v1820_v31, %v1819_v32 }
  0xa1   : > { %v600_v48 = vpop.permute.xlu0 %599  ;;  %v598_v54 = vpop.permute.xlu1 %597 }
  0xa2   : > { %1739 = vmatprep.subr.bf16.mxu0 %v1738_v28  ;;  %v605_v52 = vsel %vm175_vm1, %v600_v48, 0 }
  0xa3   : > { %1741 = vmatpush3.bf16.msra.mxu0 %v1738_v28 }
  0xa4   : > { %1743 = vmatprep.subr.bf16.mxu0 %v1742_v33 }
  0xa5   : > { %v798_v53 = vpop.permute.xlu0 %797  ;;  %v1823_v56 = vpop.permute.xlu1 %1822 }
  0xa6   : > { %v803_v55 = vsel %vm175_vm1, %v798_v53, 0  ;;  %v1825_v57 = vunpack.i.h.bf16 %v1823_v56  ;;  %v1824_v58 = vunpack.i.l.bf16 %v1823_v56 }
  0xa8   : > { %v1746_v59 = vpack.c.bf16 %v1825_v57, %v1824_v58 }
  0xa9   : > { %v1828_v60 = vpop.permute.xlu0 %1827  ;;  %v942_v0 = vpop.permute.xlu1 %941 }
  0xaa   : > { %v1830_v61 = vunpack.i.h.bf16 %v1828_v60  ;;  %v1829_v62 = vunpack.i.l.bf16 %v1828_v60  ;;  %v947_v30 = vsel %vm175_vm1, %v942_v0, 0 }
  0xac   : > { %v1750_v63 = vpack.c.bf16 %v1830_v61, %v1829_v62 }
  0xad   : > { %v940_v1 = vpop.permute.xlu0 %939  ;;  %v1082_v3 = vpop.permute.xlu1 %1081 }
  0xae   : > { %v1087_v34 = vsel %vm175_vm1, %v1082_v3, 0 }
  0xb1   : > { %v1080_v4 = vpop.permute.xlu0 %1079  ;;  %v1833_v5 = vpop.permute.xlu1 %1832 }
  0xb2   : > { %v1835_v7 = vunpack.i.h.bf16 %v1833_v5  ;;  %v1834_v8 = vunpack.i.l.bf16 %v1833_v5 }
  0xb4   : > { %v1754_v11 = vpack.c.bf16 %v1835_v7, %v1834_v8 }
  0xb5   : > { %v1838_v6 = vpop.permute.xlu0 %1837  ;;  %v1222_v26 = vpop.permute.xlu1 %1221 }
  0xb6   : > { %v1840_v9 = vunpack.i.h.bf16 %v1838_v6  ;;  %v1839_v10 = vunpack.i.l.bf16 %v1838_v6 }
  0xb8   : > { %v2023_v12 = vpack.c.bf16 %v1840_v9, %v1839_v10 }
  0xb9   : > { %v1843_v31 = vpop.permute.xlu1 %1842 }
  0xba   : > { %v1845_v32 = vunpack.i.h.bf16 %v1843_v31 }
 0x16d   : > { %v216_v14 = vpop.f32.mrb[0].mxu0 }
 0x16e   : > { %v223_v16 = vmul.f32 0.125, %v216_v14  ;;  %v1634_v17 = vpop.f32.mrb[1].mxu0 }
 0x16f   : > { %v219_v18 = vpop.f32.mrb[2].mxu0 }
 0x170   : > { %v224_v19 = vmul.f32 0.125, %v219_v18  ;;  %v1635_v21 = vpop.f32.mrb[3].mxu0  ;;  %1640 = vmatprep.mubr.msk.f32.mxu1 %vm235_vm2, %v223_v16 }
 0x172   : > { %1641 = vmatmul.mubr.msk.f32.vlgmr.msra.gmra.mrb[0].mxu1 %vm235_vm2, %v224_v19 }
 0x173   : > { %1644 = vmatpush3.bf16.xpose.msra.mxu1 %v325_v20  ;;  %1645 = vmatprep.mubr.msk.bf16.mxu1 %vm1875_vm0, %v1874_v2 }
 0x174   : > { %1656 = vmatprep.subr.bf16.mxu1 %v1874_v2 }
 0x17a   : > { %1646 = vmatmul.mubr.msk.bf16.vlgmr.msra.gmra.mrb[4].mxu1 %vm175_vm1, %v318_v24 }
 0x17b   : > { %1657 = vmatpush3.bf16.xpose.msra.mxu1 %v465_v27  ;;  %1658 = vmatprep.mubr.msk.bf16.mxu1 %vm1875_vm0, %v1874_v2 }
 0x17c   : > { %1747 = vmatprep.subr.bf16.mxu1 %v1746_v59 }
 0x182   : > { %1659 = vmatmul.mubr.msk.bf16.vlgmr.msra.gmra.mrb[8].mxu1 %vm175_vm1, %v458_v29 }
 0x183   : > { %1749 = vmatpush3.bf16.msra.mxu1 %v1746_v59 }
 0x184   : > { %1751 = vmatprep.subr.bf16.mxu1 %v1750_v63 }
 0x245   : > { %v2004_v37 = vpop.f32.mrb[0].mxu1 }
 0x246   : > { %v2006_v38 = vpop.f32.mrb[1].mxu1 }
 0x24d   : > { %v361_v39 = vpop.f32.mrb[4].mxu1 }
 0x24e   : > { %v368_v40 = vmul.f32 0.125, %v361_v39  ;;  %v1647_v41 = vpop.f32.mrb[5].mxu1 }
 0x24f   : > { %v364_v42 = vpop.f32.mrb[6].mxu1 }
 0x250   : > { %v369_v43 = vmul.f32 0.125, %v364_v42  ;;  %v1648_v44 = vpop.f32.mrb[7].mxu1  ;;  %1653 = vmatprep.mubr.msk.f32.mxu0 %vm235_vm2, %v368_v40 }
 0x252   : > { %1654 = vmatmul.mubr.msk.f32.vlgmr.msra.gmra.mrb[4].mxu0 %vm235_vm2, %v369_v43 }
 0x253   : > { %1745 = vmatpush3.bf16.msra.mxu0 %v1742_v33  ;;  %v1844_v33 = vunpack.i.l.bf16 %v1843_v31 }
 0x254   : > { %1669 = vmatprep.subr.bf16.mxu0 %v1874_v2 }
 0x255   : > { %v501_v45 = vpop.f32.mrb[8].mxu1  ;;  %v1762_v35 = vpack.c.bf16 %v1845_v32, %v1844_v33 }
 0x256   : > { %v508_v46 = vmul.f32 0.125, %v501_v45  ;;  %v1660_v47 = vpop.f32.mrb[9].mxu1 }
 0x257   : > { %v504_v49 = vpop.f32.mrb[10].mxu1 }
 0x258   : > { %v509_v50 = vmul.f32 0.125, %v504_v49  ;;  %v1661_v51 = vpop.f32.mrb[11].mxu1  ;;  %1666 = vmatprep.mubr.msk.f32.mxu0 %vm235_vm2, %v508_v46 }
 0x25a   : > { %1667 = vmatmul.mubr.msk.f32.vlgmr.msra.gmra.mrb[6].mxu0 %vm235_vm2, %v509_v50 }
 0x25b   : > { %1671 = vmatprep.mubr.msk.bf16.mxu0 %vm1875_vm0, %v1874_v2 }
 0x25c   : > { %1670 = vmatpush3.bf16.xpose.msra.mxu0 %v605_v52 }
 0x25d   : > { %1682 = vmatprep.subr.bf16.mxu0 %v1874_v2 }
 0x263   : > { %1672 = vmatmul.mubr.msk.bf16.vlgmr.msra.gmra.mrb[8].mxu0 %vm175_vm1, %v598_v54  ;;  %v1227_v54 = vsel %vm175_vm1, %v1222_v26, 0 }
 0x264   : > { %1683 = vmatpush3.bf16.xpose.msra.mxu0 %v803_v55  ;;  %1684 = vmatprep.mubr.msk.bf16.mxu0 %vm1875_vm0, %v1874_v2  ;;  %v1220_v55 = vpop.permute.xlu0 %1219 }
 0x265   : > { %1755 = vmatprep.subr.bf16.mxu0 %v1754_v11 }
 0x26b   : > { %1685 = vmatmul.mubr.msk.bf16.vlgmr.msra.gmra.mrb[12].mxu0 %vm175_vm1, %v1969_v13 }
 0x26c   : > { %1757 = vmatpush3.bf16.msra.mxu0 %v1754_v11 }
 0x26d   : > { %1759 = vmatprep.subr.bf16.mxu0 %v2023_v12 }
 0x325   : > { %v1655_v13 = vpop.f32.mrb[4].mxu0 }
 0x326   : > { %741 = vrot.lane.b32.xlu1 %v1655_v13, %s1887_s11  ;;  %v448_v14 = vpop.f32.mrb[5].mxu0 }
 0x327   : > { %739 = vrot.lane.b32.xlu0 %v448_v14, %s1887_s11 }
 0x32d   : > { %v1668_v15 = vpop.f32.mrb[6].mxu0 }
 0x32e   : > { %749 = vrot.lane.b32.xlu1 %v1668_v15, %s1888_s12  ;;  %v588_v16 = vpop.f32.mrb[7].mxu0 }
 0x32f   : > { %747 = vrot.lane.b32.xlu0 %v588_v16, %s1888_s12 }
 0x336   : > { %v641_v17 = vpop.f32.mrb[8].mxu0 }
 0x337   : > { %v648_v18 = vmul.f32 0.125, %v641_v17  ;;  %v1673_v19 = vpop.f32.mrb[9].mxu0 }
 0x338   : > { %v644_v20 = vpop.f32.mrb[10].mxu0 }
 0x339   : > { %v649_v21 = vmul.f32 0.125, %v644_v20  ;;  %v1674_v22 = vpop.f32.mrb[11].mxu0  ;;  %1679 = vmatprep.mubr.msk.f32.mxu1 %vm235_vm2, %v648_v18 }
 0x33b   : > { %1680 = vmatmul.mubr.msk.f32.vlgmr.msra.gmra.mrb[2].mxu1 %vm235_vm2, %v649_v21 }
 0x33c   : > { %1753 = vmatpush3.bf16.msra.mxu1 %v1750_v63 }
 0x33d   : > { %1695 = vmatprep.subr.bf16.mxu1 %v1874_v2 }
 0x33e   : > { %v839_v23 = vpop.f32.mrb[12].mxu0 }
 0x33f   : > { %v846_v24 = vmul.f32 0.125, %v839_v23  ;;  %v1686_v25 = vpop.f32.mrb[13].mxu0 }
 0x340   : > { %v842_v27 = vpop.f32.mrb[14].mxu0 }
 0x341   : > { %v847_v28 = vmul.f32 0.125, %v842_v27  ;;  %v1687_v29 = vpop.f32.mrb[15].mxu0  ;;  %1692 = vmatprep.mubr.msk.f32.mxu1 %vm235_vm2, %v846_v24 }
 0x343   : > { %1693 = vmatmul.mubr.msk.f32.vlgmr.msra.gmra.mrb[12].mxu1 %vm235_vm2, %v847_v28 }
 0x344   : > { %1697 = vmatprep.mubr.msk.bf16.mxu1 %vm1875_vm0, %v1874_v2 }
 0x345   : > { %1696 = vmatpush3.bf16.xpose.msra.mxu1 %v947_v30 }
 0x346   : > { %1708 = vmatprep.subr.bf16.mxu1 %v1874_v2 }
 0x34c   : > { %1698 = vmatmul.mubr.msk.bf16.vlgmr.msra.gmra.mrb[16].mxu1 %vm175_vm1, %v940_v1 }
 0x34d   : > { %1709 = vmatpush3.bf16.xpose.msra.mxu1 %v1087_v34  ;;  %1710 = vmatprep.mubr.msk.bf16.mxu1 %vm1875_vm0, %v1874_v2 }
 0x34e   : > { %1763 = vmatprep.subr.bf16.mxu1 %v1762_v35 }
 0x354   : > { %1711 = vmatmul.mubr.msk.bf16.vlgmr.msra.gmra.mrb[20].mxu1 %vm175_vm1, %v1080_v4 }
 0x355   : > { %1765 = vmatpush3.bf16.msra.mxu1 %v1762_v35 }
 0x398   : > { %v742_v56 = vpop.permute.xlu1 %741 }
 0x399   : > { %v740_v57 = vpop.permute.xlu0 %739  ;;  %v762_v60 = vsel %vm175_vm1, %v2004_v37, %v742_v56 }
 0x39a   : > { %v761_v61 = vsel %vm175_vm1, %v2006_v38, %v740_v57 }
 0x3a0   : > { %v750_v58 = vpop.permute.xlu1 %749 }
 0x3a1   : > { %v748_v59 = vpop.permute.xlu0 %747  ;;  %v764_v62 = vsel %vm235_vm2, %v762_v60, %v750_v58 }
 0x3a2   : > { %v763_v0 = vsel %vm235_vm2, %v761_v61, %v748_v59 }
 0x40e   : > { %v1681_v36 = vpop.f32.mrb[2].mxu1 }
 0x40f   : > { %757 = vrot.lane.b32.xlu1 %v1681_v36, %s1889_s15  ;;  %v728_v39 = vpop.f32.mrb[3].mxu1 }
 0x410   : > { %755 = vrot.lane.b32.xlu0 %v728_v39, %s1889_s15 }
 0x416   : > { %v2046_v40 = vpop.f32.mrb[12].mxu1 }
 0x417   : > { %v2048_v41 = vpop.f32.mrb[13].mxu1 }
 0x41f   : > { %v983_v42 = vpop.f32.mrb[16].mxu1 }
 0x420   : > { %v990_v43 = vmul.f32 0.125, %v983_v42  ;;  %v1699_v44 = vpop.f32.mrb[17].mxu1 }
 0x421   : > { %v986_v45 = vpop.f32.mrb[18].mxu1 }
 0x422   : > { %v991_v46 = vmul.f32 0.125, %v986_v45  ;;  %v1700_v47 = vpop.f32.mrb[19].mxu1  ;;  %1705 = vmatprep.mubr.msk.f32.mxu0 %vm235_vm2, %v990_v43 }
 0x424   : > { %1706 = vmatmul.mubr.msk.f32.vlgmr.msra.gmra.mrb[16].mxu0 %vm235_vm2, %v991_v46 }
 0x425   : > { %1761 = vmatpush3.bf16.msra.mxu0 %v2023_v12 }
 0x426   : > { %1721 = vmatprep.subr.bf16.mxu0 %v1874_v2 }
 0x427   : > { %v1123_v48 = vpop.f32.mrb[20].mxu1 }
 0x428   : > { %v1130_v49 = vmul.f32 0.125, %v1123_v48  ;;  %v1712_v50 = vpop.f32.mrb[21].mxu1 }
 0x429   : > { %v1126_v51 = vpop.f32.mrb[22].mxu1 }
 0x42a   : > { %v1131_v52 = vmul.f32 0.125, %v1126_v51  ;;  %v1713_v53 = vpop.f32.mrb[23].mxu1  ;;  %1718 = vmatprep.mubr.msk.f32.mxu0 %vm235_vm2, %v1130_v49 }
 0x42c   : > { %1719 = vmatmul.mubr.msk.f32.vlgmr.msra.gmra.mrb[18].mxu0 %vm235_vm2, %v1131_v52 }
 0x42d   : > { %1723 = vmatprep.mubr.msk.bf16.mxu0 %vm1875_vm0, %v1874_v2 }
 0x42e   : > { %1722 = vmatpush3.bf16.xpose.msra.mxu0 %v1227_v54 }
 0x435   : > { %1724 = vmatmul.mubr.msk.bf16.vlgmr.msra.gmra.mrb[20].mxu0 %vm175_vm1, %v1220_v55 }
 0x481   : > { %v758_v63 = vpop.permute.xlu1 %757 }
 0x482   : > { %v767_v1 = vsel %vm765_vm3, %v764_v62, %v758_v63  ;;  %v756_v3 = vpop.permute.xlu0 %755 }
 0x483   : > { %v769_v4 = vmul.f32 0.5, %v767_v1  ;;  %v766_v5 = vsel %vm765_vm3, %v763_v0, %v756_v3 }
 0x484   : > { %v768_v6 = vmul.f32 0.5, %v766_v5 }
 0x485   : > { %vm773_vm4 = vcmp.ge.f32.partialorder %v769_v4, 0.5 }
 0x486   : > { %v775_v37 = vsel %vm773_vm4, 1.0, %v1874_v2  ;;  %vm772_vm6 = vcmp.ge.f32.partialorder %v768_v6, 0.5  ;;  %v777_v7 = vsel %vm773_vm4, 0.0, %v769_v4 }
 0x487   : > { %v1578_v38 = vpack.c.bf16 %v775_v37, %v775_v37  ;;  %v774_v8 = vsel %vm772_vm6, 1.0, %v1874_v2  ;;  %v776_v9 = vsel %vm772_vm6, 0.0, %v768_v6 }
 0x488   : > { %v1577_v10 = vpack.c.bf16 %v774_v8, %v774_v8 }
 0x489   : > { %788 = vst.msk [vmem:[%s2071_s16 + $0x4] sm:$0xf] %vm786_vm5, %v1578_v38 }
 0x48a   : > { %787 = vst.msk [vmem:[%s2071_s16] sm:$0xf] %vm786_vm5, %v1577_v10 }
 0x491   : > { %v1435_v47 = vld [vmem:[%s2071_s16] sm:$0xff] (%p1930_p5)  }
 0x492   : > { %1436 = vst [vmem:[%s1419_s20] sm:$0xff] (%p1930_p5), %v1435_v47  }
 0x4f7   : > { %v1707_v11 = vpop.f32.mrb[16].mxu0 }
 0x4f8   : > { %1363 = vrot.lane.b32.xlu1 %v1707_v11, %s1887_s11  ;;  %v1070_v12 = vpop.f32.mrb[17].mxu0 }
 0x4f9   : > { %1361 = vrot.lane.b32.xlu0 %v1070_v12, %s1887_s11 }
 0x4ff   : > { %v1720_v13 = vpop.f32.mrb[18].mxu0 }
 0x500   : > { %1371 = vrot.lane.b32.xlu1 %v1720_v13, %s1888_s12  ;;  %v1210_v14 = vpop.f32.mrb[19].mxu0 }
 0x501   : > { %1369 = vrot.lane.b32.xlu0 %v1210_v14, %s1888_s12 }
 0x508   : > { %v1263_v15 = vpop.f32.mrb[20].mxu0 }
 0x509   : > { %v1270_v16 = vmul.f32 0.125, %v1263_v15  ;;  %v1725_v17 = vpop.f32.mrb[21].mxu0 }
 0x50a   : > { %v1266_v18 = vpop.f32.mrb[22].mxu0 }
 0x50b   : > { %v1271_v19 = vmul.f32 0.125, %v1266_v18  ;;  %v1726_v20 = vpop.f32.mrb[23].mxu0  ;;  %1731 = vmatprep.mubr.msk.f32.mxu1 %vm235_vm2, %v1270_v16 }
 0x50d   : > { %1732 = vmatmul.mubr.msk.f32.vlgmr.msra.gmra.mrb[14].mxu1 %vm235_vm2, %v1271_v19 }
 0x56a   : > { %v1364_v23 = vpop.permute.xlu1 %1363 }
 0x56b   : > { %v1362_v24 = vpop.permute.xlu0 %1361  ;;  %v1384_v27 = vsel %vm175_vm1, %v2046_v40, %v1364_v23 }
 0x56c   : > { %v1383_v28 = vsel %vm175_vm1, %v2048_v41, %v1362_v24 }
 0x572   : > { %v1372_v25 = vpop.permute.xlu1 %1371 }
 0x573   : > { %v1370_v26 = vpop.permute.xlu0 %1369  ;;  %v1386_v29 = vsel %vm235_vm2, %v1384_v27, %v1372_v25 }
 0x574   : > { %v1385_v31 = vsel %vm235_vm2, %v1383_v28, %v1370_v26 }
 0x5e0   : > { %v1733_v21 = vpop.f32.mrb[14].mxu1 }
 0x5e1   : > { %1379 = vrot.lane.b32.xlu1 %v1733_v21, %s1889_s15  ;;  %v1350_v22 = vpop.f32.mrb[15].mxu1 }
 0x5e2   : > { %1377 = vrot.lane.b32.xlu0 %v1350_v22, %s1889_s15 }
 0x653   : > { %v1380_v30 = vpop.permute.xlu1 %1379 }
 0x654   : > { %v1388_v32 = vsel %vm765_vm3, %v1386_v29, %v1380_v30  ;;  %v1378_v33 = vpop.permute.xlu0 %1377 }
 0x655   : > { %v1390_v34 = vsub.f32 %v1388_v32, %v777_v7  ;;  %v1387_v35 = vsel %vm765_vm3, %v1385_v31, %v1378_v33 }
 0x656   : > { %v1389_v36 = vsub.f32 %v1387_v35, %v776_v9 }
 0x657   : > { %v1392_v39 = vmul.f32 0.5, %v1390_v34 }
 0x658   : > { %v1391_v42 = vmul.f32 0.5, %v1389_v36 }
 0x659   : > { %v1394_v40 = vadd.f32 %v1392_v39, %v777_v7 }
 0x65a   : > { %v1393_v43 = vadd.f32 %v1391_v42, %v776_v9  ;;  %1416 = sbr.rel (!%p1930_p5) target bundleno = 1641 (0x669), region = 69 }
 0x65b   : > { %vm1396_vm7 = vcmp.ge.f32.partialorder %v1394_v40, 0.5 }
 0x65c   : > { %v1398_v41 = vsel %vm1396_vm7, 1.0, %v1874_v2  ;;  %vm1395_vm8 = vcmp.ge.f32.partialorder %v1393_v43, 0.5 }
 0x65d   : > { %v1580_v44 = vpack.c.bf16 %v1398_v41, %v1398_v41  ;;  %v1397_v45 = vsel %vm1395_vm8, 1.0, %v1874_v2 }
 0x65e   : > { %v1579_v46 = vpack.c.bf16 %v1397_v45, %v1397_v45 }
 0x65f   : > { %1570 = vst.msk [vmem:[%s2071_s16 + $0xc] sm:$0xf] %vm786_vm5, %v1580_v44 }
 0x660   : > { %1569 = vst.msk [vmem:[%s2071_s16 + $0x8] sm:$0xf] %vm786_vm5, %v1579_v46 }
 0x667   : > { %v1439_v48 = vld [vmem:[%s2071_s16 + $0x8] sm:$0xff]  }
 0x668   : > { %1440 = vst [vmem:[%s1419_s20 + $0x10] sm:$0xff] %v1439_v48  }
 0x669 PF: > { %p8_p10 = scmp.ge.s32.totalorder %s1917_s10, 4   ;;  %s2121_s6 = smov %s1868_s7 }
 0x66a   : > { %s2122_s7 = smov %s1928_s13  ;;  %s2123_s8 = smov %s1917_s10 }
 0x66b   :  { %10 = sbr.rel (!%p8_p10) target bundleno = 2 (0x2), region = 143 }

// kernel: sew_block_linear.13
= control target key start
LH: loop header
LB: loop body
LE: loop exit
PB: predicated region body
PF: predicated region fallthrough
CT: control target
= control target key end

     0   :  { %vm55_vm0 = vcmask 261120   ;;  %v278_v41 = vmov 0.0   ;;  %s399_s1 = inlined_call_operand.vmem [shape: f32[32,32], index: 1, kind: input, shape index: {}]   ;;  %s400_s0 = inlined_call_operand.vmem [shape: bf16[2,32,32], index: 0, kind: input, shape index: {}]   ;;  %s401_s2 = inlined_call_operand.vmem [shape: f32[1,32], index: 2, kind: input, shape index: {}]   ;;  %s402_s3 = inlined_call_operand.vmem [shape: f32[1,32], index: 3, kind: input, shape index: {}]   ;;  %s403_s4 = inlined_call_operand.vmem [shape: f32[2,32,32], index: 4, kind: input, shape index: {}]   ;;  %s404_s5 = inlined_call_operand.vmem [shape: f32[2,32,32], index: 5, kind: output, shape index: {}]  }
   0x1   :  { %v29_v0 = vld [vmem:[%s399_s1] sm:$0xff]  ;;  %v30_v1 = vld [vmem:[%s399_s1 + $0x8] sm:$0xff]  ;;  %v31_v2 = vld [vmem:[%s399_s1 + $0x10] sm:$0xff] }
   0x2   :  { %v33_v3 = vpack.c.bf16 %v30_v1, %v29_v0  ;;  %v32_v4 = vld [vmem:[%s399_s1 + $0x18] sm:$0xff]  ;;  %v274_v6 = vld [vmem:[%s400_s0] sm:$0xff]   ;;  %v276_v7 = vld [vmem:[%s400_s0 + $0x10] sm:$0xff]  }
   0x3   :  { %v34_v5 = vpack.c.bf16 %v32_v4, %v31_v2  ;;  %261 = vmatprep.mubr.msk.bf16.mxu0 %vm55_vm0, %v274_v6  ;;  %265 = vmatprep.mubr.msk.bf16.mxu1 %vm55_vm0, %v276_v7  ;;  %v275_v8 = vld [vmem:[%s400_s0 + $0x8] sm:$0xff]   ;;  %v277_v9 = vld [vmem:[%s400_s0 + $0x18] sm:$0xff]   ;;  %v241_v10 = vld [vmem:[%s401_s2] ss:$0 sm:$0xff] }
   0x4   :  { %257 = vmatprep.subr.bf16.mxu0 %v33_v3  ;;  %269 = vmatprep.subr.bf16.mxu1 %v33_v3  ;;  %v242_v12 = vld [vmem:[%s402_s3] ss:$0 sm:$0xff]  ;;  %v185_v33 = vld [vmem:[%s403_s4 + $0x10] sm:$0xff]  ;;  %v186_v49 = vld [vmem:[%s403_s4 + $0x18] sm:$0xff] }
   0x5   :  { %258 = vmatpush3.bf16.msra.mxu0 %v33_v3  ;;  %271 = vmatpush3.bf16.msra.mxu1 %v33_v3  ;;  %v183_v37 = vld [vmem:[%s403_s4] sm:$0xff]  ;;  %v184_v50 = vld [vmem:[%s403_s4 + $0x8] sm:$0xff]  ;;  %v245_v0 = vld [vmem:[%s403_s4 + $0x30] sm:$0xff] }
   0x6   :  { %259 = vmatprep.subr.bf16.mxu0 %v34_v5  ;;  %270 = vmatprep.subr.bf16.mxu1 %v34_v5  ;;  %v243_v2 = vld [vmem:[%s403_s4 + $0x20] sm:$0xff] }
   0x9   :  { %260 = vmatpush3.bf16.msra.mxu0 %v34_v5  ;;  %272 = vmatpush3.bf16.msra.mxu1 %v34_v5 }
   0xc   :  { %262 = vmatmul.mubr.msk.bf16.vlgmr.msra.gmra.mrb[0].mxu0 %vm55_vm0, %v275_v8  ;;  %266 = vmatmul.mubr.msk.bf16.vlgmr.msra.gmra.mrb[0].mxu1 %vm55_vm0, %v277_v9 }
  0xdf   :  { %v263_v11 = vpop.f32.mrb[0].mxu0  ;;  %v267_v13 = vpop.f32.mrb[0].mxu1 }
  0xe0   :  { %v142_v14 = vmul.f32 %v263_v11, %v241_v10  ;;  %v102_v15 = vpop.f32.mrb[1].mxu0  ;;  %v146_v16 = vmul.f32 %v267_v13, %v241_v10  ;;  %v118_v17 = vpop.f32.mrb[1].mxu1  ;;  %v246_v11 = vld [vmem:[%s403_s4 + $0x38] sm:$0xff] }
  0xe1   :  { %v140_v18 = vmul.f32 %v241_v10, %v102_v15  ;;  %v264_v19 = vpop.f32.mrb[2].mxu0  ;;  %v144_v20 = vmul.f32 %v241_v10, %v118_v17  ;;  %v268_v21 = vpop.f32.mrb[2].mxu1 }
  0xe2   :  { %v157_v22 = vadd.f32 %v242_v12, %v142_v14  ;;  %v143_v23 = vmul.f32 %v264_v19, %v241_v10  ;;  %v105_v24 = vpop.f32.mrb[3].mxu0  ;;  %v147_v25 = vmul.f32 %v268_v21, %v241_v10  ;;  %v121_v26 = vpop.f32.mrb[3].mxu1  ;;  %v161_v31 = vadd.f32 %v242_v12, %v146_v16 }
  0xe3   :  { %v155_v27 = vadd.f32 %v242_v12, %v140_v18  ;;  %v141_v28 = vmul.f32 %v241_v10, %v105_v24  ;;  %v145_v29 = vmul.f32 %v241_v10, %v121_v26  ;;  %v159_v35 = vadd.f32 %v242_v12, %v144_v20 }
  0xe4   :  { %v165_v30 = vmul.f32 0.5, %v157_v22  ;;  %v158_v32 = vadd.f32 %v242_v12, %v143_v23  ;;  %v162_v39 = vadd.f32 %v242_v12, %v147_v25 }
  0xe5   :  { %v163_v34 = vmul.f32 0.5, %v155_v27  ;;  %v156_v36 = vadd.f32 %v242_v12, %v141_v28  ;;  %v160_v40 = vadd.f32 %v242_v12, %v145_v29  ;;  %v244_v12 = vld [vmem:[%s403_s4 + $0x28] sm:$0xff] }
  0xe6   :  { %vm173_vm1 = vcmp.ge.f32.partialorder %v165_v30, 1.0  ;;  %v166_v38 = vmul.f32 0.5, %v158_v32 }
  0xe7   :  { %v177_v42 = vsel %vm173_vm1, 1.0, %v278_v41  ;;  %v181_v43 = vsel %vm173_vm1, 0.0, %v165_v30  ;;  %vm171_vm2 = vcmp.ge.f32.partialorder %v163_v34, 1.0  ;;  %v164_v44 = vmul.f32 0.5, %v156_v36 }
  0xe8   :  { %v189_v45 = vadd.f32 %v185_v33, %v177_v42  ;;  %v175_v46 = vsel %vm171_vm2, 1.0, %v278_v41  ;;  %v179_v47 = vsel %vm171_vm2, 0.0, %v163_v34  ;;  %v197_v48 = vsub.f32 %v161_v31, %v181_v43 }
  0xe9   :  { %v187_v51 = vadd.f32 %v183_v37, %v175_v46  ;;  %vm174_vm3 = vcmp.ge.f32.partialorder %v166_v38, 1.0  ;;  %v195_v52 = vsub.f32 %v159_v35, %v179_v47  ;;  %vm172_vm4 = vcmp.ge.f32.partialorder %v164_v44, 1.0 }
  0xea   :  { %193 = vst.msk [vmem:[%s404_s5 + $0x10] sm:$0xff] %vm55_vm0, %v189_v45  ;;  %v201_v53 = vmul.f32 0.5, %v197_v48  ;;  %v178_v54 = vsel %vm174_vm3, 1.0, %v278_v41  ;;  %v182_v55 = vsel %vm174_vm3, 0.0, %v166_v38  ;;  %v176_v56 = vsel %vm172_vm4, 1.0, %v278_v41 }
  0xeb   :  { %191 = vst.msk [vmem:[%s404_s5] sm:$0xff] %vm55_vm0, %v187_v51  ;;  %v190_v57 = vadd.f32 %v186_v49, %v178_v54  ;;  %v199_v58 = vmul.f32 0.5, %v195_v52  ;;  %v180_v59 = vsel %vm172_vm4, 0.0, %v164_v44  ;;  %v188_v60 = vadd.f32 %v184_v50, %v176_v56 }
  0xec   :  { %v205_v61 = vadd.f32 %v201_v53, %v181_v43  ;;  %v198_v62 = vsub.f32 %v162_v39, %v182_v55  ;;  %v196_v63 = vsub.f32 %v160_v40, %v180_v59 }
  0xed   :  { %194 = vst.msk [vmem:[%s404_s5 + $0x18] sm:$0xff] %vm55_vm0, %v190_v57  ;;  %v203_v1 = vadd.f32 %v199_v58, %v179_v47  ;;  %192 = vst.msk [vmem:[%s404_s5 + $0x8] sm:$0xff] %vm55_vm0, %v188_v60 }
  0xee   :  { %vm209_vm5 = vcmp.ge.f32.partialorder %v205_v61, 1.0  ;;  %v202_v3 = vmul.f32 0.5, %v198_v62  ;;  %v200_v4 = vmul.f32 0.5, %v196_v63 }
  0xef   :  { %v213_v5 = vsel %vm209_vm5, 1.0, %v278_v41  ;;  %vm207_vm6 = vcmp.ge.f32.partialorder %v203_v1, 1.0 }
  0xf0   :  { %v222_v6 = vadd.f32 %v245_v0, %v213_v5  ;;  %v211_v7 = vsel %vm207_vm6, 1.0, %v278_v41  ;;  %v206_v8 = vadd.f32 %v202_v3, %v182_v55  ;;  %v204_v9 = vadd.f32 %v200_v4, %v180_v59 }
  0xf1   :  { %v220_v10 = vadd.f32 %v243_v2, %v211_v7 }
  0xf2   :  { %249 = vst.msk [vmem:[%s404_s5 + $0x30] sm:$0xff] %vm55_vm0, %v222_v6  ;;  %vm210_vm7 = vcmp.ge.f32.partialorder %v206_v8, 1.0  ;;  %vm208_vm8 = vcmp.ge.f32.partialorder %v204_v9, 1.0 }
  0xf3   :  { %247 = vst.msk [vmem:[%s404_s5 + $0x20] sm:$0xff] %vm55_vm0, %v220_v10  ;;  %v214_v13 = vsel %vm210_vm7, 1.0, %v278_v41  ;;  %v212_v14 = vsel %vm208_vm8, 1.0, %v278_v41 }
  0xf4   :  { %v223_v15 = vadd.f32 %v246_v11, %v214_v13  ;;  %v221_v16 = vadd.f32 %v244_v12, %v212_v14 }
  0xf6   :  { %250 = vst.msk [vmem:[%s404_s5 + $0x38] sm:$0xff] %vm55_vm0, %v223_v15  ;;  %248 = vst.msk [vmem:[%s404_s5 + $0x28] sm:$0xff] %vm55_vm0, %v221_v16 }

// kernel: sew_block_linear.15
= control target key start
LH: loop header
LB: loop body
LE: loop exit
PB: predicated region body
PF: predicated region fallthrough
CT: control target
= control target key end

     0   :  { %vm36_vm0 = vcmask 261120   ;;  %v293_v47 = vmov 0.0   ;;  %s377_s1 = inlined_call_operand.vmem [shape: f32[32,128], index: 1, kind: input, shape index: {}]   ;;  %s378_s0 = inlined_call_operand.vmem [shape: f32[2,32,32], index: 0, kind: input, shape index: {}]   ;;  %s379_s2 = inlined_call_operand.vmem [shape: f32[1,128], index: 2, kind: input, shape index: {}]   ;;  %s380_s3 = inlined_call_operand.vmem [shape: f32[1,128], index: 3, kind: input, shape index: {}]   ;;  %s381_s4 = inlined_call_operand.vmem [shape: bf16[2,32,128], index: 4, kind: output, shape index: {}]  }
   0x1   :  { %v30_v0 = vld [vmem:[%s377_s1] sm:$0xff]  ;;  %v31_v1 = vld [vmem:[%s377_s1 + $0x8] sm:$0xff]  ;;  %v32_v2 = vld [vmem:[%s377_s1 + $0x10] sm:$0xff] }
   0x2   :  { %v34_v3 = vpack.c.bf16 %v31_v1, %v30_v0  ;;  %v33_v4 = vld [vmem:[%s377_s1 + $0x18] sm:$0xff]  ;;  %v18_v5 = vld [vmem:[%s378_s0] sm:$0xff]  ;;  %v19_v6 = vld [vmem:[%s378_s0 + $0x8] sm:$0xff] }
   0x3   :  { %v35_v7 = vpack.c.bf16 %v33_v4, %v32_v2  ;;  %v26_v8 = vpack.c.bf16 %v19_v6, %v18_v5  ;;  %v22_v9 = vld [vmem:[%s378_s0 + $0x20] sm:$0xff]  ;;  %v20_v10 = vld [vmem:[%s378_s0 + $0x10] sm:$0xff]  ;;  %v23_v11 = vld [vmem:[%s378_s0 + $0x28] sm:$0xff] }
   0x4   :  { %276 = vmatprep.subr.bf16.mxu0 %v34_v3  ;;  %288 = vmatprep.subr.bf16.mxu1 %v34_v3  ;;  %v21_v12 = vld [vmem:[%s378_s0 + $0x18] sm:$0xff]  ;;  %v28_v13 = vpack.c.bf16 %v23_v11, %v22_v9  ;;  %v24_v14 = vld [vmem:[%s378_s0 + $0x30] sm:$0xff]  ;;  %v233_v18 = vld [vmem:[%s379_s2] ss:$0 sm:$0xff] }
   0x5   :  { %277 = vmatpush3.bf16.msra.mxu0 %v34_v3  ;;  %290 = vmatpush3.bf16.msra.mxu1 %v34_v3  ;;  %v25_v15 = vld [vmem:[%s378_s0 + $0x38] sm:$0xff]  ;;  %v27_v16 = vpack.c.bf16 %v21_v12, %v20_v10  ;;  %v234_v20 = vld [vmem:[%s380_s3] ss:$0 sm:$0xff] }
   0x6   :  { %278 = vmatprep.subr.bf16.mxu0 %v35_v7  ;;  %289 = vmatprep.subr.bf16.mxu1 %v35_v7  ;;  %v29_v17 = vpack.c.bf16 %v25_v15, %v24_v14 }
   0x7   :  { %280 = vmatprep.mubr.msk.bf16.mxu0 %vm36_vm0, %v26_v8  ;;  %284 = vmatprep.mubr.msk.bf16.mxu1 %vm36_vm0, %v28_v13 }
   0x9   :  { %279 = vmatpush3.bf16.msra.mxu0 %v35_v7  ;;  %291 = vmatpush3.bf16.msra.mxu1 %v35_v7 }
   0xc   :  { %281 = vmatmul.mubr.msk.bf16.vlgmr.msra.gmra.mrb[0].mxu0 %vm36_vm0, %v27_v16  ;;  %285 = vmatmul.mubr.msk.bf16.vlgmr.msra.gmra.mrb[0].mxu1 %vm36_vm0, %v29_v17 }
  0xdf   :  { %v282_v19 = vpop.f32.mrb[0].mxu0  ;;  %v286_v21 = vpop.f32.mrb[0].mxu1 }
  0xe0   :  { %v123_v22 = vmul.f32 %v282_v19, %v233_v18  ;;  %v83_v23 = vpop.f32.mrb[1].mxu0  ;;  %v127_v24 = vmul.f32 %v286_v21, %v233_v18  ;;  %v99_v25 = vpop.f32.mrb[1].mxu1 }
  0xe1   :  { %v121_v26 = vmul.f32 %v233_v18, %v83_v23  ;;  %v283_v27 = vpop.f32.mrb[2].mxu0  ;;  %v125_v28 = vmul.f32 %v233_v18, %v99_v25  ;;  %v287_v29 = vpop.f32.mrb[2].mxu1 }
  0xe2   :  { %v138_v30 = vadd.f32 %v234_v20, %v123_v22  ;;  %v124_v31 = vmul.f32 %v283_v27, %v233_v18  ;;  %v86_v32 = vpop.f32.mrb[3].mxu0  ;;  %v128_v33 = vmul.f32 %v287_v29, %v233_v18  ;;  %v102_v34 = vpop.f32.mrb[3].mxu1  ;;  %v142_v39 = vadd.f32 %v234_v20, %v127_v24 }
  0xe3   :  { %v136_v35 = vadd.f32 %v234_v20, %v121_v26  ;;  %v122_v36 = vmul.f32 %v233_v18, %v86_v32  ;;  %v126_v37 = vmul.f32 %v233_v18, %v102_v34  ;;  %v140_v42 = vadd.f32 %v234_v20, %v125_v28 }
  0xe4   :  { %v146_v38 = vmul.f32 0.5, %v138_v30  ;;  %v139_v40 = vadd.f32 %v234_v20, %v124_v31  ;;  %v143_v45 = vadd.f32 %v234_v20, %v128_v33 }
  0xe5   :  { %v144_v41 = vmul.f32 0.5, %v136_v35  ;;  %v137_v43 = vadd.f32 %v234_v20, %v122_v36  ;;  %v141_v46 = vadd.f32 %v234_v20, %v126_v37 }
  0xe6   :  { %vm154_vm1 = vcmp.ge.f32.partialorder %v146_v38, 1.0  ;;  %v147_v44 = vmul.f32 0.5, %v139_v40 }
  0xe7   :  { %v158_v48 = vsel %vm154_vm1, 1.0, %v293_v47  ;;  %v162_v49 = vsel %vm154_vm1, 0.0, %v146_v38  ;;  %vm152_vm2 = vcmp.ge.f32.partialorder %v144_v41, 1.0  ;;  %v145_v50 = vmul.f32 0.5, %v137_v43 }
  0xe8   :  { %v156_v51 = vsel %vm152_vm2, 1.0, %v293_v47  ;;  %v160_v52 = vsel %vm152_vm2, 0.0, %v144_v41  ;;  %v186_v53 = vsub.f32 %v142_v39, %v162_v49  ;;  %vm155_vm3 = vcmp.ge.f32.partialorder %v147_v44, 1.0 }
  0xe9   :  { %v159_v54 = vsel %vm155_vm3, 1.0, %v293_v47  ;;  %v163_v55 = vsel %vm155_vm3, 0.0, %v147_v44  ;;  %v184_v56 = vsub.f32 %v140_v42, %v160_v52  ;;  %vm153_vm4 = vcmp.ge.f32.partialorder %v145_v50, 1.0 }
  0xea   :  { %v190_v57 = vmul.f32 0.5, %v186_v53  ;;  %v259_v58 = vpack.c.bf16 %v159_v54, %v158_v48  ;;  %v157_v59 = vsel %vm153_vm4, 1.0, %v293_v47  ;;  %v161_v60 = vsel %vm153_vm4, 0.0, %v145_v50 }
  0xeb   :  { %v188_v61 = vmul.f32 0.5, %v184_v56  ;;  %v256_v62 = vpack.c.bf16 %v157_v59, %v156_v51  ;;  %v187_v63 = vsub.f32 %v143_v45, %v163_v55  ;;  %v185_v0 = vsub.f32 %v141_v46, %v161_v60 }
  0xec   :  { %v194_v1 = vadd.f32 %v190_v57, %v162_v49  ;;  %267 = vst [vmem:[%s381_s4 + $0x8] sm:$0xff] %v259_v58  }
  0xed   :  { %v192_v2 = vadd.f32 %v188_v61, %v160_v52  ;;  %257 = vst [vmem:[%s381_s4] sm:$0xff] %v256_v62   ;;  %v191_v3 = vmul.f32 0.5, %v187_v63  ;;  %v189_v4 = vmul.f32 0.5, %v185_v0 }
  0xee   :  { %vm198_vm5 = vcmp.ge.f32.partialorder %v194_v1, 1.0 }
  0xef   :  { %vm196_vm6 = vcmp.ge.f32.partialorder %v192_v2, 1.0  ;;  %v195_v5 = vadd.f32 %v191_v3, %v163_v55  ;;  %v193_v6 = vadd.f32 %v189_v4, %v161_v60  ;;  %v202_v7 = vsel %vm198_vm5, 1.0, %v293_v47 }
  0xf0   :  { %v200_v8 = vsel %vm196_vm6, 1.0, %v293_v47 }
  0xf1   :  { %vm199_vm7 = vcmp.ge.f32.partialorder %v195_v5, 1.0  ;;  %vm197_vm8 = vcmp.ge.f32.partialorder %v193_v6, 1.0 }
  0xf2   :  { %v203_v9 = vsel %vm199_vm7, 1.0, %v293_v47  ;;  %v201_v10 = vsel %vm197_vm8, 1.0, %v293_v47 }
  0xf3   :  { %v265_v11 = vpack.c.bf16 %v203_v9, %v202_v7  ;;  %v262_v12 = vpack.c.bf16 %v201_v10, %v200_v8 }
  0xf5   :  { %269 = vst [vmem:[%s381_s4 + $0x18] sm:$0xff] %v265_v11   ;;  %268 = vst [vmem:[%s381_s4 + $0x10] sm:$0xff] %v262_v12  }

// kernel: sew_block_linear.16
= control target key start
LH: loop header
LB: loop body
LE: loop exit
PB: predicated region body
PF: predicated region fallthrough
CT: control target
= control target key end

     0   :  { %vm16_vm0 = vcmask 254976   ;;  %v261_v28 = vmov 0.0   ;;  %vm139_vm1 = vcmask 261120   ;;  %vm191_vm2 = vcmask 1040384   ;;  %s364_s1 = inlined_call_operand.vmem [shape: f32[128,32], index: 1, kind: input, shape index: {}]   ;;  %s365_s0 = inlined_call_operand.vmem [shape: bf16[2,32,128], index: 0, kind: input, shape index: {}]   ;;  %s366_s2 = inlined_call_operand.vmem [shape: f32[2,32], index: 2, kind: output, shape index: {}]  }
   0x1   :  { %v26_v0 = vld [vmem:[%s364_s1] sm:$0xff]  ;;  %v27_v1 = vld [vmem:[%s364_s1 + $0x8] sm:$0xff]  ;;  %v28_v2 = vld [vmem:[%s364_s1 + $0x10] sm:$0xff]  ;;  %17 = vst.msk [vmem:[%s366_s2] sm:$0x3] %vm16_vm0, %v261_v28 }
   0x2   :  { %v42_v3 = vpack.c.bf16 %v27_v1, %v26_v0  ;;  %v29_v4 = vld [vmem:[%s364_s1 + $0x18] sm:$0xff]  ;;  %v30_v6 = vld [vmem:[%s364_s1 + $0x20] sm:$0xff]  ;;  %v31_v7 = vld [vmem:[%s364_s1 + $0x28] sm:$0xff] }
   0x3   :  { %v43_v5 = vpack.c.bf16 %v29_v4, %v28_v2  ;;  %v32_v8 = vld [vmem:[%s364_s1 + $0x30] sm:$0xff]  ;;  %v44_v9 = vpack.c.bf16 %v31_v7, %v30_v6  ;;  %v33_v10 = vld [vmem:[%s364_s1 + $0x38] sm:$0xff]  ;;  %v257_v11 = vld [vmem:[%s365_s0] sm:$0xff]  }
   0x4   :  { %216 = vmatprep.subr.bf16.mxu0 %v42_v3  ;;  %240 = vmatprep.subr.bf16.mxu1 %v42_v3  ;;  %v259_v12 = vld [vmem:[%s365_s0 + $0x10] sm:$0xff]   ;;  %v45_v13 = vpack.c.bf16 %v33_v10, %v32_v8  ;;  %v34_v14 = vld [vmem:[%s364_s1 + $0x40] sm:$0xff]  ;;  %v35_v15 = vld [vmem:[%s364_s1 + $0x48] sm:$0xff] }
   0x5   :  { %217 = vmatpush3.bf16.msra.mxu0 %v42_v3  ;;  %248 = vmatpush3.bf16.msra.mxu1 %v42_v3  ;;  %v46_v16 = vpack.c.bf16 %v35_v15, %v34_v14  ;;  %v36_v17 = vld [vmem:[%s364_s1 + $0x50] sm:$0xff]  ;;  %v37_v18 = vld [vmem:[%s364_s1 + $0x58] sm:$0xff]  ;;  %v38_v20 = vld [vmem:[%s364_s1 + $0x60] sm:$0xff] }
   0x6   :  { %218 = vmatprep.subr.bf16.mxu0 %v43_v5  ;;  %241 = vmatprep.subr.bf16.mxu1 %v43_v5  ;;  %v47_v19 = vpack.c.bf16 %v37_v18, %v36_v17  ;;  %v39_v21 = vld [vmem:[%s364_s1 + $0x68] sm:$0xff]  ;;  %v40_v23 = vld [vmem:[%s364_s1 + $0x70] sm:$0xff]  ;;  %v41_v24 = vld [vmem:[%s364_s1 + $0x78] sm:$0xff] }
   0x7   :  { %232 = vmatprep.mubr.bf16.mxu0 %v257_v11  ;;  %236 = vmatprep.mubr.bf16.mxu1 %v259_v12  ;;  %v48_v22 = vpack.c.bf16 %v39_v21, %v38_v20  ;;  %v49_v25 = vpack.c.bf16 %v41_v24, %v40_v23  ;;  %v258_v26 = vld [vmem:[%s365_s0 + $0x8] sm:$0xff]   ;;  %v260_v27 = vld [vmem:[%s365_s0 + $0x18] sm:$0xff]  }
   0x8   :  { %v190_v23 = vld [vmem:[%s366_s2] sm:$0x3] }
   0x9   :  { %219 = vmatpush3.bf16.msra.mxu0 %v43_v5  ;;  %249 = vmatpush3.bf16.msra.mxu1 %v43_v5 }
   0xa   :  { %220 = vmatprep.subr.bf16.mxu0 %v44_v9  ;;  %242 = vmatprep.subr.bf16.mxu1 %v44_v9 }
   0xd   :  { %221 = vmatpush3.bf16.msra.mxu0 %v44_v9  ;;  %250 = vmatpush3.bf16.msra.mxu1 %v44_v9 }
   0xe   :  { %222 = vmatprep.subr.bf16.mxu0 %v45_v13  ;;  %243 = vmatprep.subr.bf16.mxu1 %v45_v13 }
  0x11   :  { %223 = vmatpush3.bf16.msra.mxu0 %v45_v13  ;;  %251 = vmatpush3.bf16.msra.mxu1 %v45_v13 }
  0x12   :  { %224 = vmatprep.subr.bf16.mxu0 %v46_v16  ;;  %244 = vmatprep.subr.bf16.mxu1 %v46_v16 }
  0x15   :  { %225 = vmatpush3.bf16.msra.mxu0 %v46_v16  ;;  %252 = vmatpush3.bf16.msra.mxu1 %v46_v16 }
  0x16   :  { %226 = vmatprep.subr.bf16.mxu0 %v47_v19  ;;  %245 = vmatprep.subr.bf16.mxu1 %v47_v19 }
  0x19   :  { %227 = vmatpush3.bf16.msra.mxu0 %v47_v19  ;;  %253 = vmatpush3.bf16.msra.mxu1 %v47_v19 }
  0x1a   :  { %228 = vmatprep.subr.bf16.mxu0 %v48_v22  ;;  %246 = vmatprep.subr.bf16.mxu1 %v48_v22 }
  0x1d   :  { %229 = vmatpush3.bf16.msra.mxu0 %v48_v22  ;;  %254 = vmatpush3.bf16.msra.mxu1 %v48_v22 }
  0x1e   :  { %230 = vmatprep.subr.bf16.mxu0 %v49_v25  ;;  %247 = vmatprep.subr.bf16.mxu1 %v49_v25 }
  0x21   :  { %231 = vmatpush3.bf16.msra.mxu0 %v49_v25  ;;  %255 = vmatpush3.bf16.msra.mxu1 %v49_v25 }
  0x24   :  { %233 = vmatmul.mubr.bf16.vlgmr.msra.gmra.mrb[0].mxu0 %v258_v26  ;;  %237 = vmatmul.mubr.bf16.vlgmr.msra.gmra.mrb[0].mxu1 %v260_v27 }
  0xf7   :  { %v234_v29 = vpop.f32.mrb[0].mxu0  ;;  %v238_v30 = vpop.f32.mrb[0].mxu1 }
  0xf8   :  { %v108_v31 = vpop.f32.mrb[1].mxu0  ;;  %v124_v32 = vpop.f32.mrb[1].mxu1  ;;  %v163_v38 = vmul.f32 %v234_v29, %v234_v29  ;;  %v143_v42 = vsel %vm139_vm1, %v234_v29, 0.0  ;;  %v167_v60 = vmul.f32 %v238_v30, %v238_v30  ;;  %v151_v0 = vsel %vm139_vm1, %v238_v30, 0.0 }
  0xf9   :  { %v161_v33 = vmul.f32 %v108_v31, %v108_v31  ;;  %v235_v34 = vpop.f32.mrb[2].mxu0  ;;  %v239_v35 = vpop.f32.mrb[2].mxu1  ;;  %v140_v39 = vsel %vm139_vm1, %v108_v31, 0.0  ;;  %v165_v47 = vmul.f32 %v124_v32, %v124_v32  ;;  %v147_v52 = vsel %vm139_vm1, %v124_v32, 0.0 }
  0xfa   :  { %v111_v36 = vpop.f32.mrb[3].mxu0  ;;  %v127_v37 = vpop.f32.mrb[3].mxu1  ;;  %v164_v45 = vmul.f32 %v235_v34, %v235_v34  ;;  %v172_v50 = vsel %vm139_vm1, %v163_v38, 0.0  ;;  %v145_v51 = vsel %vm139_vm1, %v235_v34, 0.0  ;;  %v168_v1 = vmul.f32 %v239_v35, %v239_v35 }
  0xfb   :  { %v141_v40 = vsel %vm139_vm1, %v111_v36, 0.0  ;;  %v162_v41 = vmul.f32 %v111_v36, %v111_v36  ;;  %v169_v44 = vsel %vm139_vm1, %v161_v33, 0.0  ;;  %v176_v56 = vsel %vm139_vm1, %v165_v47, 0.0 }
  0xfc   :  { %v142_v43 = vadd.f32 %v141_v40, %v140_v39  ;;  %v174_v55 = vsel %vm139_vm1, %v164_v45, 0.0  ;;  %v166_v57 = vmul.f32 %v127_v37, %v127_v37  ;;  %v149_v61 = vsel %vm139_vm1, %v127_v37, 0.0 }
  0xfd   :  { %v170_v46 = vsel %vm139_vm1, %v162_v41, 0.0  ;;  %v180_v5 = vsel %vm139_vm1, %v167_v60, 0.0  ;;  %v153_v6 = vsel %vm139_vm1, %v239_v35, 0.0  ;;  %v182_v9 = vsel %vm139_vm1, %v168_v1, 0.0 }
  0xfe   :  { %v144_v48 = vadd.f32 %v143_v42, %v142_v43  ;;  %v171_v49 = vadd.f32 %v170_v46, %v169_v44  ;;  %v178_v2 = vsel %vm139_vm1, %v166_v57, 0.0 }
 0x100   :  { %v173_v53 = vadd.f32 %v172_v50, %v171_v49  ;;  %v146_v54 = vadd.f32 %v145_v51, %v144_v48 }
 0x102   :  { %v148_v58 = vadd.f32 %v147_v52, %v146_v54  ;;  %v175_v59 = vadd.f32 %v174_v55, %v173_v53 }
 0x104   :  { %v177_v62 = vadd.f32 %v176_v56, %v175_v59  ;;  %v150_v63 = vadd.f32 %v149_v61, %v148_v58 }
 0x106   :  { %v152_v3 = vadd.f32 %v151_v0, %v150_v63  ;;  %v179_v4 = vadd.f32 %v178_v2, %v177_v62 }
 0x108   :  { %v154_v7 = vadd.f32 %v153_v6, %v152_v3  ;;  %v181_v8 = vadd.f32 %v180_v5, %v179_v4 }
 0x10a   :  { %v155_v10 = vrot.slane %v154_v7, 4  ;;  %v183_v11 = vadd.f32 %v182_v9, %v181_v8 }
 0x10c   :  { %v156_v12 = vadd.f32 %v155_v10, %v154_v7  ;;  %v184_v13 = vrot.slane %v183_v11, 4 }
 0x10e   :  { %v157_v14 = vrot.slane %v156_v12, 2  ;;  %v185_v15 = vadd.f32 %v184_v13, %v183_v11 }
 0x110   :  { %v158_v16 = vadd.f32 %v157_v14, %v156_v12  ;;  %v186_v17 = vrot.slane %v185_v15, 2 }
 0x112   :  { %v159_v18 = vrot.slane %v158_v16, 1  ;;  %v187_v19 = vadd.f32 %v186_v17, %v185_v15 }
 0x114   :  { %v188_v20 = vrot.slane %v187_v19, 1  ;;  %v160_v21 = vadd.f32 %v159_v18, %v158_v16 }
 0x116   :  { %v189_v22 = vadd.f32 %v188_v20, %v187_v19 }
 0x118   :  { %v192_v24 = vsel %vm191_vm2, %v160_v21, %v189_v22 }
 0x119   :  { %v193_v25 = vadd.f32 %v192_v24, %v190_v23 }
 0x11b   :  { %195 = vst.msk [vmem:[%s366_s2] sm:$0x3] %vm16_vm0, %v193_v25 }

// kernel: sew_block_linear.17
= control target key start
LH: loop header
LB: loop body
LE: loop exit
PB: predicated region body
PF: predicated region fallthrough
CT: control target
= control target key end

     0   :  { %s494_s0 = inlined_call_operand.vmem [shape: bf16[2,32,128], index: 0, kind: input, shape index: {}]   ;;  %s495_s1 = inlined_call_operand.vmem [shape: f32[128,32], index: 1, kind: input, shape index: {}]   ;;  %s496_s2 = inlined_call_operand.vmem [shape: f32[1,32], index: 2, kind: input, shape index: {}]   ;;  %s497_s3 = inlined_call_operand.vmem [shape: f32[1,32], index: 3, kind: input, shape index: {}]   ;;  %s498_s4 = inlined_call_operand.vmem [shape: f32[2,32,32], index: 4, kind: input, shape index: {}]   ;;  %s499_s5 = inlined_call_operand.hbm [shape: f32[2,32,32], index: 5, kind: output, shape index: {}]  }
   0x1   :  { %v30_v0 = vld [vmem:[%s495_s1] sm:$0xff]  ;;  %v31_v1 = vld [vmem:[%s495_s1 + $0x8] sm:$0xff]  ;;  %v32_v2 = vld [vmem:[%s495_s1 + $0x10] sm:$0xff] }
   0x2   :  { %v46_v3 = vpack.c.bf16 %v31_v1, %v30_v0  ;;  %v33_v4 = vld [vmem:[%s495_s1 + $0x18] sm:$0xff]  ;;  %v34_v6 = vld [vmem:[%s495_s1 + $0x20] sm:$0xff]  ;;  %v35_v7 = vld [vmem:[%s495_s1 + $0x28] sm:$0xff] }
   0x3   :  { %v47_v5 = vpack.c.bf16 %v33_v4, %v32_v2  ;;  %v36_v8 = vld [vmem:[%s495_s1 + $0x30] sm:$0xff]  ;;  %v48_v9 = vpack.c.bf16 %v35_v7, %v34_v6  ;;  %v37_v10 = vld [vmem:[%s495_s1 + $0x38] sm:$0xff]  ;;  %v322_v11 = vld [vmem:[%s494_s0] sm:$0xff]  }
   0x4   :  { %278 = vmatprep.subr.bf16.mxu0 %v46_v3  ;;  %302 = vmatprep.subr.bf16.mxu1 %v46_v3  ;;  %v324_v12 = vld [vmem:[%s494_s0 + $0x10] sm:$0xff]   ;;  %v49_v13 = vpack.c.bf16 %v37_v10, %v36_v8 }
   0x5   :  { %279 = vmatpush3.bf16.msra.mxu0 %v46_v3  ;;  %310 = vmatpush3.bf16.msra.mxu1 %v46_v3 }
   0x6   :  { %280 = vmatprep.subr.bf16.mxu0 %v47_v5  ;;  %303 = vmatprep.subr.bf16.mxu1 %v47_v5 }
   0x9   :  { %281 = vmatpush3.bf16.msra.mxu0 %v47_v5  ;;  %311 = vmatpush3.bf16.msra.mxu1 %v47_v5 }
   0xa   :  { %282 = vmatprep.subr.bf16.mxu0 %v48_v9  ;;  %304 = vmatprep.subr.bf16.mxu1 %v48_v9 }
   0xb   :  { %10 = vsyncpa [#allocation3], 0  ;;  %v38_v14 = vld [vmem:[%s495_s1 + $0x40] sm:$0xff]  ;;  %v39_v15 = vld [vmem:[%s495_s1 + $0x48] sm:$0xff]  ;;  %294 = vmatprep.mubr.bf16.mxu0 %v322_v11  ;;  %298 = vmatprep.mubr.bf16.mxu1 %v324_v12  ;;  %vm201_vm0 = vcmask 261120   ;;  %v350_v59 = vmov 0.0  }
   0xc   :  { %v50_v16 = vpack.c.bf16 %v39_v15, %v38_v14  ;;  %v40_v17 = vld [vmem:[%s495_s1 + $0x50] sm:$0xff]  ;;  %v41_v18 = vld [vmem:[%s495_s1 + $0x58] sm:$0xff]  ;;  %v42_v20 = vld [vmem:[%s495_s1 + $0x60] sm:$0xff]  ;;  %s351_s24 = smov [#allocation2]  }
   0xd   :  { %283 = vmatpush3.bf16.msra.mxu0 %v48_v9  ;;  %312 = vmatpush3.bf16.msra.mxu1 %v48_v9  ;;  %v51_v19 = vpack.c.bf16 %v41_v18, %v40_v17  ;;  %v43_v21 = vld [vmem:[%s495_s1 + $0x68] sm:$0xff]  ;;  %v44_v23 = vld [vmem:[%s495_s1 + $0x70] sm:$0xff]  ;;  %v45_v24 = vld [vmem:[%s495_s1 + $0x78] sm:$0xff]  ;;  %s245_s25 = sshll.u32 %s351_s24, 4  ;;  %s246_s25 = int_to_ptr.vmem [resolvable:$true] %s245_s25 }
   0xe   :  { %284 = vmatprep.subr.bf16.mxu0 %v49_v13  ;;  %305 = vmatprep.subr.bf16.mxu1 %v49_v13  ;;  %v52_v22 = vpack.c.bf16 %v43_v21, %v42_v20  ;;  %v53_v25 = vpack.c.bf16 %v45_v24, %v44_v23  ;;  %v323_v26 = vld [vmem:[%s494_s0 + $0x8] sm:$0xff]   ;;  %v325_v27 = vld [vmem:[%s494_s0 + $0x18] sm:$0xff]   ;;  %v260_v28 = vld [vmem:[%s496_s2] ss:$0 sm:$0xff]  ;;  %s326_s26 = scalar_lea.vmem %s246_s25, 1024  ;;  %p331_p1 = scmp.lt.s32.totalorder %s246_s25, %s246_s25 }
   0xf   :  { %v261_v30 = vld [vmem:[%s497_s3] ss:$0 sm:$0xff]  ;;  %v195_v51 = vld [vmem:[%s498_s4 + $0x10] sm:$0xff]  ;;  %v196_v3 = vld [vmem:[%s498_s4 + $0x18] sm:$0xff]  ;;  %p327_p0 = scmp.ne.s32.totalorder %s246_s25, %s326_s26  ;;  %p332_p2 = scmp.lt.s32.totalorder %s326_s26, %s326_s26 }
  0x10   :  { %v193_v55 = vld [vmem:[%s498_s4] sm:$0xff]  ;;  %v194_v4 = vld [vmem:[%s498_s4 + $0x8] sm:$0xff]  ;;  %v264_v18 = vld [vmem:[%s498_s4 + $0x30] sm:$0xff] }
  0x11   :  { %285 = vmatpush3.bf16.msra.mxu0 %v49_v13  ;;  %313 = vmatpush3.bf16.msra.mxu1 %v49_v13  ;;  %v262_v20 = vld [vmem:[%s498_s4 + $0x20] sm:$0xff]  ;;  %p333_p3 = por %p332_p2, %p331_p1 }
  0x12   :  { %286 = vmatprep.subr.bf16.mxu0 %v50_v16  ;;  %306 = vmatprep.subr.bf16.mxu1 %v50_v16 }
  0x13   :  { %p334_p4 = pnand %p333_p3, %p327_p0 }
  0x15   :  { %287 = vmatpush3.bf16.msra.mxu0 %v50_v16  ;;  %314 = vmatpush3.bf16.msra.mxu1 %v50_v16 }
  0x16   :  { %288 = vmatprep.subr.bf16.mxu0 %v51_v19  ;;  %307 = vmatprep.subr.bf16.mxu1 %v51_v19 }
  0x19   :  { %289 = vmatpush3.bf16.msra.mxu0 %v51_v19  ;;  %315 = vmatpush3.bf16.msra.mxu1 %v51_v19 }
  0x1a   :  { %290 = vmatprep.subr.bf16.mxu0 %v52_v22  ;;  %308 = vmatprep.subr.bf16.mxu1 %v52_v22 }
  0x1d   :  { %291 = vmatpush3.bf16.msra.mxu0 %v52_v22  ;;  %316 = vmatpush3.bf16.msra.mxu1 %v52_v22 }
  0x1e   :  { %292 = vmatprep.subr.bf16.mxu0 %v53_v25  ;;  %309 = vmatprep.subr.bf16.mxu1 %v53_v25 }
  0x21   :  { %293 = vmatpush3.bf16.msra.mxu0 %v53_v25  ;;  %317 = vmatpush3.bf16.msra.mxu1 %v53_v25 }
  0x24   :  { %295 = vmatmul.mubr.bf16.vlgmr.msra.gmra.mrb[0].mxu0 %v323_v26  ;;  %299 = vmatmul.mubr.bf16.vlgmr.msra.gmra.mrb[0].mxu1 %v325_v27 }
  0xf7   :  { %v296_v29 = vpop.f32.mrb[0].mxu0  ;;  %v300_v31 = vpop.f32.mrb[0].mxu1 }
  0xf8   :  { %v152_v32 = vmul.f32 %v296_v29, %v260_v28  ;;  %v112_v33 = vpop.f32.mrb[1].mxu0  ;;  %v156_v34 = vmul.f32 %v300_v31, %v260_v28  ;;  %v128_v35 = vpop.f32.mrb[1].mxu1  ;;  %v265_v29 = vld [vmem:[%s498_s4 + $0x38] sm:$0xff] }
  0xf9   :  { %v150_v36 = vmul.f32 %v260_v28, %v112_v33  ;;  %v297_v37 = vpop.f32.mrb[2].mxu0  ;;  %v154_v38 = vmul.f32 %v260_v28, %v128_v35  ;;  %v301_v39 = vpop.f32.mrb[2].mxu1 }
  0xfa   :  { %v167_v40 = vadd.f32 %v261_v30, %v152_v32  ;;  %v153_v41 = vmul.f32 %v297_v37, %v260_v28  ;;  %v115_v42 = vpop.f32.mrb[3].mxu0  ;;  %v157_v43 = vmul.f32 %v301_v39, %v260_v28  ;;  %v131_v44 = vpop.f32.mrb[3].mxu1  ;;  %v171_v49 = vadd.f32 %v261_v30, %v156_v34 }
  0xfb   :  { %v165_v45 = vadd.f32 %v261_v30, %v150_v36  ;;  %v151_v46 = vmul.f32 %v260_v28, %v115_v42  ;;  %v155_v47 = vmul.f32 %v260_v28, %v131_v44  ;;  %v169_v53 = vadd.f32 %v261_v30, %v154_v38 }
  0xfc   :  { %v175_v48 = vmul.f32 0.5, %v167_v40  ;;  %v168_v50 = vadd.f32 %v261_v30, %v153_v41  ;;  %v172_v57 = vadd.f32 %v261_v30, %v157_v43 }
  0xfd   :  { %v173_v52 = vmul.f32 0.5, %v165_v45  ;;  %v166_v54 = vadd.f32 %v261_v30, %v151_v46  ;;  %v170_v58 = vadd.f32 %v261_v30, %v155_v47  ;;  %v263_v30 = vld [vmem:[%s498_s4 + $0x28] sm:$0xff] }
  0xfe   :  { %vm183_vm1 = vcmp.ge.f32.partialorder %v175_v48, 1.0  ;;  %v176_v56 = vmul.f32 0.5, %v168_v50 }
  0xff   :  { %v187_v60 = vsel %vm183_vm1, 1.0, %v350_v59  ;;  %v191_v61 = vsel %vm183_vm1, 0.0, %v175_v48  ;;  %vm181_vm2 = vcmp.ge.f32.partialorder %v173_v52, 1.0  ;;  %v174_v62 = vmul.f32 0.5, %v166_v54 }
 0x100   :  { %v199_v63 = vadd.f32 %v195_v51, %v187_v60  ;;  %v185_v0 = vsel %vm181_vm2, 1.0, %v350_v59  ;;  %v189_v1 = vsel %vm181_vm2, 0.0, %v173_v52  ;;  %v208_v2 = vsub.f32 %v171_v49, %v191_v61 }
 0x101   :  { %v197_v5 = vadd.f32 %v193_v55, %v185_v0  ;;  %vm184_vm3 = vcmp.ge.f32.partialorder %v176_v56, 1.0  ;;  %v206_v6 = vsub.f32 %v169_v53, %v189_v1  ;;  %vm182_vm4 = vcmp.ge.f32.partialorder %v174_v62, 1.0 }
 0x102   :  { %204 = vst.msk [vmem:[#allocation2 + $0x10] sm:$0xff] %vm201_vm0, %v199_v63  ;;  %v212_v7 = vmul.f32 0.5, %v208_v2  ;;  %v188_v8 = vsel %vm184_vm3, 1.0, %v350_v59  ;;  %v192_v9 = vsel %vm184_vm3, 0.0, %v176_v56  ;;  %v186_v10 = vsel %vm182_vm4, 1.0, %v350_v59 }
 0x103   :  { %202 = vst.msk [vmem:[#allocation2] sm:$0xff] %vm201_vm0, %v197_v5  ;;  %v200_v11 = vadd.f32 %v196_v3, %v188_v8  ;;  %v210_v12 = vmul.f32 0.5, %v206_v6  ;;  %v190_v13 = vsel %vm182_vm4, 0.0, %v174_v62  ;;  %v198_v14 = vadd.f32 %v194_v4, %v186_v10 }
 0x104   :  { %v216_v15 = vadd.f32 %v212_v7, %v191_v61  ;;  %v209_v16 = vsub.f32 %v172_v57, %v192_v9  ;;  %v207_v17 = vsub.f32 %v170_v58, %v190_v13 }
 0x105   :  { %205 = vst.msk [vmem:[#allocation2 + $0x18] sm:$0xff] %vm201_vm0, %v200_v11  ;;  %v214_v19 = vadd.f32 %v210_v12, %v189_v1  ;;  %203 = vst.msk [vmem:[#allocation2 + $0x8] sm:$0xff] %vm201_vm0, %v198_v14 }
 0x106   :  { %vm220_vm5 = vcmp.ge.f32.partialorder %v216_v15, 1.0  ;;  %v213_v21 = vmul.f32 0.5, %v209_v16  ;;  %v211_v22 = vmul.f32 0.5, %v207_v17 }
 0x107   :  { %v224_v23 = vsel %vm220_vm5, 1.0, %v350_v59  ;;  %vm218_vm6 = vcmp.ge.f32.partialorder %v214_v19, 1.0 }
 0x108   :  { %v233_v24 = vadd.f32 %v264_v18, %v224_v23  ;;  %v222_v25 = vsel %vm218_vm6, 1.0, %v350_v59  ;;  %v217_v26 = vadd.f32 %v213_v21, %v192_v9  ;;  %v215_v27 = vadd.f32 %v211_v22, %v190_v13 }
 0x109   :  { %v231_v28 = vadd.f32 %v262_v20, %v222_v25 }
 0x10a   :  { %238 = vst.msk [vmem:[#allocation2 + $0x30] sm:$0xff] %vm201_vm0, %v233_v24  ;;  %vm221_vm7 = vcmp.ge.f32.partialorder %v217_v26, 1.0  ;;  %vm219_vm8 = vcmp.ge.f32.partialorder %v215_v27, 1.0 }
 0x10b   :  { %236 = vst.msk [vmem:[#allocation2 + $0x20] sm:$0xff] %vm201_vm0, %v231_v28  ;;  %v225_v31 = vsel %vm221_vm7, 1.0, %v350_v59  ;;  %v223_v32 = vsel %vm219_vm8, 1.0, %v350_v59 }
 0x10c   :  { %v234_v33 = vadd.f32 %v265_v29, %v225_v31  ;;  %v232_v34 = vadd.f32 %v263_v30, %v223_v32 }
 0x10e   :  { %239 = vst.msk [vmem:[#allocation2 + $0x38] sm:$0xff] %vm201_vm0, %v234_v33  ;;  %237 = vst.msk [vmem:[#allocation2 + $0x28] sm:$0xff] %vm201_vm0, %v232_v34 }
 0x10f   :  { %337 = shalt.err (!%p334_p4)
}
 0x110   :  { %s338_s28 = scalar_lea.hbm %s499_s5, 1024 }
 0x111   :  { %p339_p5 = scmp.ne.s32.totalorder %s499_s5, %s338_s28  ;;  %p342_p6 = scmp.lt.u32.totalorder %s338_s28, %s499_s5 }
 0x113   :  { %p344_p7 = pnand %p342_p6, %p339_p5 }
 0x115   :  { %347 = shalt.err (!%p344_p7)
}
 0x116   :  { %s352_s1 = smov 128   ;;  %s353_s8 = smov 8  }
 0x117   :  { %251 = dma.vmem_to_hbm [thread:$0]  %s246_s25, 1024, %s499_s5, [#allocation3], %s352_s1, %s352_s1, %s353_s8  }
 0x118   :  { %348 = dma.done.wait [#allocation3], 1024  }
 0x119   :  { %349 = vsyncadd [#allocation3], 4294966272 }
 0x11a   :  { %255 = vsyncpa [#allocation3], 1 }

</bundles_post_ra>
